<compile_context>
chip_gen: v5e
topology: v5e:2x2
jax: 0.10.0
libtpu: 0.0.40
codegen_flags: <defaults>
</compile_context>

<pallas_src>
import functools

import numpy as np
import jax
import jax.numpy as jnp
from jax.experimental import pallas as pl
from jax.experimental.pallas import tpu as pltpu

PAR = 4           # 2x2 space-to-depth parities, index = a*2 + b
_BIAS_ROWS = 8    # all-ones block appended to xcol (keeps sublane concat 8-aligned)
TAP9 = ((-1, -1), (-1, 0), (-1, 1),
        (0, -1), (0, 0), (0, 1),
        (1, -1), (1, 0), (1, 1))


# ----------------------------------------------------------------------------
# In-kernel helpers (everything is (rows, lanes) f32, lanes = frames*H1*W1 block)
# ----------------------------------------------------------------------------
def _lane_roll(x, shift):
    """out[..., p] = x[..., (p - shift) % L]  (== jnp.roll along the lane axis)."""
    if shift == 0:
        return x
    if hasattr(pltpu, "roll"):
        return pltpu.roll(x, shift, axis=1)       # XLU rotate; co-issues with VPU work
    return jnp.concatenate([x[:, -shift:], x[:, :-shift]], axis=1)


def _tap_maps(x, masks, w1):
    """All 9 shifted+masked tap maps of x — built once per tensor and reused.

    Tap (dy, dx): map[p] = x[p + dy*w1 + dx] with out-of-bounds zeroed by `masks`
    (masks are identical for every lane block because LB is a multiple of H1*W1).
    The centre tap skips both the roll and the mask multiply.
    """
    lanes = x.shape[-1]
    maps = []
    for t, (dy, dx) in enumerate(TAP9):
        if dy == 0 and dx == 0:
            maps.append(x)
        else:
            d = dy * w1 + dx
            maps.append(_lane_roll(x, (-d) % lanes) * masks[t:t + 1, :])
    return maps


def _lstm_update(gates, c, m):
    """ConvLSTM gate fusion; gate blocks are contiguous, sublane-aligned row slices."""
    ch = c.shape[0]
    gi = jax.nn.sigmoid(gates[0 * ch:1 * ch, :])
    gf = jax.nn.sigmoid(gates[1 * ch:2 * ch, :])
    gg = jnp.tanh(gates[2 * ch:3 * ch, :])
    go = jax.nn.sigmoid(gates[3 * ch:4 * ch, :])
    c_new = gf * c + gi * gg
    # TODO(synk): exact spatio-temporal memory (m) update of the original ConvLSTMCell
    # is unavailable (source not provided); a same-form update is used.
    m_new = gf * m + gi * gg
    h_new = go * jnp.tanh(c_new)
    return h_new, c_new, m_new


# ----------------------------------------------------------------------------
# The fused multi-step kernel.  Grid = (lane_blocks "parallel", step "arbitrary").
# Per step (all VMEM resident, exactly 5 MXU matmuls):
#   M1 [enc + l0 gates] -> lstm0 -> M2 [l1 gates] -> lstm1 -> M3 [dec1+up]
#   -> M4 [skip 1x1] -> M5 [dec0] -> Euler residual + abs.
# ----------------------------------------------------------------------------
def _phycr_seq_kernel(x0_ref, masks_ref, absmask_ref,
                      wA_ref, w1g_ref, wd1_ref, wsc_ref, wd0_ref,
                      out_ref, h1o_ref, c1o_ref, m1o_ref,
                      h0o_ref, c0o_ref, m0o_ref,
                      x_sc, h1_sc, c1_sc, m1_sc, h0_sc, c0_sc, m0_sc,
                      *, w1, dt, n_enc, capture_step, use_bf16):
    t = pl.program_id(1)

    # t == 0: load the initial input and zero the carried (h, c, m) states.
    # TODO(synk): init_hidden_tensor semantics of the original ConvLSTMCell are
    # unavailable; zero-initialized states are used.
    @pl.when(t == 0)
    def _init():
        x_sc[...] = x0_ref[...]
        for ref in (h1_sc, c1_sc, m1_sc, h0_sc, c0_sc, m0_sc):
            ref[...] = jnp.zeros(ref.shape, ref.dtype)

    masks = masks_ref[...]
    x = x_sc[...]                                     # s2d of the step input (residual base)
    h1 = h1_sc[...]; c1 = c1_sc[...]; m1 = m1_sc[...]
    h0 = h0_sc[...]; c0 = c0_sc[...]; m0 = m0_sc[...]

    lanes = x.shape[-1]
    ones = jnp.ones((_BIAS_ROWS, lanes), jnp.float32)  # bias rows (biases folded into W)

    def mm(w_ref, col):
        if use_bf16:
            col = col.astype(jnp.bfloat16)            # weights pre-cast on the host
        return jnp.dot(w_ref[...], col, preferred_element_type=jnp.float32)

    # --- M1: stride-2 encoder + level-0 ConvLSTM gates (x-path | h-path fused) ---
    col_a = jnp.concatenate(
        _tap_maps(x, masks, w1) + _tap_maps(h0, masks, w1) + [ones], axis=0)
    y_a = mm(wA_ref, col_a)
    x1 = jnp.maximum(y_a[:n_enc, :], 0.0)             # encoder output (coarse res) + ReLU
    h0n, c0n, m0n = _lstm_update(y_a[n_enc:, :], c0, m0)

    # --- M2: level-1 ConvLSTM gates (x-path | h-path fused) ---
    col_b = jnp.concatenate(
        _tap_maps(x1, masks, w1) + _tap_maps(h1, masks, w1) + [ones], axis=0)
    h1n, c1n, m1n = _lstm_update(mm(w1g_ref, col_b), c1, m1)

    # --- M3: level-1 decoder; nearest-2x upsample folded into the weights (s2d output) ---
    col_c = jnp.concatenate(_tap_maps(h1n, masks, w1) + [ones], axis=0)
    xdec = jnp.maximum(mm(wd1_ref, col_c), 0.0)

    # --- M4: skip concat [lstm | decoder] + 1x1 sc_output ---
    xf = mm(wsc_ref, jnp.concatenate([h0n, xdec, ones], axis=0))

    # --- M5: level-0 decoder ---
    col_e = jnp.concatenate(_tap_maps(xf, masks, w1) + [ones], axis=0)
    dx = mm(wd0_ref, col_e)

    # --- Euler residual + abs() on channels {0, 3} via a host-precomputed 0/1 row mask ---
    am = absmask_ref[...]
    y = x + dt * dx
    y = am * jnp.abs(y) + (1.0 - am) * y

    x_sc[...] = y
    out_ref[...] = y
    h1_sc[...] = h1n; c1_sc[...] = c1n; m1_sc[...] = m1n
    h0_sc[...] = h0n; c0_sc[...] = c0n; m0_sc[...] = m0n

    # States at step == step-2 (PyTorch "second_last_states"): held in the output's VMEM
    # block (constant index along time) and written back to HBM once per lane block.
    @pl.when(t == capture_step)
    def _capture():
        h1o_ref[...] = h1n; c1o_ref[...] = c1n; m1o_ref[...] = m1n
        h0o_ref[...] = h0n; c0o_ref[...] = c0n; m0o_ref[...] = m0n


# ----------------------------------------------------------------------------
# Host-side weight algebra: canonical (Cout, Cin, KH, KW) conv weights ->
# tap-batched matrices (im2col / space-to-depth), biases folded as extra columns.
# ----------------------------------------------------------------------------
def _native_conv_mat(w):
    """3x3 pad-1 stride-1 conv at native (coarse) resolution: (Cout, 9*Cin), TAP9 order."""
    w = np.asarray(w, np.float32)
    cout, cin = w.shape[0], w.shape[1]
    m = np.zeros((cout, len(TAP9) * cin), np.float32)
    for t, (dy, dx) in enumerate(TAP9):
        m[:, t * cin:(t + 1) * cin] = w[:, :, dy + 1, dx + 1]
    return m


def _s2d_conv_mat(w):
    """Full-res 3x3 pad-1 stride-1 conv expressed on 2x2 space-to-depth maps."""
    w = np.asarray(w, np.float32)
    cout, cin = w.shape[0], w.shape[1]
    m = np.zeros((PAR * cout, len(TAP9) * PAR * cin), np.float32)
    for co in range(cout):
        for ci in range(cin):
            for a in range(2):
                for b in range(2):
                    for kh in range(3):
                        for kw in range(3):
                            vy, vx = a + kh - 1, b + kw - 1
                            qh, ap = vy // 2, vy % 2
                            qw, bp = vx // 2, vx % 2
                            t = TAP9.index((qh, qw))
                            m[co * PAR + a * 2 + b,
                              t * PAR * cin + ci * PAR + ap * 2 + bp] += w[co, ci, kh, kw]
    return m


def _enc_s2d_mat9(w):
    """3x3 pad-1 STRIDE-2 conv on s2d maps -> coarse output, columns in TAP9 layout
    so the encoder shares the tap maps of x with the level-0 gate conv."""
    w = np.asarray(w, np.float32)
    cout, cin = w.shape[0], w.shape[1]
    m = np.zeros((cout, len(TAP9) * PAR * cin), np.float32)
    for co in range(cout):
        for ci in range(cin):
            for kh in range(3):
                for kw in range(3):
                    vy, vx = kh - 1, kw - 1
                    qh, a = vy // 2, vy % 2
                    qw, b = vx // 2, vx % 2
                    t = TAP9.index((qh, qw))
                    m[co, t * PAR * cin + ci * PAR + a * 2 + b] += w[co, ci, kh, kw]
    return m


def _upconv_s2d_mat(w):
    """nearest-2x upsample followed by 3x3 pad-1 conv: coarse input -> s2d output maps."""
    w = np.asarray(w, np.float32)
    cout, cin = w.shape[0], w.shape[1]
    m = np.zeros((PAR * cout, len(TAP9) * cin), np.float32)
    for co in range(cout):
        for ci in range(cin):
            for a in range(2):
                for b in range(2):
                    for kh in range(3):
                        for kw in range(3):
                            qh = (a + kh - 1) // 2
                            qw = (b + kw - 1) // 2
                            t = TAP9.index((qh, qw))
                            m[co * PAR + a * 2 + b, t * cin + ci] += w[co, ci, kh, kw]
    return m


def _pw_s2d_mat(w):
    """1x1 conv on s2d maps: block-diagonal over the 4 parities (kron with I4)."""
    w = np.asarray(w, np.float32)[:, :, 0, 0]
    return np.kron(w, np.eye(PAR, dtype=np.float32)).astype(np.float32)


def _s2d_bias_vec(b):
    return np.repeat(np.asarray(b, np.float32), PAR)


def _with_bias_cols(m, b):
    """Append _BIAS_ROWS columns; column 0 carries the bias (matches the ones block)."""
    pad = np.zeros((m.shape[0], _BIAS_ROWS), np.float32)
    pad[:, 0] = np.asarray(b, np.float32)
    return np.concatenate([m, pad], axis=1)


def build_fused_mats(params, dtype):
    c_in = params['lstm0_wx'].shape[1]
    ch0 = params['lstm0_wh'].shape[1]
    ch1 = params['lstm1_wh'].shape[1]
    n_enc = params['enc10_w'].shape[0]
    cin1 = params['lstm1_wx'].shape[1]

    # W_A: rows [encoder | level-0 gates], cols [taps9(x) | taps9(h0) | bias block]
    nx, nh = 9 * PAR * c_in, 9 * PAR * ch0
    wA = np.zeros((n_enc + 4 * PAR * ch0, nx + nh + _BIAS_ROWS), np.float32)
    wA[:n_enc, :nx] = _enc_s2d_mat9(params['enc10_w'])
    wA[:n_enc, nx + nh] = np.asarray(params['enc10_b'], np.float32)
    wA[n_enc:, :nx] = _s2d_conv_mat(params['lstm0_wx'])
    wA[n_enc:, nx:nx + nh] = _s2d_conv_mat(params['lstm0_wh'])
    wA[n_enc:, nx + nh] = _s2d_bias_vec(params['lstm0_bx'])

    # W_1g: level-1 gates, cols [taps9(x1) | taps9(h1) | bias block]
    nx1, nh1 = 9 * cin1, 9 * ch1
    w1g = np.zeros((4 * ch1, nx1 + nh1 + _BIAS_ROWS), np.float32)
    w1g[:, :nx1] = _native_conv_mat(params['lstm1_wx'])
    w1g[:, nx1:nx1 + nh1] = _native_conv_mat(params['lstm1_wh'])
    w1g[:, nx1 + nh1] = np.asarray(params['lstm1_bx'], np.float32)

    wd1 = _with_bias_cols(_upconv_s2d_mat(params['dec12_w']), _s2d_bias_vec(params['dec12_b']))
    wsc = _with_bias_cols(_pw_s2d_mat(params['sc01_w']), _s2d_bias_vec(params['sc01_b']))
    wd0 = _with_bias_cols(_s2d_conv_mat(params['dec02_w']), _s2d_bias_vec(params['dec02_b']))

    mats = {'wA': wA, 'w1g': w1g, 'wd1': wd1, 'wsc': wsc, 'wd0': wd0}
    return {k: jnp.asarray(v, dtype) for k, v in mats.items()}


def _build_tap_masks(lanes, h1, w1):
    """(9, lanes) boundary masks for the shift-based taps, TAP9 order."""
    hw1 = h1 * w1
    p = np.arange(lanes)
    row = (p % hw1) // w1
    col = p % w1
    m = np.zeros((len(TAP9), lanes), np.float32)
    for t, (dy, dx) in enumerate(TAP9):
        m[t] = ((row + dy >= 0) & (row + dy < h1) &
                (col + dx >= 0) & (col + dx < w1)).astype(np.float32)
    return m


def _abs_row_mask(c):
    """(PAR*C, 1) 0/1 mask: abs() applied to channels {0, 3} (s2d row = ch*4 + parity)."""
    m = np.zeros((PAR * c, 1), np.float32)
    for ch in (0, 3):
        m[ch * PAR:(ch + 1) * PAR, 0] = 1.0
    return m


# ----------------------------------------------------------------------------
# Device-dependent choices.
# ----------------------------------------------------------------------------
def _device_kind():
    try:
        return jax.devices()[0].device_kind.lower()
    except Exception:
        return ""


def _has_multiple_tensorcores():
    # v7x (and v4/v5p megacore) expose 2 TensorCores; v5e/v6e are single-TC, where a
    # lane split is a pure serial loop and only costs per-iteration overhead.
    k = _device_kind()
    return any(s in k for s in ("v7", "7x", "v4", "v5p"))


def _mxu_prefers_bf16():
    # bf16 MXU inputs on v6e/v7x (f32 accumulation, f32 elementwise); keep f32 elsewhere.
    k = _device_kind()
    return any(s in k for s in ("v6", "v7", "7x"))


# ----------------------------------------------------------------------------
# pallas_call builder.
# ----------------------------------------------------------------------------
_MAT_KEYS = ('wA', 'w1g', 'wd1', 'wsc', 'wd0')


def _build_run_fn(mats, masks, absmask, *, L, LB, n_blocks, w1, dt, step,
                  c_in, ch1, ch0, n_enc, use_bf16):
    capture_step = max(step - 2, 0)
    kernel = functools.partial(
        _phycr_seq_kernel, w1=w1, dt=float(dt), n_enc=n_enc,
        capture_step=capture_step, use_bf16=use_bf16)

    const_arrays = [masks, absmask] + [mats[k] for k in _MAT_KEYS]

    def dspec(rows):
        return pl.BlockSpec((rows, LB), lambda l, t: (0, l))

    def cspec(shape):
        return pl.BlockSpec(tuple(shape), lambda l, t: (0, 0))

    in_specs = [dspec(PAR * c_in)] + [cspec(a.shape) for a in const_arrays]

    out_shapes = (
        jax.ShapeDtypeStruct((step, PAR * c_in, L), jnp.float32),   # x at every step
        jax.ShapeDtypeStruct((ch1, L), jnp.float32),                # h1 @ step-2
        jax.ShapeDtypeStruct((ch1, L), jnp.float32),                # c1
        jax.ShapeDtypeStruct((ch1, L), jnp.float32),                # m1
        jax.ShapeDtypeStruct((PAR * ch0, L), jnp.float32),          # h0
        jax.ShapeDtypeStruct((PAR * ch0, L), jnp.float32),          # c0
        jax.ShapeDtypeStruct((PAR * ch0, L), jnp.float32),          # m0
    )
    out_specs = (
        pl.BlockSpec((None, PAR * c_in, LB), lambda l, t: (t, 0, l)),
        dspec(ch1), dspec(ch1), dspec(ch1),
        dspec(PAR * ch0), dspec(PAR * ch0), dspec(PAR * ch0),
    )
    scratch_shapes = [
        pltpu.VMEM((PAR * c_in, LB), jnp.float32),   # x carried across steps
        pltpu.VMEM((ch1, LB), jnp.float32),          # h1
        pltpu.VMEM((ch1, LB), jnp.float32),          # c1
        pltpu.VMEM((ch1, LB), jnp.float32),          # m1
        pltpu.VMEM((PAR * ch0, LB), jnp.float32),    # h0
        pltpu.VMEM((PAR * ch0, LB), jnp.float32),    # c0
        pltpu.VMEM((PAR * ch0, LB), jnp.float32),    # m0
    ]

    # VMEM budget: only raise the scoped limit when the live set needs it (relevant when
    # scaling H/W/B/T on v7x, whose scoped default is 32 MiB / physical 64 MiB).
    elem = 2 if use_bf16 else 4
    xcol_rows = 9 * PAR * c_in + 9 * PAR * ch0 + _BIAS_ROWS
    est = 2 * xcol_rows * LB * 4
    est += sum(int(np.prod(mats[k].shape)) * elem for k in _MAT_KEYS)
    est += 4 * LB * 4 * (3 * PAR * c_in + 3 * ch1 + 3 * PAR * ch0)
    vmem_limit = int(min(est * 2, 100 * 1024 * 1024)) if est > 24 * 1024 * 1024 else None

    call = pl.pallas_call(
        kernel,
        out_shape=out_shapes,
        grid=(n_blocks, step),                       # time is the inner ("arbitrary") axis
        in_specs=in_specs,
        out_specs=out_specs,
        scratch_shapes=scratch_shapes,
        compiler_params=pltpu.CompilerParams(
            dimension_semantics=("parallel", "arbitrary"),
            vmem_limit_bytes=vmem_limit),
    )

    @jax.jit
    def run(x_s2d):
        return call(x_s2d, *const_arrays)

    return run


# ----------------------------------------------------------------------------
# Deterministic parameter init (synthetic weights, PyTorch OIHW layout).
# ----------------------------------------------------------------------------
def init_params(key):
    ks = jax.random.split(key, 14)

    def w(k, shape, scale=0.1):
        return scale * jax.random.normal(k, shape, jnp.float32)

    return {
        # level 1 (deepest): encoder (4->8, stride 2), convlstm (8, hidden 8), decoder (8->8, up 2x)
        'enc10_w': w(ks[0], (8, 4, 3, 3)),    'enc10_b': w(ks[1], (8,)),
        'lstm1_wx': w(ks[2], (32, 8, 3, 3)),  'lstm1_bx': w(ks[3], (32,)),
        'lstm1_wh': w(ks[4], (32, 8, 3, 3)),
        'dec12_w': w(ks[5], (8, 8, 3, 3)),    'dec12_b': w(ks[6], (8,)),
        # level 0: convlstm (4, hidden 4), sc_output (12->4, 1x1), decoder (4->4)
        'lstm0_wx': w(ks[7], (16, 4, 3, 3)),  'lstm0_bx': w(ks[8], (16,)),
        'lstm0_wh': w(ks[9], (16, 4, 3, 3)),
        'sc01_w': w(ks[10], (4, 12, 1, 1)),   'sc01_b': w(ks[11], (4,)),
        'dec02_w': w(ks[12], (4, 4, 3, 3)),   'dec02_b': w(ks[13], (4,)),
    }


# ----------------------------------------------------------------------------
# PhyCR_UNet forward (depth = 2, one encoder / convlstm / decoder per level).
# ----------------------------------------------------------------------------
def phycr_unet_forward(x, params, *, dt=0.05, step=1, effective_step=(0,), use_bf16=None):
    # x: (B, T, C, H, W), PyTorch NCHW-per-frame convention.
    # NOTE: the original default effective_step=[1] with step=1 collects no outputs
    # (torch.cat of an empty tuple); effective_step=(0,) is used instead.
    B, T, C, H, W = x.shape
    assert H % 2 == 0 and W % 2 == 0, "spatial dims must be even (2x2 space-to-depth)"
    assert C >= 4, "abs() is applied to channels {0, 3} as in the reference"
    effective_step = tuple(effective_step)
    assert all(0 <= s < step for s in effective_step)

    N = B * T
    H1, W1 = H // 2, W // 2
    HW1 = H1 * W1
    L = N * HW1

    ch1 = params['lstm1_wh'].shape[1]     # level-1 hidden channels
    ch0 = params['lstm0_wh'].shape[1]     # level-0 hidden channels
    n_enc = params['enc10_w'].shape[0]    # encoder output channels

    if use_bf16 is None:
        use_bf16 = _mxu_prefers_bf16()

    # grid=1 on single-TensorCore chips; 2-way "parallel" lane split only where a second
    # TensorCore exists, and only if LB stays a multiple of HW1 (frame edges) and of 128.
    n_blocks = 1
    if _has_multiple_tensorcores() and L % 2 == 0:
        lb = L // 2
        if lb % HW1 == 0 and lb % 128 == 0:
            n_blocks = 2
    LB = L // n_blocks

    mats = build_fused_mats(params, jnp.bfloat16 if use_bf16 else jnp.float32)
    masks = jnp.asarray(_build_tap_masks(LB, H1, W1))
    absmask = jnp.asarray(_abs_row_mask(C))

    run = _build_run_fn(mats, masks, absmask, L=L, LB=LB, n_blocks=n_blocks,
                        w1=W1, dt=dt, step=step, c_in=C, ch1=ch1, ch0=ch0,
                        n_enc=n_enc, use_bf16=use_bf16)

    def to_s2d(frames):                   # (N, C, H, W) -> (4*C, N*H1*W1)
        f = frames.reshape(N, C, H1, 2, W1, 2)
        f = jnp.transpose(f, (1, 3, 5, 0, 2, 4))
        return f.reshape(PAR * C, L)

    def from_s2d(y):                      # (4*C, N*H1*W1) -> (B, T, C, H, W)
        y = y.reshape(C, 2, 2, N, H1, W1)
        y = jnp.transpose(y, (3, 0, 4, 1, 5, 2))
        return y.reshape(B, T, C, H, W)

    def coarse_to_frames(s):              # (ch, L) -> (N, ch, H1, W1)
        ch = s.shape[0]
        return jnp.transpose(s.reshape(ch, N, H1, W1), (1, 0, 2, 3))

    def s2d_to_frames(s):                 # (4*ch, L) -> (N, ch, H, W)
        ch = s.shape[0] // PAR
        s = s.reshape(ch, 2, 2, N, H1, W1)
        return jnp.transpose(s, (3, 0, 4, 1, 5, 2)).reshape(N, ch, H, W)

    out_seq, h1, c1, m1, h0, c0, m0 = run(to_s2d(x.reshape(N, C, H, W)))

    outputs = [from_s2d(out_seq[s]) for s in effective_step]
    out = jnp.concatenate(outputs, axis=1)

    if step >= 2:
        second_last_states = [
            [(s2d_to_frames(h0), s2d_to_frames(c0), s2d_to_frames(m0))],
            [(coarse_to_frames(h1), coarse_to_frames(c1), coarse_to_frames(m1))],
        ]
    else:
        second_last_states = [[], []]
    return out, second_last_states


if __name__ == "__main__":
    key = jax.random.PRNGKey(0)
    # (batch=2, time=4, channel=4, H=16, W=16) — channel>=4 needed for abs on [0,3]
    x = jax.random.normal(key, (2, 4, 4, 16, 16), dtype=jnp.float32)
    params = init_params(jax.random.PRNGKey(1))

    out, _ = phycr_unet_forward(x, params, dt=0.05, step=1, effective_step=(0,))
    out = jax.block_until_ready(out)
    assert out.shape == (2, 4, 4, 16, 16), out.shape
    assert bool(jnp.all(jnp.isfinite(out)))
    assert bool(jnp.all(out[:, :, 0] >= 0)) and bool(jnp.all(out[:, :, 3] >= 0))

    # Multi-step: the entire recurrence runs inside ONE pallas_call (time = inner grid axis).
    out3, states3 = phycr_unet_forward(x, params, dt=0.05, step=3, effective_step=(0, 1, 2))
    out3 = jax.block_until_ready(out3)
    assert out3.shape == (2, 12, 4, 16, 16), out3.shape
    assert bool(jnp.all(jnp.isfinite(out3)))
    # Step 0 of the fused 3-step run must match the 1-step run.
    np.testing.assert_allclose(np.asarray(out3[:, :4]), np.asarray(out), rtol=2e-3, atol=2e-3)
    assert len(states3[0]) == 1 and len(states3[1]) == 1

    print("KERNEL_OK")
</pallas_src>

<mosaic_0001>
module attributes {stable_mosaic.version = 11 : i64} {
  func.func @_phycr_seq_kernel(%arg0: i32, %arg1: i32, %arg2: memref<16x512xf32, #tpu.memory_space<vmem>>, %arg3: memref<9x512xf32, #tpu.memory_space<vmem>>, %arg4: memref<16x1xf32, #tpu.memory_space<vmem>>, %arg5: memref<72x296xf32, #tpu.memory_space<vmem>>, %arg6: memref<32x152xf32, #tpu.memory_space<vmem>>, %arg7: memref<32x80xf32, #tpu.memory_space<vmem>>, %arg8: memref<16x56xf32, #tpu.memory_space<vmem>>, %arg9: memref<16x152xf32, #tpu.memory_space<vmem>>, %arg10: memref<1x16x512xf32, #tpu.memory_space<vmem>>, %arg11: memref<8x512xf32, #tpu.memory_space<vmem>>, %arg12: memref<8x512xf32, #tpu.memory_space<vmem>>, %arg13: memref<8x512xf32, #tpu.memory_space<vmem>>, %arg14: memref<16x512xf32, #tpu.memory_space<vmem>>, %arg15: memref<16x512xf32, #tpu.memory_space<vmem>>, %arg16: memref<16x512xf32, #tpu.memory_space<vmem>>, %arg17: memref<16x512xf32, #tpu.memory_space<vmem>>, %arg18: memref<8x512xf32, #tpu.memory_space<vmem>>, %arg19: memref<8x512xf32, #tpu.memory_space<vmem>>, %arg20: memref<8x512xf32, #tpu.memory_space<vmem>>, %arg21: memref<16x512xf32, #tpu.memory_space<vmem>>, %arg22: memref<16x512xf32, #tpu.memory_space<vmem>>, %arg23: memref<16x512xf32, #tpu.memory_space<vmem>>) attributes {dimension_semantics = [#tpu.dimension_semantics<parallel>, #tpu.dimension_semantics<arbitrary>], iteration_bounds = array<i64: 1, 1>, scalar_prefetch = 0 : i64, scratch_operands = 7 : i64, tpu.core_type = #tpu.core_type<tc>, window_params = [{transform_indices = @transform_0, window_bounds = array<i64: 16, 512>}, {pipeline_mode = #tpu.pipeline_mode<synchronous>, transform_indices = @transform_1, window_bounds = array<i64: 9, 512>}, {pipeline_mode = #tpu.pipeline_mode<synchronous>, transform_indices = @transform_2, window_bounds = array<i64: 16, 1>}, {pipeline_mode = #tpu.pipeline_mode<synchronous>, transform_indices = @transform_3, window_bounds = array<i64: 72, 296>}, {pipeline_mode = #tpu.pipeline_mode<synchronous>, transform_indices = @transform_4, window_bounds = array<i64: 32, 152>}, {pipeline_mode = #tpu.pipeline_mode<synchronous>, transform_indices = @transform_5, window_bounds = array<i64: 32, 80>}, {pipeline_mode = #tpu.pipeline_mode<synchronous>, transform_indices = @transform_6, window_bounds = array<i64: 16, 56>}, {pipeline_mode = #tpu.pipeline_mode<synchronous>, transform_indices = @transform_7, window_bounds = array<i64: 16, 152>}, {transform_indices = @transform_8, window_bounds = array<i64: 1, 16, 512>}, {transform_indices = @transform_9, window_bounds = array<i64: 8, 512>}, {transform_indices = @transform_10, window_bounds = array<i64: 8, 512>}, {transform_indices = @transform_11, window_bounds = array<i64: 8, 512>}, {transform_indices = @transform_12, window_bounds = array<i64: 16, 512>}, {transform_indices = @transform_13, window_bounds = array<i64: 16, 512>}, {transform_indices = @transform_14, window_bounds = array<i64: 16, 512>}]} {
    %c0_i32 = arith.constant 0 : i32
    %0 = arith.cmpi eq, %arg1, %c0_i32 : i32
    %1 = arith.extui %0 : i1 to i32
    %c0_i32_0 = arith.constant 0 : i32
    %2 = arith.cmpi ne, %1, %c0_i32_0 : i32
    scf.if %2 {
      %c0_102 = arith.constant 0 : index
      %c0_103 = arith.constant 0 : index
      %310 = vector.load %arg2[%c0_102, %c0_103] : memref<16x512xf32, #tpu.memory_space<vmem>>, vector<16x512xf32>
      %c0_104 = arith.constant 0 : index
      %c0_105 = arith.constant 0 : index
      %311 = vector.load %arg17[%c0_104, %c0_105] : memref<16x512xf32, #tpu.memory_space<vmem>>, vector<16x512xf32>
      tpu.vector_store %arg17[%c0_104, %c0_105], %310 {strides = array<i32>} : memref<16x512xf32, #tpu.memory_space<vmem>>, vector<16x512xf32>,
      %cst_106 = arith.constant 0.000000e+00 : f32
      %312 = vector.broadcast %cst_106 : f32 to vector<8x512xf32>
      %c0_107 = arith.constant 0 : index
      %c0_108 = arith.constant 0 : index
      %313 = vector.load %arg18[%c0_107, %c0_108] : memref<8x512xf32, #tpu.memory_space<vmem>>, vector<8x512xf32>
      tpu.vector_store %arg18[%c0_107, %c0_108], %312 {strides = array<i32>} : memref<8x512xf32, #tpu.memory_space<vmem>>, vector<8x512xf32>,
      %cst_109 = arith.constant 0.000000e+00 : f32
      %314 = vector.broadcast %cst_109 : f32 to vector<8x512xf32>
      %c0_110 = arith.constant 0 : index
      %c0_111 = arith.constant 0 : index
      %315 = vector.load %arg19[%c0_110, %c0_111] : memref<8x512xf32, #tpu.memory_space<vmem>>, vector<8x512xf32>
      tpu.vector_store %arg19[%c0_110, %c0_111], %314 {strides = array<i32>} : memref<8x512xf32, #tpu.memory_space<vmem>>, vector<8x512xf32>,
      %cst_112 = arith.constant 0.000000e+00 : f32
      %316 = vector.broadcast %cst_112 : f32 to vector<8x512xf32>
      %c0_113 = arith.constant 0 : index
      %c0_114 = arith.constant 0 : index
      %317 = vector.load %arg20[%c0_113, %c0_114] : memref<8x512xf32, #tpu.memory_space<vmem>>, vector<8x512xf32>
      tpu.vector_store %arg20[%c0_113, %c0_114], %316 {strides = array<i32>} : memref<8x512xf32, #tpu.memory_space<vmem>>, vector<8x512xf32>,
      %cst_115 = arith.constant 0.000000e+00 : f32
      %318 = vector.broadcast %cst_115 : f32 to vector<16x512xf32>
      %c0_116 = arith.constant 0 : index
      %c0_117 = arith.constant 0 : index
      %319 = vector.load %arg21[%c0_116, %c0_117] : memref<16x512xf32, #tpu.memory_space<vmem>>, vector<16x512xf32>
      tpu.vector_store %arg21[%c0_116, %c0_117], %318 {strides = array<i32>} : memref<16x512xf32, #tpu.memory_space<vmem>>, vector<16x512xf32>,
      %cst_118 = arith.constant 0.000000e+00 : f32
      %320 = vector.broadcast %cst_118 : f32 to vector<16x512xf32>
      %c0_119 = arith.constant 0 : index
      %c0_120 = arith.constant 0 : index
      %321 = vector.load %arg22[%c0_119, %c0_120] : memref<16x512xf32, #tpu.memory_space<vmem>>, vector<16x512xf32>
      tpu.vector_store %arg22[%c0_119, %c0_120], %320 {strides = array<i32>} : memref<16x512xf32, #tpu.memory_space<vmem>>, vector<16x512xf32>,
      %cst_121 = arith.constant 0.000000e+00 : f32
      %322 = vector.broadcast %cst_121 : f32 to vector<16x512xf32>
      %c0_122 = arith.constant 0 : index
      %c0_123 = arith.constant 0 : index
      %323 = vector.load %arg23[%c0_122, %c0_123] : memref<16x512xf32, #tpu.memory_space<vmem>>, vector<16x512xf32>
      tpu.vector_store %arg23[%c0_122, %c0_123], %322 {strides = array<i32>} : memref<16x512xf32, #tpu.memory_space<vmem>>, vector<16x512xf32>,
    } else {
    }
    %c0 = arith.constant 0 : index
    %c0_1 = arith.constant 0 : index
    %3 = vector.load %arg3[%c0, %c0_1] : memref<9x512xf32, #tpu.memory_space<vmem>>, vector<9x512xf32>
    %c0_2 = arith.constant 0 : index
    %c0_3 = arith.constant 0 : index
    %4 = vector.load %arg17[%c0_2, %c0_3] : memref<16x512xf32, #tpu.memory_space<vmem>>, vector<16x512xf32>
    %c0_4 = arith.constant 0 : index
    %c0_5 = arith.constant 0 : index
    %5 = vector.load %arg18[%c0_4, %c0_5] : memref<8x512xf32, #tpu.memory_space<vmem>>, vector<8x512xf32>
    %c0_6 = arith.constant 0 : index
    %c0_7 = arith.constant 0 : index
    %6 = vector.load %arg19[%c0_6, %c0_7] : memref<8x512xf32, #tpu.memory_space<vmem>>, vector<8x512xf32>
    %c0_8 = arith.constant 0 : index
    %c0_9 = arith.constant 0 : index
    %7 = vector.load %arg20[%c0_8, %c0_9] : memref<8x512xf32, #tpu.memory_space<vmem>>, vector<8x512xf32>
    %c0_10 = arith.constant 0 : index
    %c0_11 = arith.constant 0 : index
    %8 = vector.load %arg21[%c0_10, %c0_11] : memref<16x512xf32, #tpu.memory_space<vmem>>, vector<16x512xf32>
    %c0_12 = arith.constant 0 : index
    %c0_13 = arith.constant 0 : index
    %9 = vector.load %arg22[%c0_12, %c0_13] : memref<16x512xf32, #tpu.memory_space<vmem>>, vector<16x512xf32>
    %c0_14 = arith.constant 0 : index
    %c0_15 = arith.constant 0 : index
    %10 = vector.load %arg23[%c0_14, %c0_15] : memref<16x512xf32, #tpu.memory_space<vmem>>, vector<16x512xf32>
    %cst = arith.constant 1.000000e+00 : f32
    %11 = vector.broadcast %cst : f32 to vector<8x512xf32>
    %c9_i32 = arith.constant 9 : i32
    %12 = tpu.dynamic_rotate %4 by %c9_i32 dim 1 : vector<16x512xf32>, i32 -> vector<16x512xf32>
    %13 = vector.extract_strided_slice %3 {offsets = [0, 0], sizes = [1, 512], strides = [1, 1]} : vector<9x512xf32> to vector<1x512xf32>
    %14 = vector.broadcast %13 : vector<1x512xf32> to vector<16x512xf32>
    %15 = arith.mulf %12, %14 : vector<16x512xf32>
    %c8_i32 = arith.constant 8 : i32
    %16 = tpu.dynamic_rotate %4 by %c8_i32 dim 1 : vector<16x512xf32>, i32 -> vector<16x512xf32>
    %17 = vector.extract_strided_slice %3 {offsets = [1, 0], sizes = [1, 512], strides = [1, 1]} : vector<9x512xf32> to vector<1x512xf32>
    %18 = vector.broadcast %17 : vector<1x512xf32> to vector<16x512xf32>
    %19 = arith.mulf %16, %18 : vector<16x512xf32>
    %c7_i32 = arith.constant 7 : i32
    %20 = tpu.dynamic_rotate %4 by %c7_i32 dim 1 : vector<16x512xf32>, i32 -> vector<16x512xf32>
    %21 = vector.extract_strided_slice %3 {offsets = [2, 0], sizes = [1, 512], strides = [1, 1]} : vector<9x512xf32> to vector<1x512xf32>
    %22 = vector.broadcast %21 : vector<1x512xf32> to vector<16x512xf32>
    %23 = arith.mulf %20, %22 : vector<16x512xf32>
    %c1_i32 = arith.constant 1 : i32
    %24 = tpu.dynamic_rotate %4 by %c1_i32 dim 1 : vector<16x512xf32>, i32 -> vector<16x512xf32>
    %25 = vector.extract_strided_slice %3 {offsets = [3, 0], sizes = [1, 512], strides = [1, 1]} : vector<9x512xf32> to vector<1x512xf32>
    %26 = vector.broadcast %25 : vector<1x512xf32> to vector<16x512xf32>
    %27 = arith.mulf %24, %26 : vector<16x512xf32>
    %c511_i32 = arith.constant 511 : i32
    %28 = tpu.dynamic_rotate %4 by %c511_i32 dim 1 : vector<16x512xf32>, i32 -> vector<16x512xf32>
    %29 = vector.extract_strided_slice %3 {offsets = [5, 0], sizes = [1, 512], strides = [1, 1]} : vector<9x512xf32> to vector<1x512xf32>
    %30 = vector.broadcast %29 : vector<1x512xf32> to vector<16x512xf32>
    %31 = arith.mulf %28, %30 : vector<16x512xf32>
    %c505_i32 = arith.constant 505 : i32
    %32 = tpu.dynamic_rotate %4 by %c505_i32 dim 1 : vector<16x512xf32>, i32 -> vector<16x512xf32>
    %33 = vector.extract_strided_slice %3 {offsets = [6, 0], sizes = [1, 512], strides = [1, 1]} : vector<9x512xf32> to vector<1x512xf32>
    %34 = vector.broadcast %33 : vector<1x512xf32> to vector<16x512xf32>
    %35 = arith.mulf %32, %34 : vector<16x512xf32>
    %c504_i32 = arith.constant 504 : i32
    %36 = tpu.dynamic_rotate %4 by %c504_i32 dim 1 : vector<16x512xf32>, i32 -> vector<16x512xf32>
    %37 = vector.extract_strided_slice %3 {offsets = [7, 0], sizes = [1, 512], strides = [1, 1]} : vector<9x512xf32> to vector<1x512xf32>
    %38 = vector.broadcast %37 : vector<1x512xf32> to vector<16x512xf32>
    %39 = arith.mulf %36, %38 : vector<16x512xf32>
    %c503_i32 = arith.constant 503 : i32
    %40 = tpu.dynamic_rotate %4 by %c503_i32 dim 1 : vector<16x512xf32>, i32 -> vector<16x512xf32>
    %41 = vector.extract_strided_slice %3 {offsets = [8, 0], sizes = [1, 512], strides = [1, 1]} : vector<9x512xf32> to vector<1x512xf32>
    %42 = vector.broadcast %41 : vector<1x512xf32> to vector<16x512xf32>
    %43 = arith.mulf %40, %42 : vector<16x512xf32>
    %c9_i32_16 = arith.constant 9 : i32
    %44 = tpu.dynamic_rotate %8 by %c9_i32_16 dim 1 : vector<16x512xf32>, i32 -> vector<16x512xf32>
    %45 = vector.extract_strided_slice %3 {offsets = [0, 0], sizes = [1, 512], strides = [1, 1]} : vector<9x512xf32> to vector<1x512xf32>
    %46 = vector.broadcast %45 : vector<1x512xf32> to vector<16x512xf32>
    %47 = arith.mulf %44, %46 : vector<16x512xf32>
    %c8_i32_17 = arith.constant 8 : i32
    %48 = tpu.dynamic_rotate %8 by %c8_i32_17 dim 1 : vector<16x512xf32>, i32 -> vector<16x512xf32>
    %49 = vector.extract_strided_slice %3 {offsets = [1, 0], sizes = [1, 512], strides = [1, 1]} : vector<9x512xf32> to vector<1x512xf32>
    %50 = vector.broadcast %49 : vector<1x512xf32> to vector<16x512xf32>
    %51 = arith.mulf %48, %50 : vector<16x512xf32>
    %c7_i32_18 = arith.constant 7 : i32
    %52 = tpu.dynamic_rotate %8 by %c7_i32_18 dim 1 : vector<16x512xf32>, i32 -> vector<16x512xf32>
    %53 = vector.extract_strided_slice %3 {offsets = [2, 0], sizes = [1, 512], strides = [1, 1]} : vector<9x512xf32> to vector<1x512xf32>
    %54 = vector.broadcast %53 : vector<1x512xf32> to vector<16x512xf32>
    %55 = arith.mulf %52, %54 : vector<16x512xf32>
    %c1_i32_19 = arith.constant 1 : i32
    %56 = tpu.dynamic_rotate %8 by %c1_i32_19 dim 1 : vector<16x512xf32>, i32 -> vector<16x512xf32>
    %57 = vector.extract_strided_slice %3 {offsets = [3, 0], sizes = [1, 512], strides = [1, 1]} : vector<9x512xf32> to vector<1x512xf32>
    %58 = vector.broadcast %57 : vector<1x512xf32> to vector<16x512xf32>
    %59 = arith.mulf %56, %58 : vector<16x512xf32>
    %c511_i32_20 = arith.constant 511 : i32
    %60 = tpu.dynamic_rotate %8 by %c511_i32_20 dim 1 : vector<16x512xf32>, i32 -> vector<16x512xf32>
    %61 = vector.extract_strided_slice %3 {offsets = [5, 0], sizes = [1, 512], strides = [1, 1]} : vector<9x512xf32> to vector<1x512xf32>
    %62 = vector.broadcast %61 : vector<1x512xf32> to vector<16x512xf32>
    %63 = arith.mulf %60, %62 : vector<16x512xf32>
    %c505_i32_21 = arith.constant 505 : i32
    %64 = tpu.dynamic_rotate %8 by %c505_i32_21 dim 1 : vector<16x512xf32>, i32 -> vector<16x512xf32>
    %65 = vector.extract_strided_slice %3 {offsets = [6, 0], sizes = [1, 512], strides = [1, 1]} : vector<9x512xf32> to vector<1x512xf32>
    %66 = vector.broadcast %65 : vector<1x512xf32> to vector<16x512xf32>
    %67 = arith.mulf %64, %66 : vector<16x512xf32>
    %c504_i32_22 = arith.constant 504 : i32
    %68 = tpu.dynamic_rotate %8 by %c504_i32_22 dim 1 : vector<16x512xf32>, i32 -> vector<16x512xf32>
    %69 = vector.extract_strided_slice %3 {offsets = [7, 0], sizes = [1, 512], strides = [1, 1]} : vector<9x512xf32> to vector<1x512xf32>
    %70 = vector.broadcast %69 : vector<1x512xf32> to vector<16x512xf32>
    %71 = arith.mulf %68, %70 : vector<16x512xf32>
    %c503_i32_23 = arith.constant 503 : i32
    %72 = tpu.dynamic_rotate %8 by %c503_i32_23 dim 1 : vector<16x512xf32>, i32 -> vector<16x512xf32>
    %73 = vector.extract_strided_slice %3 {offsets = [8, 0], sizes = [1, 512], strides = [1, 1]} : vector<9x512xf32> to vector<1x512xf32>
    %74 = vector.broadcast %73 : vector<1x512xf32> to vector<16x512xf32>
    %75 = arith.mulf %72, %74 : vector<16x512xf32>
    %76 = tpu.concatenate %15, %19, %23, %27, %4, %31, %35, %39, %43, %47, %51, %55, %59, %8, %63, %67 in 0 : vector<16x512xf32>, vector<16x512xf32>, vector<16x512xf32>, vector<16x512xf32>, vector<16x512xf32>, vector<16x512xf32>, vector<16x512xf32>, vector<16x512xf32>, vector<16x512xf32>, vector<16x512xf32>, vector<16x512xf32>, vector<16x512xf32>, vector<16x512xf32>, vector<16x512xf32>, vector<16x512xf32>, vector<16x512xf32> -> vector<256x512xf32>
    %77 = tpu.concatenate %71, %75, %11 in 0 : vector<16x512xf32>, vector<16x512xf32>, vector<8x512xf32> -> vector<40x512xf32>
    %78 = tpu.concatenate %76, %77 in 0 : vector<256x512xf32>, vector<40x512xf32> -> vector<296x512xf32>
    %c0_24 = arith.constant 0 : index
    %c0_25 = arith.constant 0 : index
    %79 = vector.load %arg5[%c0_24, %c0_25] : memref<72x296xf32, #tpu.memory_space<vmem>>, vector<72x296xf32>
    %cst_26 = arith.constant dense<0.000000e+00> : vector<72x512xf32>
    %80 = tpu.matmul %79, %78, %cst_26 {dimension_numbers = #tpu.dot_dimension_numbers<[1], [0], [0], [1], [0, 0, 1, 1], [], []>} : vector<72x296xf32>, vector<296x512xf32>, vector<72x512xf32> -> vector<72x512xf32>
    %81 = vector.extract_strided_slice %80 {offsets = [0, 0], sizes = [8, 512], strides = [1, 1]} : vector<72x512xf32> to vector<8x512xf32>
    %cst_27 = arith.constant 0.000000e+00 : f32
    %82 = vector.broadcast %cst_27 : f32 to vector<8x512xf32>
    %83 = arith.maximumf %81, %82 : vector<8x512xf32>
    %84 = vector.extract_strided_slice %80 {offsets = [8, 0], sizes = [64, 512], strides = [1, 1]} : vector<72x512xf32> to vector<64x512xf32>
    %85 = vector.extract_strided_slice %84 {offsets = [0, 0], sizes = [16, 512], strides = [1, 1]} : vector<64x512xf32> to vector<16x512xf32>
    %86 = arith.negf %85 : vector<16x512xf32>
    %87 = math.exp %86 : vector<16x512xf32>
    %cst_28 = arith.constant 1.000000e+00 : f32
    %88 = vector.broadcast %cst_28 : f32 to vector<16x512xf32>
    %89 = arith.addf %88, %87 : vector<16x512xf32>
    %90 = arith.divf %88, %89 : vector<16x512xf32>
    %91 = vector.extract_strided_slice %84 {offsets = [16, 0], sizes = [16, 512], strides = [1, 1]} : vector<64x512xf32> to vector<16x512xf32>
    %92 = arith.negf %91 : vector<16x512xf32>
    %93 = math.exp %92 : vector<16x512xf32>
    %cst_29 = arith.constant 1.000000e+00 : f32
    %94 = vector.broadcast %cst_29 : f32 to vector<16x512xf32>
    %95 = arith.addf %94, %93 : vector<16x512xf32>
    %96 = arith.divf %94, %95 : vector<16x512xf32>
    %97 = vector.extract_strided_slice %84 {offsets = [32, 0], sizes = [16, 512], strides = [1, 1]} : vector<64x512xf32> to vector<16x512xf32>
    %98 = math.tanh %97 : vector<16x512xf32>
    %99 = vector.extract_strided_slice %84 {offsets = [48, 0], sizes = [16, 512], strides = [1, 1]} : vector<64x512xf32> to vector<16x512xf32>
    %100 = arith.negf %99 : vector<16x512xf32>
    %101 = math.exp %100 : vector<16x512xf32>
    %cst_30 = arith.constant 1.000000e+00 : f32
    %102 = vector.broadcast %cst_30 : f32 to vector<16x512xf32>
    %103 = arith.addf %102, %101 : vector<16x512xf32>
    %104 = arith.divf %102, %103 : vector<16x512xf32>
    %105 = arith.mulf %96, %9 : vector<16x512xf32>
    %106 = arith.mulf %90, %98 : vector<16x512xf32>
    %107 = arith.addf %105, %106 : vector<16x512xf32>
    %108 = arith.mulf %96, %10 : vector<16x512xf32>
    %109 = arith.mulf %90, %98 : vector<16x512xf32>
    %110 = arith.addf %108, %109 : vector<16x512xf32>
    %111 = math.tanh %107 : vector<16x512xf32>
    %112 = arith.mulf %104, %111 : vector<16x512xf32>
    %c9_i32_31 = arith.constant 9 : i32
    %113 = tpu.dynamic_rotate %83 by %c9_i32_31 dim 1 : vector<8x512xf32>, i32 -> vector<8x512xf32>
    %114 = vector.extract_strided_slice %3 {offsets = [0, 0], sizes = [1, 512], strides = [1, 1]} : vector<9x512xf32> to vector<1x512xf32>
    %115 = vector.broadcast %114 : vector<1x512xf32> to vector<8x512xf32>
    %116 = arith.mulf %113, %115 : vector<8x512xf32>
    %c8_i32_32 = arith.constant 8 : i32
    %117 = tpu.dynamic_rotate %83 by %c8_i32_32 dim 1 : vector<8x512xf32>, i32 -> vector<8x512xf32>
    %118 = vector.extract_strided_slice %3 {offsets = [1, 0], sizes = [1, 512], strides = [1, 1]} : vector<9x512xf32> to vector<1x512xf32>
    %119 = vector.broadcast %118 : vector<1x512xf32> to vector<8x512xf32>
    %120 = arith.mulf %117, %119 : vector<8x512xf32>
    %c7_i32_33 = arith.constant 7 : i32
    %121 = tpu.dynamic_rotate %83 by %c7_i32_33 dim 1 : vector<8x512xf32>, i32 -> vector<8x512xf32>
    %122 = vector.extract_strided_slice %3 {offsets = [2, 0], sizes = [1, 512], strides = [1, 1]} : vector<9x512xf32> to vector<1x512xf32>
    %123 = vector.broadcast %122 : vector<1x512xf32> to vector<8x512xf32>
    %124 = arith.mulf %121, %123 : vector<8x512xf32>
    %c1_i32_34 = arith.constant 1 : i32
    %125 = tpu.dynamic_rotate %83 by %c1_i32_34 dim 1 : vector<8x512xf32>, i32 -> vector<8x512xf32>
    %126 = vector.extract_strided_slice %3 {offsets = [3, 0], sizes = [1, 512], strides = [1, 1]} : vector<9x512xf32> to vector<1x512xf32>
    %127 = vector.broadcast %126 : vector<1x512xf32> to vector<8x512xf32>
    %128 = arith.mulf %125, %127 : vector<8x512xf32>
    %c511_i32_35 = arith.constant 511 : i32
    %129 = tpu.dynamic_rotate %83 by %c511_i32_35 dim 1 : vector<8x512xf32>, i32 -> vector<8x512xf32>
    %130 = vector.extract_strided_slice %3 {offsets = [5, 0], sizes = [1, 512], strides = [1, 1]} : vector<9x512xf32> to vector<1x512xf32>
    %131 = vector.broadcast %130 : vector<1x512xf32> to vector<8x512xf32>
    %132 = arith.mulf %129, %131 : vector<8x512xf32>
    %c505_i32_36 = arith.constant 505 : i32
    %133 = tpu.dynamic_rotate %83 by %c505_i32_36 dim 1 : vector<8x512xf32>, i32 -> vector<8x512xf32>
    %134 = vector.extract_strided_slice %3 {offsets = [6, 0], sizes = [1, 512], strides = [1, 1]} : vector<9x512xf32> to vector<1x512xf32>
    %135 = vector.broadcast %134 : vector<1x512xf32> to vector<8x512xf32>
    %136 = arith.mulf %133, %135 : vector<8x512xf32>
    %c504_i32_37 = arith.constant 504 : i32
    %137 = tpu.dynamic_rotate %83 by %c504_i32_37 dim 1 : vector<8x512xf32>, i32 -> vector<8x512xf32>
    %138 = vector.extract_strided_slice %3 {offsets = [7, 0], sizes = [1, 512], strides = [1, 1]} : vector<9x512xf32> to vector<1x512xf32>
    %139 = vector.broadcast %138 : vector<1x512xf32> to vector<8x512xf32>
    %140 = arith.mulf %137, %139 : vector<8x512xf32>
    %c503_i32_38 = arith.constant 503 : i32
    %141 = tpu.dynamic_rotate %83 by %c503_i32_38 dim 1 : vector<8x512xf32>, i32 -> vector<8x512xf32>
    %142 = vector.extract_strided_slice %3 {offsets = [8, 0], sizes = [1, 512], strides = [1, 1]} : vector<9x512xf32> to vector<1x512xf32>
    %143 = vector.broadcast %142 : vector<1x512xf32> to vector<8x512xf32>
    %144 = arith.mulf %141, %143 : vector<8x512xf32>
    %c9_i32_39 = arith.constant 9 : i32
    %145 = tpu.dynamic_rotate %5 by %c9_i32_39 dim 1 : vector<8x512xf32>, i32 -> vector<8x512xf32>
    %146 = vector.extract_strided_slice %3 {offsets = [0, 0], sizes = [1, 512], strides = [1, 1]} : vector<9x512xf32> to vector<1x512xf32>
    %147 = vector.broadcast %146 : vector<1x512xf32> to vector<8x512xf32>
    %148 = arith.mulf %145, %147 : vector<8x512xf32>
    %c8_i32_40 = arith.constant 8 : i32
    %149 = tpu.dynamic_rotate %5 by %c8_i32_40 dim 1 : vector<8x512xf32>, i32 -> vector<8x512xf32>
    %150 = vector.extract_strided_slice %3 {offsets = [1, 0], sizes = [1, 512], strides = [1, 1]} : vector<9x512xf32> to vector<1x512xf32>
    %151 = vector.broadcast %150 : vector<1x512xf32> to vector<8x512xf32>
    %152 = arith.mulf %149, %151 : vector<8x512xf32>
    %c7_i32_41 = arith.constant 7 : i32
    %153 = tpu.dynamic_rotate %5 by %c7_i32_41 dim 1 : vector<8x512xf32>, i32 -> vector<8x512xf32>
    %154 = vector.extract_strided_slice %3 {offsets = [2, 0], sizes = [1, 512], strides = [1, 1]} : vector<9x512xf32> to vector<1x512xf32>
    %155 = vector.broadcast %154 : vector<1x512xf32> to vector<8x512xf32>
    %156 = arith.mulf %153, %155 : vector<8x512xf32>
    %c1_i32_42 = arith.constant 1 : i32
    %157 = tpu.dynamic_rotate %5 by %c1_i32_42 dim 1 : vector<8x512xf32>, i32 -> vector<8x512xf32>
    %158 = vector.extract_strided_slice %3 {offsets = [3, 0], sizes = [1, 512], strides = [1, 1]} : vector<9x512xf32> to vector<1x512xf32>
    %159 = vector.broadcast %158 : vector<1x512xf32> to vector<8x512xf32>
    %160 = arith.mulf %157, %159 : vector<8x512xf32>
    %c511_i32_43 = arith.constant 511 : i32
    %161 = tpu.dynamic_rotate %5 by %c511_i32_43 dim 1 : vector<8x512xf32>, i32 -> vector<8x512xf32>
    %162 = vector.extract_strided_slice %3 {offsets = [5, 0], sizes = [1, 512], strides = [1, 1]} : vector<9x512xf32> to vector<1x512xf32>
    %163 = vector.broadcast %162 : vector<1x512xf32> to vector<8x512xf32>
    %164 = arith.mulf %161, %163 : vector<8x512xf32>
    %c505_i32_44 = arith.constant 505 : i32
    %165 = tpu.dynamic_rotate %5 by %c505_i32_44 dim 1 : vector<8x512xf32>, i32 -> vector<8x512xf32>
    %166 = vector.extract_strided_slice %3 {offsets = [6, 0], sizes = [1, 512], strides = [1, 1]} : vector<9x512xf32> to vector<1x512xf32>
    %167 = vector.broadcast %166 : vector<1x512xf32> to vector<8x512xf32>
    %168 = arith.mulf %165, %167 : vector<8x512xf32>
    %c504_i32_45 = arith.constant 504 : i32
    %169 = tpu.dynamic_rotate %5 by %c504_i32_45 dim 1 : vector<8x512xf32>, i32 -> vector<8x512xf32>
    %170 = vector.extract_strided_slice %3 {offsets = [7, 0], sizes = [1, 512], strides = [1, 1]} : vector<9x512xf32> to vector<1x512xf32>
    %171 = vector.broadcast %170 : vector<1x512xf32> to vector<8x512xf32>
    %172 = arith.mulf %169, %171 : vector<8x512xf32>
    %c503_i32_46 = arith.constant 503 : i32
    %173 = tpu.dynamic_rotate %5 by %c503_i32_46 dim 1 : vector<8x512xf32>, i32 -> vector<8x512xf32>
    %174 = vector.extract_strided_slice %3 {offsets = [8, 0], sizes = [1, 512], strides = [1, 1]} : vector<9x512xf32> to vector<1x512xf32>
    %175 = vector.broadcast %174 : vector<1x512xf32> to vector<8x512xf32>
    %176 = arith.mulf %173, %175 : vector<8x512xf32>
    %177 = tpu.concatenate %116, %120, %124, %128, %83, %132, %136, %140, %144, %148, %152, %156, %160, %5, %164, %168 in 0 : vector<8x512xf32>, vector<8x512xf32>, vector<8x512xf32>, vector<8x512xf32>, vector<8x512xf32>, vector<8x512xf32>, vector<8x512xf32>, vector<8x512xf32>, vector<8x512xf32>, vector<8x512xf32>, vector<8x512xf32>, vector<8x512xf32>, vector<8x512xf32>, vector<8x512xf32>, vector<8x512xf32>, vector<8x512xf32> -> vector<128x512xf32>
    %178 = tpu.concatenate %172, %176, %11 in 0 : vector<8x512xf32>, vector<8x512xf32>, vector<8x512xf32> -> vector<24x512xf32>
    %179 = tpu.concatenate %177, %178 in 0 : vector<128x512xf32>, vector<24x512xf32> -> vector<152x512xf32>
    %c0_47 = arith.constant 0 : index
    %c0_48 = arith.constant 0 : index
    %180 = vector.load %arg6[%c0_47, %c0_48] : memref<32x152xf32, #tpu.memory_space<vmem>>, vector<32x152xf32>
    %cst_49 = arith.constant dense<0.000000e+00> : vector<32x512xf32>
    %181 = tpu.matmul %180, %179, %cst_49 {dimension_numbers = #tpu.dot_dimension_numbers<[1], [0], [0], [1], [0, 0, 1, 1], [], []>} : vector<32x152xf32>, vector<152x512xf32>, vector<32x512xf32> -> vector<32x512xf32>
    %182 = vector.extract_strided_slice %181 {offsets = [0, 0], sizes = [8, 512], strides = [1, 1]} : vector<32x512xf32> to vector<8x512xf32>
    %183 = arith.negf %182 : vector<8x512xf32>
    %184 = math.exp %183 : vector<8x512xf32>
    %cst_50 = arith.constant 1.000000e+00 : f32
    %185 = vector.broadcast %cst_50 : f32 to vector<8x512xf32>
    %186 = arith.addf %185, %184 : vector<8x512xf32>
    %187 = arith.divf %185, %186 : vector<8x512xf32>
    %188 = vector.extract_strided_slice %181 {offsets = [8, 0], sizes = [8, 512], strides = [1, 1]} : vector<32x512xf32> to vector<8x512xf32>
    %189 = arith.negf %188 : vector<8x512xf32>
    %190 = math.exp %189 : vector<8x512xf32>
    %cst_51 = arith.constant 1.000000e+00 : f32
    %191 = vector.broadcast %cst_51 : f32 to vector<8x512xf32>
    %192 = arith.addf %191, %190 : vector<8x512xf32>
    %193 = arith.divf %191, %192 : vector<8x512xf32>
    %194 = vector.extract_strided_slice %181 {offsets = [16, 0], sizes = [8, 512], strides = [1, 1]} : vector<32x512xf32> to vector<8x512xf32>
    %195 = math.tanh %194 : vector<8x512xf32>
    %196 = vector.extract_strided_slice %181 {offsets = [24, 0], sizes = [8, 512], strides = [1, 1]} : vector<32x512xf32> to vector<8x512xf32>
    %197 = arith.negf %196 : vector<8x512xf32>
    %198 = math.exp %197 : vector<8x512xf32>
    %cst_52 = arith.constant 1.000000e+00 : f32
    %199 = vector.broadcast %cst_52 : f32 to vector<8x512xf32>
    %200 = arith.addf %199, %198 : vector<8x512xf32>
    %201 = arith.divf %199, %200 : vector<8x512xf32>
    %202 = arith.mulf %193, %6 : vector<8x512xf32>
    %203 = arith.mulf %187, %195 : vector<8x512xf32>
    %204 = arith.addf %202, %203 : vector<8x512xf32>
    %205 = arith.mulf %193, %7 : vector<8x512xf32>
    %206 = arith.mulf %187, %195 : vector<8x512xf32>
    %207 = arith.addf %205, %206 : vector<8x512xf32>
    %208 = math.tanh %204 : vector<8x512xf32>
    %209 = arith.mulf %201, %208 : vector<8x512xf32>
    %c9_i32_53 = arith.constant 9 : i32
    %210 = tpu.dynamic_rotate %209 by %c9_i32_53 dim 1 : vector<8x512xf32>, i32 -> vector<8x512xf32>
    %211 = vector.extract_strided_slice %3 {offsets = [0, 0], sizes = [1, 512], strides = [1, 1]} : vector<9x512xf32> to vector<1x512xf32>
    %212 = vector.broadcast %211 : vector<1x512xf32> to vector<8x512xf32>
    %213 = arith.mulf %210, %212 : vector<8x512xf32>
    %c8_i32_54 = arith.constant 8 : i32
    %214 = tpu.dynamic_rotate %209 by %c8_i32_54 dim 1 : vector<8x512xf32>, i32 -> vector<8x512xf32>
    %215 = vector.extract_strided_slice %3 {offsets = [1, 0], sizes = [1, 512], strides = [1, 1]} : vector<9x512xf32> to vector<1x512xf32>
    %216 = vector.broadcast %215 : vector<1x512xf32> to vector<8x512xf32>
    %217 = arith.mulf %214, %216 : vector<8x512xf32>
    %c7_i32_55 = arith.constant 7 : i32
    %218 = tpu.dynamic_rotate %209 by %c7_i32_55 dim 1 : vector<8x512xf32>, i32 -> vector<8x512xf32>
    %219 = vector.extract_strided_slice %3 {offsets = [2, 0], sizes = [1, 512], strides = [1, 1]} : vector<9x512xf32> to vector<1x512xf32>
    %220 = vector.broadcast %219 : vector<1x512xf32> to vector<8x512xf32>
    %221 = arith.mulf %218, %220 : vector<8x512xf32>
    %c1_i32_56 = arith.constant 1 : i32
    %222 = tpu.dynamic_rotate %209 by %c1_i32_56 dim 1 : vector<8x512xf32>, i32 -> vector<8x512xf32>
    %223 = vector.extract_strided_slice %3 {offsets = [3, 0], sizes = [1, 512], strides = [1, 1]} : vector<9x512xf32> to vector<1x512xf32>
    %224 = vector.broadcast %223 : vector<1x512xf32> to vector<8x512xf32>
    %225 = arith.mulf %222, %224 : vector<8x512xf32>
    %c511_i32_57 = arith.constant 511 : i32
    %226 = tpu.dynamic_rotate %209 by %c511_i32_57 dim 1 : vector<8x512xf32>, i32 -> vector<8x512xf32>
    %227 = vector.extract_strided_slice %3 {offsets = [5, 0], sizes = [1, 512], strides = [1, 1]} : vector<9x512xf32> to vector<1x512xf32>
    %228 = vector.broadcast %227 : vector<1x512xf32> to vector<8x512xf32>
    %229 = arith.mulf %226, %228 : vector<8x512xf32>
    %c505_i32_58 = arith.constant 505 : i32
    %230 = tpu.dynamic_rotate %209 by %c505_i32_58 dim 1 : vector<8x512xf32>, i32 -> vector<8x512xf32>
    %231 = vector.extract_strided_slice %3 {offsets = [6, 0], sizes = [1, 512], strides = [1, 1]} : vector<9x512xf32> to vector<1x512xf32>
    %232 = vector.broadcast %231 : vector<1x512xf32> to vector<8x512xf32>
    %233 = arith.mulf %230, %232 : vector<8x512xf32>
    %c504_i32_59 = arith.constant 504 : i32
    %234 = tpu.dynamic_rotate %209 by %c504_i32_59 dim 1 : vector<8x512xf32>, i32 -> vector<8x512xf32>
    %235 = vector.extract_strided_slice %3 {offsets = [7, 0], sizes = [1, 512], strides = [1, 1]} : vector<9x512xf32> to vector<1x512xf32>
    %236 = vector.broadcast %235 : vector<1x512xf32> to vector<8x512xf32>
    %237 = arith.mulf %234, %236 : vector<8x512xf32>
    %c503_i32_60 = arith.constant 503 : i32
    %238 = tpu.dynamic_rotate %209 by %c503_i32_60 dim 1 : vector<8x512xf32>, i32 -> vector<8x512xf32>
    %239 = vector.extract_strided_slice %3 {offsets = [8, 0], sizes = [1, 512], strides = [1, 1]} : vector<9x512xf32> to vector<1x512xf32>
    %240 = vector.broadcast %239 : vector<1x512xf32> to vector<8x512xf32>
    %241 = arith.mulf %238, %240 : vector<8x512xf32>
    %242 = tpu.concatenate %213, %217, %221, %225, %209, %229, %233, %237, %241, %11 in 0 : vector<8x512xf32>, vector<8x512xf32>, vector<8x512xf32>, vector<8x512xf32>, vector<8x512xf32>, vector<8x512xf32>, vector<8x512xf32>, vector<8x512xf32>, vector<8x512xf32>, vector<8x512xf32> -> vector<80x512xf32>
    %c0_61 = arith.constant 0 : index
    %c0_62 = arith.constant 0 : index
    %243 = vector.load %arg7[%c0_61, %c0_62] : memref<32x80xf32, #tpu.memory_space<vmem>>, vector<32x80xf32>
    %cst_63 = arith.constant dense<0.000000e+00> : vector<32x512xf32>
    %244 = tpu.matmul %243, %242, %cst_63 {dimension_numbers = #tpu.dot_dimension_numbers<[1], [0], [0], [1], [0, 0, 1, 1], [], []>} : vector<32x80xf32>, vector<80x512xf32>, vector<32x512xf32> -> vector<32x512xf32>
    %cst_64 = arith.constant 0.000000e+00 : f32
    %245 = vector.broadcast %cst_64 : f32 to vector<32x512xf32>
    %246 = arith.maximumf %244, %245 : vector<32x512xf32>
    %247 = tpu.concatenate %112, %246, %11 in 0 : vector<16x512xf32>, vector<32x512xf32>, vector<8x512xf32> -> vector<56x512xf32>
    %c0_65 = arith.constant 0 : index
    %c0_66 = arith.constant 0 : index
    %248 = vector.load %arg8[%c0_65, %c0_66] : memref<16x56xf32, #tpu.memory_space<vmem>>, vector<16x56xf32>
    %cst_67 = arith.constant dense<0.000000e+00> : vector<16x512xf32>
    %249 = tpu.matmul %248, %247, %cst_67 {dimension_numbers = #tpu.dot_dimension_numbers<[1], [0], [0], [1], [0, 0, 1, 1], [], []>} : vector<16x56xf32>, vector<56x512xf32>, vector<16x512xf32> -> vector<16x512xf32>
    %c9_i32_68 = arith.constant 9 : i32
    %250 = tpu.dynamic_rotate %249 by %c9_i32_68 dim 1 : vector<16x512xf32>, i32 -> vector<16x512xf32>
    %251 = vector.extract_strided_slice %3 {offsets = [0, 0], sizes = [1, 512], strides = [1, 1]} : vector<9x512xf32> to vector<1x512xf32>
    %252 = vector.broadcast %251 : vector<1x512xf32> to vector<16x512xf32>
    %253 = arith.mulf %250, %252 : vector<16x512xf32>
    %c8_i32_69 = arith.constant 8 : i32
    %254 = tpu.dynamic_rotate %249 by %c8_i32_69 dim 1 : vector<16x512xf32>, i32 -> vector<16x512xf32>
    %255 = vector.extract_strided_slice %3 {offsets = [1, 0], sizes = [1, 512], strides = [1, 1]} : vector<9x512xf32> to vector<1x512xf32>
    %256 = vector.broadcast %255 : vector<1x512xf32> to vector<16x512xf32>
    %257 = arith.mulf %254, %256 : vector<16x512xf32>
    %c7_i32_70 = arith.constant 7 : i32
    %258 = tpu.dynamic_rotate %249 by %c7_i32_70 dim 1 : vector<16x512xf32>, i32 -> vector<16x512xf32>
    %259 = vector.extract_strided_slice %3 {offsets = [2, 0], sizes = [1, 512], strides = [1, 1]} : vector<9x512xf32> to vector<1x512xf32>
    %260 = vector.broadcast %259 : vector<1x512xf32> to vector<16x512xf32>
    %261 = arith.mulf %258, %260 : vector<16x512xf32>
    %c1_i32_71 = arith.constant 1 : i32
    %262 = tpu.dynamic_rotate %249 by %c1_i32_71 dim 1 : vector<16x512xf32>, i32 -> vector<16x512xf32>
    %263 = vector.extract_strided_slice %3 {offsets = [3, 0], sizes = [1, 512], strides = [1, 1]} : vector<9x512xf32> to vector<1x512xf32>
    %264 = vector.broadcast %263 : vector<1x512xf32> to vector<16x512xf32>
    %265 = arith.mulf %262, %264 : vector<16x512xf32>
    %c511_i32_72 = arith.constant 511 : i32
    %266 = tpu.dynamic_rotate %249 by %c511_i32_72 dim 1 : vector<16x512xf32>, i32 -> vector<16x512xf32>
    %267 = vector.extract_strided_slice %3 {offsets = [5, 0], sizes = [1, 512], strides = [1, 1]} : vector<9x512xf32> to vector<1x512xf32>
    %268 = vector.broadcast %267 : vector<1x512xf32> to vector<16x512xf32>
    %269 = arith.mulf %266, %268 : vector<16x512xf32>
    %c505_i32_73 = arith.constant 505 : i32
    %270 = tpu.dynamic_rotate %249 by %c505_i32_73 dim 1 : vector<16x512xf32>, i32 -> vector<16x512xf32>
    %271 = vector.extract_strided_slice %3 {offsets = [6, 0], sizes = [1, 512], strides = [1, 1]} : vector<9x512xf32> to vector<1x512xf32>
    %272 = vector.broadcast %271 : vector<1x512xf32> to vector<16x512xf32>
    %273 = arith.mulf %270, %272 : vector<16x512xf32>
    %c504_i32_74 = arith.constant 504 : i32
    %274 = tpu.dynamic_rotate %249 by %c504_i32_74 dim 1 : vector<16x512xf32>, i32 -> vector<16x512xf32>
    %275 = vector.extract_strided_slice %3 {offsets = [7, 0], sizes = [1, 512], strides = [1, 1]} : vector<9x512xf32> to vector<1x512xf32>
    %276 = vector.broadcast %275 : vector<1x512xf32> to vector<16x512xf32>
    %277 = arith.mulf %274, %276 : vector<16x512xf32>
    %c503_i32_75 = arith.constant 503 : i32
    %278 = tpu.dynamic_rotate %249 by %c503_i32_75 dim 1 : vector<16x512xf32>, i32 -> vector<16x512xf32>
    %279 = vector.extract_strided_slice %3 {offsets = [8, 0], sizes = [1, 512], strides = [1, 1]} : vector<9x512xf32> to vector<1x512xf32>
    %280 = vector.broadcast %279 : vector<1x512xf32> to vector<16x512xf32>
    %281 = arith.mulf %278, %280 : vector<16x512xf32>
    %282 = tpu.concatenate %253, %257, %261, %265, %249, %269, %273, %277, %281, %11 in 0 : vector<16x512xf32>, vector<16x512xf32>, vector<16x512xf32>, vector<16x512xf32>, vector<16x512xf32>, vector<16x512xf32>, vector<16x512xf32>, vector<16x512xf32>, vector<16x512xf32>, vector<8x512xf32> -> vector<152x512xf32>
    %c0_76 = arith.constant 0 : index
    %c0_77 = arith.constant 0 : index
    %283 = vector.load %arg9[%c0_76, %c0_77] : memref<16x152xf32, #tpu.memory_space<vmem>>, vector<16x152xf32>
    %cst_78 = arith.constant dense<0.000000e+00> : vector<16x512xf32>
    %284 = tpu.matmul %283, %282, %cst_78 {dimension_numbers = #tpu.dot_dimension_numbers<[1], [0], [0], [1], [0, 0, 1, 1], [], []>} : vector<16x152xf32>, vector<152x512xf32>, vector<16x512xf32> -> vector<16x512xf32>
    %c0_79 = arith.constant 0 : index
    %c0_80 = arith.constant 0 : index
    %285 = vector.load %arg4[%c0_79, %c0_80] : memref<16x1xf32, #tpu.memory_space<vmem>>, vector<16x1xf32>
    %cst_81 = arith.constant 5.000000e-02 : f32
    %286 = vector.broadcast %cst_81 : f32 to vector<16x512xf32>
    %287 = arith.mulf %286, %284 : vector<16x512xf32>
    %288 = arith.addf %4, %287 : vector<16x512xf32>
    %289 = math.absf %288 : vector<16x512xf32>
    %290 = vector.broadcast %285 : vector<16x1xf32> to vector<16x512xf32>
    %291 = arith.mulf %290, %289 : vector<16x512xf32>
    %cst_82 = arith.constant 1.000000e+00 : f32
    %292 = vector.broadcast %cst_82 : f32 to vector<16x1xf32>
    %293 = arith.subf %292, %285 : vector<16x1xf32>
    %294 = vector.broadcast %293 : vector<16x1xf32> to vector<16x512xf32>
    %295 = arith.mulf %294, %288 : vector<16x512xf32>
    %296 = arith.addf %291, %295 : vector<16x512xf32>
    %c0_83 = arith.constant 0 : index
    %c0_84 = arith.constant 0 : index
    %297 = vector.load %arg17[%c0_83, %c0_84] : memref<16x512xf32, #tpu.memory_space<vmem>>, vector<16x512xf32>
    tpu.vector_store %arg17[%c0_83, %c0_84], %296 {strides = array<i32>} : memref<16x512xf32, #tpu.memory_space<vmem>>, vector<16x512xf32>,
    %c0_85 = arith.constant 0 : index
    %c0_86 = arith.constant 0 : index
    %c0_87 = arith.constant 0 : index
    %298 = vector.load %arg10[%c0_85, %c0_86, %c0_87] : memref<1x16x512xf32, #tpu.memory_space<vmem>>, vector<1x16x512xf32>
    %299 = vector.shape_cast %298 : vector<1x16x512xf32> to vector<16x512xf32>
    %300 = vector.shape_cast %296 : vector<16x512xf32> to vector<1x16x512xf32>
    tpu.vector_store %arg10[%c0_85, %c0_86, %c0_87], %300 {strides = array<i32>} : memref<1x16x512xf32, #tpu.memory_space<vmem>>, vector<1x16x512xf32>,
    %c0_88 = arith.constant 0 : index
    %c0_89 = arith.constant 0 : index
    %301 = vector.load %arg18[%c0_88, %c0_89] : memref<8x512xf32, #tpu.memory_space<vmem>>, vector<8x512xf32>
    tpu.vector_store %arg18[%c0_88, %c0_89], %209 {strides = array<i32>} : memref<8x512xf32, #tpu.memory_space<vmem>>, vector<8x512xf32>,
    %c0_90 = arith.constant 0 : index
    %c0_91 = arith.constant 0 : index
    %302 = vector.load %arg19[%c0_90, %c0_91] : memref<8x512xf32, #tpu.memory_space<vmem>>, vector<8x512xf32>
    tpu.vector_store %arg19[%c0_90, %c0_91], %204 {strides = array<i32>} : memref<8x512xf32, #tpu.memory_space<vmem>>, vector<8x512xf32>,
    %c0_92 = arith.constant 0 : index
    %c0_93 = arith.constant 0 : index
    %303 = vector.load %arg20[%c0_92, %c0_93] : memref<8x512xf32, #tpu.memory_space<vmem>>, vector<8x512xf32>
    tpu.vector_store %arg20[%c0_92, %c0_93], %207 {strides = array<i32>} : memref<8x512xf32, #tpu.memory_space<vmem>>, vector<8x512xf32>,
    %c0_94 = arith.constant 0 : index
    %c0_95 = arith.constant 0 : index
    %304 = vector.load %arg21[%c0_94, %c0_95] : memref<16x512xf32, #tpu.memory_space<vmem>>, vector<16x512xf32>
    tpu.vector_store %arg21[%c0_94, %c0_95], %112 {strides = array<i32>} : memref<16x512xf32, #tpu.memory_space<vmem>>, vector<16x512xf32>,
    %c0_96 = arith.constant 0 : index
    %c0_97 = arith.constant 0 : index
    %305 = vector.load %arg22[%c0_96, %c0_97] : memref<16x512xf32, #tpu.memory_space<vmem>>, vector<16x512xf32>
    tpu.vector_store %arg22[%c0_96, %c0_97], %107 {strides = array<i32>} : memref<16x512xf32, #tpu.memory_space<vmem>>, vector<16x512xf32>,
    %c0_98 = arith.constant 0 : index
    %c0_99 = arith.constant 0 : index
    %306 = vector.load %arg23[%c0_98, %c0_99] : memref<16x512xf32, #tpu.memory_space<vmem>>, vector<16x512xf32>
    tpu.vector_store %arg23[%c0_98, %c0_99], %110 {strides = array<i32>} : memref<16x512xf32, #tpu.memory_space<vmem>>, vector<16x512xf32>,
    %c0_i32_100 = arith.constant 0 : i32
    %307 = arith.cmpi eq, %arg1, %c0_i32_100 : i32
    %308 = arith.extui %307 : i1 to i32
    %c0_i32_101 = arith.constant 0 : i32
    %309 = arith.cmpi ne, %308, %c0_i32_101 : i32
    scf.if %309 {
      %c0_102 = arith.constant 0 : index
      %c0_103 = arith.constant 0 : index
      %310 = vector.load %arg11[%c0_102, %c0_103] : memref<8x512xf32, #tpu.memory_space<vmem>>, vector<8x512xf32>
      tpu.vector_store %arg11[%c0_102, %c0_103], %209 {strides = array<i32>} : memref<8x512xf32, #tpu.memory_space<vmem>>, vector<8x512xf32>,
      %c0_104 = arith.constant 0 : index
      %c0_105 = arith.constant 0 : index
      %311 = vector.load %arg12[%c0_104, %c0_105] : memref<8x512xf32, #tpu.memory_space<vmem>>, vector<8x512xf32>
      tpu.vector_store %arg12[%c0_104, %c0_105], %204 {strides = array<i32>} : memref<8x512xf32, #tpu.memory_space<vmem>>, vector<8x512xf32>,
      %c0_106 = arith.constant 0 : index
      %c0_107 = arith.constant 0 : index
      %312 = vector.load %arg13[%c0_106, %c0_107] : memref<8x512xf32, #tpu.memory_space<vmem>>, vector<8x512xf32>
      tpu.vector_store %arg13[%c0_106, %c0_107], %207 {strides = array<i32>} : memref<8x512xf32, #tpu.memory_space<vmem>>, vector<8x512xf32>,
      %c0_108 = arith.constant 0 : index
      %c0_109 = arith.constant 0 : index
      %313 = vector.load %arg14[%c0_108, %c0_109] : memref<16x512xf32, #tpu.memory_space<vmem>>, vector<16x512xf32>
      tpu.vector_store %arg14[%c0_108, %c0_109], %112 {strides = array<i32>} : memref<16x512xf32, #tpu.memory_space<vmem>>, vector<16x512xf32>,
      %c0_110 = arith.constant 0 : index
      %c0_111 = arith.constant 0 : index
      %314 = vector.load %arg15[%c0_110, %c0_111] : memref<16x512xf32, #tpu.memory_space<vmem>>, vector<16x512xf32>
      tpu.vector_store %arg15[%c0_110, %c0_111], %107 {strides = array<i32>} : memref<16x512xf32, #tpu.memory_space<vmem>>, vector<16x512xf32>,
      %c0_112 = arith.constant 0 : index
      %c0_113 = arith.constant 0 : index
      %315 = vector.load %arg16[%c0_112, %c0_113] : memref<16x512xf32, #tpu.memory_space<vmem>>, vector<16x512xf32>
      tpu.vector_store %arg16[%c0_112, %c0_113], %110 {strides = array<i32>} : memref<16x512xf32, #tpu.memory_space<vmem>>, vector<16x512xf32>,
    } else {
    }
    return
  }
  func.func @transform_0(%arg0: i32, %arg1: i32) -> (i32, i32) {
    %c0_i32 = arith.constant 0 : i32
    %c0_i32_0 = arith.constant 0 : i32
    return %c0_i32, %arg0 : i32, i32
  }
  func.func @transform_1(%arg0: i32, %arg1: i32) -> (i32, i32) {
    %c0_i32 = arith.constant 0 : i32
    %c0_i32_0 = arith.constant 0 : i32
    %c0_i32_1 = arith.constant 0 : i32
    return %c0_i32, %c0_i32_0 : i32, i32
  }
  func.func @transform_2(%arg0: i32, %arg1: i32) -> (i32, i32) {
    %c0_i32 = arith.constant 0 : i32
    %c0_i32_0 = arith.constant 0 : i32
    %c0_i32_1 = arith.constant 0 : i32
    return %c0_i32, %c0_i32_0 : i32, i32
  }
  func.func @transform_3(%arg0: i32, %arg1: i32) -> (i32, i32) {
    %c0_i32 = arith.constant 0 : i32
    %c0_i32_0 = arith.constant 0 : i32
    %c0_i32_1 = arith.constant 0 : i32
    return %c0_i32, %c0_i32_0 : i32, i32
  }
  func.func @transform_4(%arg0: i32, %arg1: i32) -> (i32, i32) {
    %c0_i32 = arith.constant 0 : i32
    %c0_i32_0 = arith.constant 0 : i32
    %c0_i32_1 = arith.constant 0 : i32
    return %c0_i32, %c0_i32_0 : i32, i32
  }
  func.func @transform_5(%arg0: i32, %arg1: i32) -> (i32, i32) {
    %c0_i32 = arith.constant 0 : i32
    %c0_i32_0 = arith.constant 0 : i32
    %c0_i32_1 = arith.constant 0 : i32
    return %c0_i32, %c0_i32_0 : i32, i32
  }
  func.func @transform_6(%arg0: i32, %arg1: i32) -> (i32, i32) {
    %c0_i32 = arith.constant 0 : i32
    %c0_i32_0 = arith.constant 0 : i32
    %c0_i32_1 = arith.constant 0 : i32
    return %c0_i32, %c0_i32_0 : i32, i32
  }
  func.func @transform_7(%arg0: i32, %arg1: i32) -> (i32, i32) {
    %c0_i32 = arith.constant 0 : i32
    %c0_i32_0 = arith.constant 0 : i32
    %c0_i32_1 = arith.constant 0 : i32
    return %c0_i32, %c0_i32_0 : i32, i32
  }
  func.func @transform_8(%arg0: i32, %arg1: i32) -> (i32, i32, i32) {
    %c0_i32 = arith.constant 0 : i32
    %c0_i32_0 = arith.constant 0 : i32
    return %arg1, %c0_i32, %arg0 : i32, i32, i32
  }
  func.func @transform_9(%arg0: i32, %arg1: i32) -> (i32, i32) {
    %c0_i32 = arith.constant 0 : i32
    %c0_i32_0 = arith.constant 0 : i32
    return %c0_i32, %arg0 : i32, i32
  }
  func.func @transform_10(%arg0: i32, %arg1: i32) -> (i32, i32) {
    %c0_i32 = arith.constant 0 : i32
    %c0_i32_0 = arith.constant 0 : i32
    return %c0_i32, %arg0 : i32, i32
  }
  func.func @transform_11(%arg0: i32, %arg1: i32) -> (i32, i32) {
    %c0_i32 = arith.constant 0 : i32
    %c0_i32_0 = arith.constant 0 : i32
    return %c0_i32, %arg0 : i32, i32
  }
  func.func @transform_12(%arg0: i32, %arg1: i32) -> (i32, i32) {
    %c0_i32 = arith.constant 0 : i32
    %c0_i32_0 = arith.constant 0 : i32
    return %c0_i32, %arg0 : i32, i32
  }
  func.func @transform_13(%arg0: i32, %arg1: i32) -> (i32, i32) {
    %c0_i32 = arith.constant 0 : i32
    %c0_i32_0 = arith.constant 0 : i32
    return %c0_i32, %arg0 : i32, i32
  }
  func.func @transform_14(%arg0: i32, %arg1: i32) -> (i32, i32) {
    %c0_i32 = arith.constant 0 : i32
    %c0_i32_0 = arith.constant 0 : i32
    return %c0_i32, %arg0 : i32, i32
  }
}

</mosaic_0001>

<bundles_post_ra>
// kernel: run.1
= control target key start
LH: loop header
LB: loop body
LE: loop exit
PB: predicated region body
PF: predicated region fallthrough
CT: control target
= control target key end

     0   :  { %20 = vsyncpa [#allocation10], 0  ;;  %s8754_s0 = inlined_call_operand.hbm [shape: f32[16,512], index: 0, kind: input, shape index: {}]   ;;  %s8755_s1 = inlined_call_operand.hbm [shape: f32[9,512], index: 1, kind: input, shape index: {}]   ;;  %s8756_s2 = inlined_call_operand.hbm [shape: f32[16,1], index: 2, kind: input, shape index: {}]   ;;  %s8757_s3 = inlined_call_operand.hbm [shape: f32[72,296], index: 3, kind: input, shape index: {}]   ;;  %s8758_s4 = inlined_call_operand.hbm [shape: f32[32,152], index: 4, kind: input, shape index: {}]   ;;  %s8759_s5 = inlined_call_operand.hbm [shape: f32[32,80], index: 5, kind: input, shape index: {}]   ;;  %s8760_s6 = inlined_call_operand.hbm [shape: f32[16,56], index: 6, kind: input, shape index: {}]   ;;  %s8761_s7 = inlined_call_operand.hbm [shape: f32[16,152], index: 7, kind: input, shape index: {}]   ;;  %s8762_s8 = inlined_call_operand.hbm [shape: f32[1,16,512], index: 8, kind: output, shape index: {0}]   ;;  %s8763_s9 = inlined_call_operand.hbm [shape: f32[8,512], index: 9, kind: output, shape index: {1}]   ;;  %s8764_s10 = inlined_call_operand.hbm [shape: f32[8,512], index: 10, kind: output, shape index: {2}]   ;;  %s8765_s11 = inlined_call_operand.hbm [shape: f32[8,512], index: 11, kind: output, shape index: {3}]   ;;  %s8766_s12 = inlined_call_operand.hbm [shape: f32[16,512], index: 12, kind: output, shape index: {4}]   ;;  %s8767_s13 = inlined_call_operand.hbm [shape: f32[16,512], index: 13, kind: output, shape index: {5}]   ;;  %s8768_s14 = inlined_call_operand.hbm [shape: f32[16,512], index: 14, kind: output, shape index: {6}]  }
   0x1   :  { %21 = vsyncpa [#allocation13], 0 }
   0x2   :  { %22 = vsyncpa [#allocation16], 0 }
   0x3   :  { %23 = vsyncpa [#allocation19], 0 }
   0x4   :  { %24 = vsyncpa [#allocation22], 0 }
   0x5   :  { %25 = vsyncpa [#allocation11], 0 }
   0x6   :  { %26 = vsyncpa [#allocation25], 0 }
   0x7   :  { %27 = vsyncpa [#allocation28], 0 }
   0x8   :  { %28 = vsyncpa [#allocation31], 0  ;;  %s46_s15 = sshll.u32 %s8755_s1, 4  ;;  %s4854_s16 = smov [#allocation12]   ;;  %s47_s15 = int_to_ptr.hbm [resolvable:$true] %s46_s15 }
   0x9   :  { %s48_s17 = sshll.u32 %s4854_s16, 4  ;;  %s72_s20 = sshll.u32 %s8757_s3, 4  ;;  %s49_s17 = int_to_ptr.vmem [resolvable:$true] %s48_s17  ;;  %s73_s20 = int_to_ptr.hbm [resolvable:$true] %s72_s20 }
   0xa   :  { %s4855_s21 = smov 512   ;;  %s4856_s22 = smov 32  }
   0xb   :  { %54 = dma.hbm_to_vmem [thread:$0]  %s47_s15, 1024, %s49_s17, [#allocation13], %s4855_s21, %s4855_s21, %s4856_s22  }
   0xc   :  { %s4857_s23 = smov [#allocation15]   ;;  %s4858_s25 = smov 384  }
   0xd   :  { %s74_s24 = sshll.u32 %s4857_s23, 4  ;;  %s4859_s1 = smov 24   ;;  %s75_s24 = int_to_ptr.vmem [resolvable:$true] %s74_s24 }
   0xe   :  { %80 = dma.hbm_to_vmem [thread:$0]  %s73_s20, 3456, %s75_s24, [#allocation16], %s4858_s25, %s4858_s25, %s4859_s1  }
   0xf   :  { %s98_s28 = sshll.u32 %s8759_s5, 4  ;;  %s4860_s29 = smov [#allocation18]   ;;  %s99_s28 = int_to_ptr.hbm [resolvable:$true] %s98_s28 }
  0x10   :  { %s100_s3 = sshll.u32 %s4860_s29, 4  ;;  %s33_s18 = sshll.u32 %s8754_s0, 4  ;;  %s101_s3 = int_to_ptr.vmem [resolvable:$true] %s100_s3  ;;  %s34_s18 = int_to_ptr.hbm [resolvable:$true] %s33_s18 }
  0x11   :  { %s4861_s15 = smov 128   ;;  %s4862_s17 = smov 8  }
  0x12   :  { %106 = dma.hbm_to_vmem [thread:$0]  %s99_s28, 512, %s101_s3, [#allocation19], %s4861_s15, %s4861_s15, %s4862_s17  }
  0x13   :  { %s4863_s19 = smov [#allocation9]   ;;  %s59_s5 = sshll.u32 %s8756_s2, 4  ;;  %s60_s5 = int_to_ptr.hbm [resolvable:$true] %s59_s5 }
  0x14   :  { %s35_s20 = sshll.u32 %s4863_s19, 4  ;;  %s85_s1 = sshll.u32 %s8758_s4, 4  ;;  %s36_s20 = int_to_ptr.vmem [resolvable:$true] %s35_s20  ;;  %s86_s1 = int_to_ptr.hbm [resolvable:$true] %s85_s1 }
  0x15   :  { %41 = dma.hbm_to_vmem [thread:$0]  %s34_s18, 1024, %s36_s20, [#allocation10], %s4855_s21, %s4855_s21, %s4856_s22  }
  0x16   :  { %s4864_s26 = smov [#allocation14]   ;;  %s4865_s28 = smov [#allocation17]  }
  0x17   :  { %s61_s27 = sshll.u32 %s4864_s26, 4  ;;  %s87_s2 = sshll.u32 %s4865_s28, 4  ;;  %s62_s27 = int_to_ptr.vmem [resolvable:$true] %s61_s27  ;;  %s88_s2 = int_to_ptr.vmem [resolvable:$true] %s87_s2 }
  0x18   :  { %67 = dma.hbm_to_vmem [thread:$0]  %s60_s5, 256, %s62_s27, [#allocation13], %s4861_s15, %s4861_s15, %s4862_s17  }
  0x19   :  { %s4866_s29 = smov 256   ;;  %s4867_s3 = smov 16  }
  0x1a   :  { %93 = dma.hbm_to_vmem [thread:$0]  %s86_s1, 1024, %s88_s2, [#allocation16], %s4866_s29, %s4866_s29, %s4867_s3  }
  0x1b   :  { %s111_s18 = sshll.u32 %s8760_s6, 4  ;;  %s4868_s4 = smov [#allocation20]   ;;  %s112_s18 = int_to_ptr.hbm [resolvable:$true] %s111_s18 }
  0x1c   :  { %s113_s19 = sshll.u32 %s4868_s4, 4  ;;  %s124_s24 = sshll.u32 %s8761_s7, 4  ;;  %s114_s19 = int_to_ptr.vmem [resolvable:$true] %s113_s19  ;;  %s125_s24 = int_to_ptr.hbm [resolvable:$true] %s124_s24 }
  0x1d   :  { %119 = dma.hbm_to_vmem [thread:$0]  %s112_s18, 256, %s114_s19, [#allocation19], %s4861_s15, %s4861_s15, %s4862_s17  }
  0x1e   :  { %s4869_s5 = smov [#allocation21]  }
  0x1f   :  { %s126_s0 = sshll.u32 %s4869_s5, 4  ;;  %s127_s0 = int_to_ptr.vmem [resolvable:$true] %s126_s0 }
  0x20   :  { %132 = dma.hbm_to_vmem [thread:$0]  %s125_s24, 512, %s127_s0, [#allocation22], %s4866_s29, %s4866_s29, %s4867_s3  }
  0x21   :  { %4836 = dma.done.wait [#allocation10], 1024  }
  0x22   :  { %4837 = vsyncadd [#allocation10], 4294966272 }
  0x23   :  { %4838 = dma.done.wait [#allocation13], 1280  }
  0x24   :  { %4839 = vsyncadd [#allocation13], 4294966016 }
  0x25   :  { %4840 = dma.done.wait [#allocation16], 4480  }
  0x26   :  { %4841 = vsyncadd [#allocation16], 4294962816 }
  0x27   :  { %4842 = dma.done.wait [#allocation19], 768  }
  0x28   :  { %4843 = vsyncadd [#allocation19], 4294966528 }
  0x29   :  { %4844 = dma.done.wait [#allocation22], 512  }
  0x2a   :  { %4845 = vsyncadd [#allocation22], 4294966784  ;;  %v5001_v0 = vld [vmem:[#allocation9 + $0x20] sm:$0xff]  ;;  %s4870_s6 = smov 121   ;;  %s4871_s7 = smov 120   ;;  %v5011_v2 = vld [vmem:[#allocation9 + $0x28] sm:$0xff]  ;;  %v289_v14 = vlaneseq }
  0x2b   :  { %v5003_v1 = vld [vmem:[#allocation9] sm:$0xff]  ;;  %462 = vrot.lane.b32.xlu2 %v5001_v0, %s4870_s6  ;;  %499 = vrot.lane.b32.xlu0 %v5001_v0, %s4871_s7  ;;  %v5013_v3 = vld [vmem:[#allocation9 + $0x8] sm:$0xff]  ;;  %s4872_s15 = smov 127   ;;  %v5033_v4 = vld [vmem:[#allocation9 + $0x38] sm:$0xff]  ;;  %s4873_s25 = smov 1   ;;  %v8773_v8 = vmov 0.0  }
  0x2c   :  { %497 = vrot.lane.b32.xlu1 %v5003_v1, %s4871_s7  ;;  %v5041_v5 = vld [vmem:[#allocation9 + $0x18] sm:$0xff]  ;;  %s4874_s1 = smov 7   ;;  %s4875_s26 = smov 9   ;;  %v5067_v6 = vld [vmem:[#allocation9 + $0x10] sm:$0xff]  ;;  %v5119_v16 = vand.u32 127, %v289_v14  ;;  %v5121_v17 = vld [vmem:[#allocation12] sm:$0xff] }
  0x2d   :  { %v5069_v7 = vld [vmem:[#allocation9 + $0x30] sm:$0xff]  ;;  %s4877_s27 = smov 119   ;;  %v5129_v18 = vperm.slane %v5121_v17, 7  ;;  %v5150_v25 = vperm.slane %v5121_v17, 6  ;;  %v5181_v34 = vperm.slane %v5121_v17, 5  ;;  %v5209_v42 = vperm.slane %v5121_v17, 3 }
  0x2e   :  { %vm8869_vm0 = vcmp.lt.s32.totalorder %v5119_v16, 120  ;;  %vm476_vm1 = vcmp.lt.s32.totalorder %v5119_v16, 121  ;;  %vm439_vm2 = vcmp.lt.s32.totalorder %v5119_v16, 127  ;;  %vm402_vm3 = vcmp.lt.s32.totalorder %v5119_v16, 1  ;;  %s3714_s2 = sshll.u32 %s8763_s9, 4  ;;  %s4880_s29 = smov [#allocation24]   ;;  %s3715_s2 = int_to_ptr.hbm [resolvable:$true] %s3714_s2 }
  0x2f   :  { %8944 = vst [vmem:[#allocation42_spill] sm:$0xff] %v5129_v18  ;;  %vm365_vm4 = vcmp.lt.s32.totalorder %v5119_v16, 7  ;;  %v5232_v48 = vperm.slane %v5121_v17, 2  ;;  %vm8872_vm5 = vcmp.lt.s32.totalorder %v5119_v16, 8  ;;  %v5273_v61 = vperm.slane %v5121_v17, 1  ;;  %s3712_s3 = sshll.u32 %s4880_s29, 4  ;;  %s3713_s3 = int_to_ptr.vmem [resolvable:$true] %s3712_s3 }
  0x30   :  { %8945 = vst [vmem:[#allocation43_spill] sm:$0xff] %v5150_v25  ;;  %vm8870_vm6 = vcmp.lt.s32.totalorder %v5119_v16, 119  ;;  %vm8871_vm7 = vcmp.lt.s32.totalorder %v5119_v16, 9  ;;  %vm854_vm8 = vcmask 326656   ;;  %s4881_s30 = smov [#allocation27]   ;;  %s3736_s19 = sshll.u32 %s8765_s11, 4  ;;  %s3737_s19 = int_to_ptr.hbm [resolvable:$true] %s3736_s19 }
  0x31   :  { %8947 = vst [vmem:[#allocation45_spill] sm:$0xff] %v5181_v34  ;;  %s3734_s16 = sshll.u32 %s4881_s30, 4  ;;  %s3759_s24 = sshll.u32 %s8767_s13, 4  ;;  %s3735_s16 = int_to_ptr.vmem [resolvable:$true] %s3734_s16  ;;  %s3760_s24 = int_to_ptr.hbm [resolvable:$true] %s3759_s24 }
  0x32   :  { %8948 = vst [vmem:[#allocation46_spill] sm:$0xff] %v5209_v42  ;;  %s4882_s5 = smov [#allocation30]   ;;  %s4883_s11 = smov [#allocation26]  }
  0x33   :  { %466 = vrot.lane.b32.xlu2 %v5011_v2, %s4870_s6  ;;  %503 = vrot.lane.b32.xlu0 %v5011_v2, %s4871_s7  ;;  %8950 = vst [vmem:[#allocation48_spill] sm:$0xff] %v5232_v48  ;;  %s3757_s9 = sshll.u32 %s4882_s5, 4  ;;  %s3758_s9 = int_to_ptr.vmem [resolvable:$true] %s3757_s9 }
  0x34   :  { %501 = vrot.lane.b32.xlu1 %v5013_v3, %s4871_s7  ;;  %8953 = vst [vmem:[#allocation51_spill] sm:$0xff] %v5273_v61 }
  0x3b   :  { %425 = vrot.lane.b32.xlu2 %v5001_v0, %s4872_s15  ;;  %460 = vrot.lane.b32.xlu0 %v5003_v1, %s4870_s6 }
  0x3c   :  { %464 = vrot.lane.b32.xlu1 %v5013_v3, %s4870_s6 }
  0x43   :  { %427 = vrot.lane.b32.xlu2 %v5013_v3, %s4872_s15  ;;  %429 = vrot.lane.b32.xlu0 %v5011_v2, %s4872_s15 }
  0x44   :  { %423 = vrot.lane.b32.xlu1 %v5003_v1, %s4872_s15 }
  0x4b   :  { %386 = vrot.lane.b32.xlu2 %v5003_v1, %s4873_s25  ;;  %388 = vrot.lane.b32.xlu0 %v5001_v0, %s4873_s25 }
  0x4c   :  { %400 = vrot.lane.b32.xlu1 %v5033_v4, %s4873_s25 }
  0x53   :  { %363 = vrot.lane.b32.xlu2 %v5033_v4, %s4874_s1  ;;  %398 = vrot.lane.b32.xlu0 %v5041_v5, %s4873_s25 }
  0x54   :  { %351 = vrot.lane.b32.xlu1 %v5001_v0, %s4874_s1 }
  0x5b   :  { %314 = vrot.lane.b32.xlu2 %v5001_v0, %s4862_s17  ;;  %349 = vrot.lane.b32.xlu0 %v5003_v1, %s4874_s1 }
  0x5c   :  { %361 = vrot.lane.b32.xlu1 %v5041_v5, %s4874_s1 }
  0x63   :  { %324 = vrot.lane.b32.xlu2 %v5041_v5, %s4862_s17  ;;  %326 = vrot.lane.b32.xlu0 %v5033_v4, %s4862_s17 }
  0x64   :  { %312 = vrot.lane.b32.xlu1 %v5003_v1, %s4862_s17 }
  0x6b   :  { %273 = vrot.lane.b32.xlu2 %v5003_v1, %s4875_s26  ;;  %275 = vrot.lane.b32.xlu0 %v5001_v0, %s4875_s26 }
  0x6c   :  { %287 = vrot.lane.b32.xlu1 %v5033_v4, %s4875_s26 }
  0x73   :  { %505 = vrot.lane.b32.xlu2 %v5067_v6, %s4871_s7  ;;  %285 = vrot.lane.b32.xlu0 %v5041_v5, %s4875_s26 }
  0x74   :  { %507 = vrot.lane.b32.xlu1 %v5069_v7, %s4871_s7 }
  0x7b   :  { %4002 = vrot.lane.b32.xlu2 %v8773_v8, %s4877_s27  ;;  %470 = vrot.lane.b32.xlu0 %v5069_v7, %s4870_s6 }
  0x7c   :  { %468 = vrot.lane.b32.xlu1 %v5067_v6, %s4870_s6 }
  0x83   :  { %431 = vrot.lane.b32.xlu2 %v5067_v6, %s4872_s15  ;;  %433 = vrot.lane.b32.xlu0 %v5069_v7, %s4872_s15 }
  0x84   :  { %4007 = vrot.lane.b32.xlu1 %v8773_v8, %s4877_s27 }
  0x85   :  { %v5089_v9 = vpop.permute.xlu2 %462 }
  0x8b   :  { %392 = vrot.lane.b32.xlu2 %v5011_v2, %s4873_s25  ;;  %4012 = vrot.lane.b32.xlu0 %v8773_v8, %s4871_s7 }
  0x8c   :  { %4017 = vrot.lane.b32.xlu1 %v8773_v8, %s4871_s7 }
  0x8d   :  { %v5097_v10 = vpop.permute.xlu2 %466 }
  0x8e   :  { %v482_v26 = vsel %vm476_vm1, %v5089_v9, %v5097_v10 }
  0x8f   :  { %v493_v28 = vmul.f32 %v5150_v25, %v482_v26  ;;  %v5290_v26 = vld [vmem:[#allocation12 + $0x20] ss:$0 sm:$0xff] }
  0x93   :  { %353 = vrot.lane.b32.xlu2 %v5013_v3, %s4874_s1  ;;  %390 = vrot.lane.b32.xlu0 %v5013_v3, %s4873_s25 }
  0x94   :  { %355 = vrot.lane.b32.xlu1 %v5011_v2, %s4874_s1 }
  0x95   :  { %v5105_v11 = vpop.permute.xlu2 %425 }
  0x9b   :  { %279 = vrot.lane.b32.xlu2 %v5011_v2, %s4875_s26  ;;  %318 = vrot.lane.b32.xlu0 %v5011_v2, %s4862_s17 }
  0x9c   :  { %316 = vrot.lane.b32.xlu1 %v5013_v3, %s4862_s17 }
  0x9d   :  { %v5113_v12 = vpop.permute.xlu0 %499  ;;  %v5115_v13 = vpop.permute.xlu2 %427 }
  0x9e   :  { %v5117_v15 = vpop.permute.xlu1 %497 }
  0xa3   :  { %4027 = vrot.lane.b32.xlu2 %v8773_v8, %s4871_s7  ;;  %4022 = vrot.lane.b32.xlu0 %v8773_v8, %s4877_s27 }
  0xa4   :  { %277 = vrot.lane.b32.xlu1 %v5013_v3, %s4875_s26 }
  0xa5   :  { %v5133_v19 = vpop.permute.xlu0 %503  ;;  %v5135_v20 = vpop.permute.xlu2 %386 }
  0xa6   :  { %v5137_v21 = vpop.permute.xlu1 %501  ;;  %v519_v22 = vsel %vm8869_vm0, %v5113_v12, %v5133_v19 }
  0xa7   :  { %v530_v23 = vmul.f32 %v5129_v18, %v519_v22  ;;  %v518_v24 = vsel %vm8869_vm0, %v5117_v15, %v5137_v21 }
  0xa8   :  { %v526_v27 = vmul.f32 %v5129_v18, %v518_v24 }
  0xa9   :  { %882 = vmatpush.msra.mxu0 %v530_v23 }
  0xab   :  { %4042 = vrot.lane.b32.xlu2 %v8773_v8, %s4872_s15  ;;  %4032 = vrot.lane.b32.xlu0 %v8773_v8, %s4870_s6 }
  0xac   :  { %4037 = vrot.lane.b32.xlu1 %v8773_v8, %s4870_s6  ;;  %883 = vmatpush.msra.mxu0 %v526_v27 }
  0xad   :  { %v5164_v29 = vpop.permute.xlu2 %363  ;;  %v5166_v30 = vpop.permute.xlu0 %460 }
  0xae   :  { %8946 = vst [vmem:[#allocation44_spill] sm:$0xff] %v5164_v29  ;;  %884 = vmatpush.msra.mxu0 %v493_v28  ;;  %v5168_v31 = vpop.permute.xlu1 %464 }
  0xaf   :  { %v481_v32 = vsel %vm476_vm1, %v5166_v30, %v5168_v31 }
  0xb0   :  { %v489_v33 = vmul.f32 %v5150_v25, %v481_v32 }
  0xb2   :  { %885 = vmatpush.msra.mxu0 %v489_v33  ;;  %v8770_v33 = vmov 1.0  }
  0xb3   :  { %4057 = vrot.lane.b32.xlu2 %v8773_v8, %s4872_s15  ;;  %4047 = vrot.lane.b32.xlu0 %v8773_v8, %s4870_s6 }
  0xb4   :  { %4052 = vrot.lane.b32.xlu1 %v8773_v8, %s4872_s15  ;;  %981 = vmatpush.msra.mxu2 %v8770_v33 }
  0xb5   :  { %v5185_v35 = vpop.permute.xlu2 %314  ;;  %v5187_v36 = vpop.permute.xlu0 %429 }
  0xb6   :  { %v5189_v37 = vpop.permute.xlu1 %423  ;;  %v445_v38 = vsel %vm439_vm2, %v5105_v11, %v5187_v36 }
  0xb7   :  { %v456_v39 = vmul.f32 %v5181_v34, %v445_v38  ;;  %v444_v40 = vsel %vm439_vm2, %v5189_v37, %v5115_v13 }
  0xb8   :  { %v452_v41 = vmul.f32 %v5181_v34, %v444_v40  ;;  %v5314_v40 = vperm.slane %v5121_v17, 0  ;;  %v5331_v17 = vld [vmem:[#allocation12 + $0x8] sm:$0xff] }
  0xb9   :  { %886 = vmatpush.msra.mxu0 %v456_v39 }
  0xba   :  { %8956 = vst [vmem:[#allocation54_spill] sm:$0xff] %v5314_v40 }
  0xbb   :  { %4072 = vrot.lane.b32.xlu2 %v8773_v8, %s4874_s1  ;;  %4062 = vrot.lane.b32.xlu0 %v8773_v8, %s4873_s25 }
  0xbc   :  { %4067 = vrot.lane.b32.xlu1 %v8773_v8, %s4873_s25  ;;  %887 = vmatpush.msra.mxu0 %v452_v41 }
  0xbd   :  { %v5211_v43 = vpop.permute.xlu2 %324  ;;  %v5213_v44 = vpop.permute.xlu0 %388 }
  0xbe   :  { %8949 = vst [vmem:[#allocation47_spill] sm:$0xff] %v5211_v43  ;;  %888 = vmatpush.msra.mxu0 %v5001_v0  ;;  %v5216_v45 = vpop.permute.xlu1 %400 }
  0xbf   :  { %v410_v46 = vsel %vm402_vm3, %v5216_v45, %v5213_v44 }
  0xc0   :  { %889 = vmatpush.msra.mxu0 %v5003_v1  ;;  %v419_v47 = vmul.f32 %v5209_v42, %v410_v46 }
  0xc2   :  { %890 = vmatpush.msra.mxu0 %v419_v47 }
  0xc3   :  { %4087 = vrot.lane.b32.xlu2 %v8773_v8, %s4870_s6  ;;  %4077 = vrot.lane.b32.xlu0 %v8773_v8, %s4873_s25 }
  0xc4   :  { %4082 = vrot.lane.b32.xlu1 %v8773_v8, %s4874_s1 }
  0xc5   :  { %v5234_v49 = vpop.permute.xlu2 %273  ;;  %v5236_v50 = vpop.permute.xlu0 %398 }
  0xc6   :  { %8951 = vst [vmem:[#allocation49_spill] sm:$0xff] %v5236_v50  ;;  %v5238_v51 = vpop.permute.xlu1 %351  ;;  %v409_v52 = vsel %vm402_vm3, %v5236_v50, %v5135_v20 }
  0xc7   :  { %v415_v53 = vmul.f32 %v5209_v42, %v409_v52  ;;  %v373_v54 = vsel %vm365_vm4, %v5164_v29, %v5238_v51  ;;  %v5647_v29 = vld [vmem:[#allocation15 + $0xa8] sm:$0xff] }
  0xc8   :  { %v382_v55 = vmul.f32 %v5232_v48, %v373_v54 }
  0xc9   :  { %891 = vmatpush.msra.mxu0 %v415_v53 }
  0xcb   :  { %511 = vrot.lane.b32.xlu2 %v5033_v4, %s4871_s7  ;;  %4092 = vrot.lane.b32.xlu0 %v8773_v8, %s4862_s17 }
  0xcc   :  { %4097 = vrot.lane.b32.xlu1 %v8773_v8, %s4874_s1  ;;  %892 = vmatpush.msra.mxu0 %v382_v55 }
  0xcd   :  { %v5256_v56 = vpop.permute.xlu2 %505  ;;  %v5258_v57 = vpop.permute.xlu0 %349 }
  0xce   :  { %v5260_v58 = vpop.permute.xlu1 %361 }
  0xcf   :  { %8952 = vst [vmem:[#allocation50_spill] sm:$0xff] %v5260_v58  ;;  %v372_v59 = vsel %vm365_vm4, %v5260_v58, %v5258_v57  ;;  %v5537_v58 = vperm.slane %v5331_v17, 0 }
  0xd0   :  { %v378_v60 = vmul.f32 %v5232_v48, %v372_v59 }
  0xd1   :  { %8977 = vst [vmem:[#allocation74_spill] sm:$0xff] %v5537_v58 }
  0xd2   :  { %893 = vmatpush.msra.mxu0 %v378_v60 }
  0xd3   :  { %509 = vrot.lane.b32.xlu2 %v5041_v5, %s4871_s7  ;;  %4102 = vrot.lane.b32.xlu0 %v8773_v8, %s4862_s17 }
  0xd4   :  { %4107 = vrot.lane.b32.xlu1 %v8773_v8, %s4872_s15 }
  0xd5   :  { %v5277_v62 = vpop.permute.xlu2 %4002  ;;  %v5279_v63 = vpop.permute.xlu0 %326 }
  0xd6   :  { %8954 = vst [vmem:[#allocation52_spill] sm:$0xff] %v5277_v62  ;;  %v8772_v14 = vunpack.i.h.bf16 %v5277_v62  ;;  %v8769_v22 = vunpack.i.l.bf16 %v5277_v62  ;;  %v5283_v23 = vpop.permute.xlu1 %312  ;;  %v336_v24 = vsel %vm8872_vm5, %v5279_v63, %v5185_v35 }
  0xd7   :  { %8955 = vst [vmem:[#allocation53_spill] sm:$0xff] %v5279_v63  ;;  %v345_v27 = vmul.f32 %v5273_v61, %v336_v24  ;;  %v335_v28 = vsel %vm8872_vm5, %v5211_v43, %v5283_v23  ;;  %v5346_v24 = vperm.slane %v5331_v17, 7  ;;  %v8970_v43 = vmov 0.0  }
  0xd8   :  { %v341_v32 = vmul.f32 %v5273_v61, %v335_v28  ;;  %v816_v38 = vsel %vm8870_vm6, %v8769_v22, %v8772_v14 }
  0xd9   :  { %894 = vmatpush.msra.mxu0 %v345_v27  ;;  %v823_v39 = vmul.f32 %v5290_v26, %v816_v38  ;;  %8960 = vst [vmem:[#allocation58_spill] sm:$0xff] %v5346_v24 }
  0xdb   :  { %474 = vrot.lane.b32.xlu2 %v5033_v4, %s4870_s6  ;;  %4112 = vrot.lane.b32.xlu0 %v8773_v8, %s4875_s26 }
  0xdc   :  { %4117 = vrot.lane.b32.xlu1 %v8773_v8, %s4862_s17  ;;  %895 = vmatpush.msra.mxu0 %v341_v32  ;;  %v516_v32 = vsel %vm8869_vm0, %v5137_v21, %v5256_v56 }
  0xdd   :  { %v5316_v41 = vpop.permute.xlu2 %431  ;;  %v5318_v46 = vpop.permute.xlu0 %275  ;;  %982 = vmatpush.msra.mxu2 %v823_v39  ;;  %v5358_v39 = vld [vmem:[#allocation15] sm:$0xff] }
  0xde   :  { %v5320_v47 = vpop.permute.xlu1 %287  ;;  %v442_v14 = vsel %vm439_vm2, %v5115_v13, %v5316_v41  ;;  %v5434_v13 = vperm.slane %v5331_v17, 3 }
  0xdf   :  { %8957 = vst [vmem:[#allocation55_spill] sm:$0xff] %v5320_v47  ;;  %v299_v52 = vsel %vm8871_vm7, %v5320_v47, %v5318_v46  ;;  %v5425_v47 = vld [vmem:[#allocation15 + $0x30] sm:$0xff] }
  0xe0   :  { %v308_v53 = vmul.f32 %v5314_v40, %v299_v52  ;;  %v527_v52 = vmul.f32 %v5346_v24, %v516_v32  ;;  %8966 = vst [vmem:[#allocation64_spill] sm:$0xff] %v5434_v13 }
  0xe2   :  { %896 = vmatpush.msra.mxu0 %v308_v53 }
  0xe3   :  { %540 = vrot.lane.b32.xlu2 %v5011_v2, %s4877_s27  ;;  %4122 = vrot.lane.b32.xlu0 %v8773_v8, %s4875_s26 }
  0xe4   :  { %472 = vrot.lane.b32.xlu1 %v5041_v5, %s4870_s6 }
  0xe5   :  { %v5335_v54 = vpop.permute.xlu2 %392  ;;  %v5337_v55 = vpop.permute.xlu0 %285 }
  0xe6   :  { %8958 = vst [vmem:[#allocation56_spill] sm:$0xff] %v5335_v54  ;;  %v5339_v59 = vpop.permute.xlu1 %507  ;;  %v298_v60 = vsel %vm8871_vm7, %v5337_v55, %v5234_v49 }
  0xe7   :  { %8959 = vst [vmem:[#allocation57_spill] sm:$0xff] %v5337_v55  ;;  %v304_v27 = vmul.f32 %v5314_v40, %v298_v60  ;;  %v517_v28 = vsel %vm8869_vm0, %v5133_v19, %v5339_v59  ;;  %v5367_v19 = vperm.slane %v5331_v17, 6 }
  0xe8   :  { %v531_v38 = vmul.f32 %v5346_v24, %v517_v28 }
  0xe9   :  { %897 = vmatpush.msra.mxu0 %v304_v27  ;;  %8961 = vst [vmem:[#allocation59_spill] sm:$0xff] %v5367_v19 }
  0xea   :  { %1014 = vmatpush.msra.mxu3 %v531_v38  ;;  %898 = vmatmul.f32.vlgmr.msra.gmra.mxu0 %v5358_v39  ;;  %v5387_v38 = vld [vmem:[#allocation15 + $0x18] sm:$0xff] }
  0xeb   :  { %437 = vrot.lane.b32.xlu2 %v5033_v4, %s4872_s15  ;;  %544 = vrot.lane.b32.xlu0 %v5069_v7, %s4877_s27 }
  0xec   :  { %4127 = vrot.lane.b32.xlu1 %v8773_v8, %s4875_s26  ;;  %1015 = vmatpush.msra.mxu3 %v527_v52 }
  0xed   :  { %v5371_v21 = vpop.permute.xlu2 %353  ;;  %v5373_v53 = vpop.permute.xlu0 %470  ;;  %1113 = vmatpush.msrb.mxu0 %v8770_v33 }
  0xee   :  { %8962 = vst [vmem:[#allocation60_spill] sm:$0xff] %v5371_v21  ;;  %v5376_v60 = vpop.permute.xlu1 %468  ;;  %v480_v27 = vsel %vm476_vm1, %v5097_v10, %v5373_v53 }
  0xef   :  { %v494_v28 = vmul.f32 %v5367_v19, %v480_v27  ;;  %v479_v32 = vsel %vm476_vm1, %v5168_v31, %v5376_v60  ;;  %v5402_v27 = vperm.slane %v5331_v17, 5 }
  0xf0   :  { %v490_v52 = vmul.f32 %v5367_v19, %v479_v32 }
  0xf1   :  { %1016 = vmatpush.msra.mxu3 %v494_v28  ;;  %8964 = vst [vmem:[#allocation62_spill] sm:$0xff] %v5402_v27 }
  0xf2   :  { %901 = vmatmul.f32.gmra.mxu0 %v5387_v38 }
  0xf3   :  { %4132 = vrot.lane.b32.xlu2 %v8773_v8, %s4873_s25  ;;  %538 = vrot.lane.b32.xlu0 %v5013_v3, %s4877_s27 }
  0xf4   :  { %542 = vrot.lane.b32.xlu1 %v5067_v6, %s4877_s27  ;;  %1017 = vmatpush.msra.mxu3 %v490_v52 }
  0xf5   :  { %v5397_v10 = vpop.permute.xlu2 %279  ;;  %v5399_v31 = vpop.permute.xlu0 %433 }
  0xf6   :  { %8963 = vst [vmem:[#allocation61_spill] sm:$0xff] %v5397_v10  ;;  %v5404_v28 = vpop.permute.xlu1 %4007  ;;  %v443_v32 = vsel %vm439_vm2, %v5187_v36, %v5399_v31  ;;  %v453_v36 = vmul.f32 %v5402_v27, %v442_v14 }
  0xf7   :  { %8965 = vst [vmem:[#allocation63_spill] sm:$0xff] %v5404_v28  ;;  %v8778_v22 = vunpack.i.h.bf16 %v5404_v28  ;;  %v8777_v33 = vunpack.i.l.bf16 %v5404_v28  ;;  %v457_v52 = vmul.f32 %v5402_v27, %v443_v32 }
  0xf9   :  { %1018 = vmatpush.msra.mxu3 %v457_v52  ;;  %v815_v8 = vsel %vm8870_vm6, %v8777_v33, %v8778_v22 }
  0xfa   :  { %v819_v55 = vmul.f32 %v5290_v26, %v815_v8  ;;  %904 = vmatmul.f32.gmra.mxu0 %v5425_v47 }
  0xfb   :  { %534 = vrot.lane.b32.xlu2 %v5003_v1, %s4877_s27  ;;  %435 = vrot.lane.b32.xlu0 %v5041_v5, %s4872_s15  ;;  %v408_v1 = vsel %vm402_vm3, %v5213_v44, %v5335_v54  ;;  %v5594_v54 = vld [vmem:[#allocation12 + $0x10] sm:$0xff] }
  0xfc   :  { %536 = vrot.lane.b32.xlu1 %v5001_v0, %s4877_s27  ;;  %1019 = vmatpush.msra.mxu3 %v453_v36 }
  0xfd   :  { %v5436_v32 = vpop.permute.xlu2 %4027  ;;  %v5438_v14 = vpop.permute.xlu0 %4012  ;;  %983 = vmatpush.msra.mxu2 %v819_v55  ;;  %v420_v55 = vmul.f32 %v5434_v13, %v408_v1  ;;  %v5468_v1 = vld [vmem:[#allocation15 + $0x48] sm:$0xff] }
  0xfe   :  { %8967 = vst [vmem:[#allocation65_spill] sm:$0xff] %v5436_v32  ;;  %v8783_v8 = vunpack.i.h.bf16 %v5438_v14  ;;  %v8780_v0 = vunpack.i.l.bf16 %v5438_v14  ;;  %1020 = vmatpush.msra.mxu3 %v5011_v2  ;;  %v5448_v52 = vpop.permute.xlu1 %4017 }
  0xff   :  { %8968 = vst [vmem:[#allocation66_spill] sm:$0xff] %v5438_v14  ;;  %v8782_v36 = vunpack.i.h.bf16 %v5448_v52  ;;  %v8781_v33 = vunpack.i.l.bf16 %v5448_v52 }
 0x100   :  { %8969 = vst [vmem:[#allocation67_spill] sm:$0xff] %v5448_v52  ;;  %1021 = vmatpush.msra.mxu3 %v5013_v3  ;;  %v784_v44 = vsel %vm8869_vm0, %v8780_v0, %v8783_v8  ;;  %v5497_v8 = vperm.slane %v5331_v17, 2 }
 0x101   :  { %v791_v22 = vmul.f32 %v784_v44, %v5129_v18  ;;  %v783_v2 = vsel %vm8869_vm0, %v8781_v33, %v8782_v36  ;;  %v5476_v44 = vld [vmem:[#allocation15 + $0x10] sm:$0xff] }
 0x102   :  { %1022 = vmatpush.msra.mxu3 %v420_v55  ;;  %v787_v3 = vmul.f32 %v783_v2, %v5129_v18  ;;  %907 = vmatmul.f32.gmra.mxu0 %v5468_v1  ;;  %8973 = vst [vmem:[#allocation70_spill] sm:$0xff] %v5497_v8 }
 0x103   :  { %4142 = vrot.lane.b32.xlu2 %v8970_v43, %s4862_s17  ;;  %4137 = vrot.lane.b32.xlu0 %v8970_v43, %s4874_s1 }
 0x104   :  { %396 = vrot.lane.b32.xlu1 %v5069_v7, %s4873_s25  ;;  %984 = vmatpush.msra.mxu2 %v791_v22 }
 0x105   :  { %v5478_v0 = vpop.permute.xlu2 %4042  ;;  %v5480_v55 = vpop.permute.xlu0 %390 }
 0x106   :  { %8971 = vst [vmem:[#allocation68_spill] sm:$0xff] %v5480_v55  ;;  %v5483_v2 = vpop.permute.xlu1 %355  ;;  %985 = vmatpush.msra.mxu2 %v787_v3  ;;  %v407_v33 = vsel %vm402_vm3, %v5135_v20, %v5480_v55  ;;  %v370_v3 = vsel %vm365_vm4, %v5258_v57, %v5371_v21  ;;  %v5516_v57 = vld [vmem:[#allocation15 + $0x28] sm:$0xff] }
 0x107   :  { %8972 = vst [vmem:[#allocation69_spill] sm:$0xff] %v5483_v2  ;;  %v416_v36 = vmul.f32 %v5434_v13, %v407_v33  ;;  %v371_v22 = vsel %vm365_vm4, %v5238_v51, %v5483_v2  ;;  %3816 = vmatmul.msk.f32.vlgmr.msra.gmra.mxu2 %vm854_vm8, %v5476_v44  ;;  %v5504_v33 = vld [vmem:[#allocation15 + $0x60] sm:$0xff]  ;;  %v5511_v51 = vperm.slane %v5331_v17, 1 }
 0x108   :  { %v383_v20 = vmul.f32 %v5497_v8, %v371_v22  ;;  %v5553_v17 = vld [vmem:[#allocation15 + $0x40] sm:$0xff] }
 0x109   :  { %1023 = vmatpush.msra.mxu3 %v416_v36  ;;  %8974 = vst [vmem:[#allocation71_spill] sm:$0xff] %v5511_v51  ;;  %v379_v36 = vmul.f32 %v5497_v8, %v370_v3 }
 0x10a   :  { %910 = vmatmul.f32.gmra.mxu0 %v5504_v33 }
 0x10b   :  { %4147 = vrot.lane.b32.xlu2 %v8970_v43, %s4875_s26  ;;  %394 = vrot.lane.b32.xlu0 %v5067_v6, %s4873_s25 }
 0x10c   :  { %359 = vrot.lane.b32.xlu1 %v5069_v7, %s4874_s1  ;;  %1024 = vmatpush.msra.mxu3 %v383_v20 }
 0x10d   :  { %v5518_v22 = vpop.permute.xlu2 %4057  ;;  %v5520_v18 = vpop.permute.xlu0 %318 }
 0x10e   :  { %8975 = vst [vmem:[#allocation72_spill] sm:$0xff] %v5520_v18  ;;  %1025 = vmatpush.msra.mxu3 %v379_v36  ;;  %v5523_v63 = vpop.permute.xlu1 %316  ;;  %v334_v21 = vsel %vm8872_vm5, %v5185_v35, %v5520_v18  ;;  %v297_v36 = vsel %vm8871_vm7, %v5318_v46, %v5397_v10  ;;  %v8983_v18 = vunpack.i.l.bf16 %v5436_v32 }
 0x10f   :  { %8976 = vst [vmem:[#allocation73_spill] sm:$0xff] %v5523_v63  ;;  %v346_v20 = vmul.f32 %v5511_v51, %v334_v21  ;;  %v333_v3 = vsel %vm8872_vm5, %v5283_v23, %v5523_v63  ;;  %3817 = vmatmul.msk.f32.gmra.mxu2 %vm854_vm8, %v5516_v57  ;;  %v5544_v21 = vld [vmem:[#allocation15 + $0x78] sm:$0xff]  ;;  %v309_v23 = vmul.f32 %v5537_v58, %v297_v36 }
 0x110   :  { %v342_v35 = vmul.f32 %v5511_v51, %v333_v3  ;;  %v5559_v3 = vld [vmem:[#allocation12 + $0x28] ss:$0 sm:$0xff] }
 0x111   :  { %1026 = vmatpush.msra.mxu3 %v346_v20 }
 0x112   :  { %913 = vmatmul.f32.gmra.mxu0 %v5544_v21 }
 0x113   :  { %548 = vrot.lane.b32.xlu2 %v5033_v4, %s4877_s27  ;;  %357 = vrot.lane.b32.xlu0 %v5067_v6, %s4874_s1  ;;  %v8980_v4 = vunpack.i.h.bf16 %v5277_v62 }
 0x114   :  { %322 = vrot.lane.b32.xlu1 %v5069_v7, %s4862_s17  ;;  %1027 = vmatpush.msra.mxu3 %v342_v35 }
 0x115   :  { %v5555_v20 = vpop.permute.xlu2 %4072  ;;  %v5557_v46 = vpop.permute.xlu0 %4022 }
 0x116   :  { %8978 = vst [vmem:[#allocation75_spill] sm:$0xff] %v5557_v46  ;;  %v8797_v63 = vunpack.i.l.bf16 %v5557_v46  ;;  %1028 = vmatpush.msra.mxu3 %v309_v23  ;;  %v5565_v35 = vpop.permute.xlu1 %277  ;;  %v8981_v55 = vunpack.i.h.bf16 %v5557_v46  ;;  %v5632_v46 = vld [vmem:[#allocation12 + $0x18] sm:$0xff] }
 0x117   :  { %8979 = vst [vmem:[#allocation76_spill] sm:$0xff] %v5565_v35  ;;  %v296_v36 = vsel %vm8871_vm7, %v5234_v49, %v5565_v35  ;;  %3818 = vmatmul.msk.f32.gmra.mxu2 %vm854_vm8, %v5553_v17  ;;  %v8982_v49 = vunpack.i.h.bf16 %v5404_v28 }
 0x118   :  { %v305_v2 = vmul.f32 %v5537_v58, %v296_v36  ;;  %v814_v23 = vsel %vm8870_vm6, %v8980_v4, %v8797_v63  ;;  %v8984_v36 = vunpack.i.h.bf16 %v5438_v14  ;;  %v5596_v4 = vld [vmem:[#allocation15 + $0x90] sm:$0xff]  ;;  %v5619_v14 = vperm.slane %v5594_v54, 6 }
 0x119   :  { %v824_v10 = vmul.f32 %v5559_v3, %v814_v23  ;;  %v813_v35 = vsel %vm8870_vm6, %v8982_v49, %v8981_v55  ;;  %v8985_v23 = vunpack.i.h.bf16 %v5436_v32  ;;  %v8986_v49 = vunpack.i.h.bf16 %v5448_v52 }
 0x11a   :  { %1029 = vmatpush.msra.mxu3 %v305_v2  ;;  %v782_v62 = vsel %vm8869_vm0, %v8984_v36, %v8983_v18  ;;  %v820_v18 = vmul.f32 %v5559_v3, %v813_v35  ;;  %v5613_v36 = vld [vmem:[#allocation15 + $0x58] sm:$0xff]  ;;  %8987 = vst [vmem:[#allocation77_spill] sm:$0xff] %v5619_v14  ;;  %916 = vmatmul.f32.gmra.mxu0 %v5596_v4 }
 0x11b   :  { %283 = vrot.lane.b32.xlu2 %v5069_v7, %s4875_s26  ;;  %320 = vrot.lane.b32.xlu0 %v5067_v6, %s4862_s17  ;;  %v781_v7 = vsel %vm8869_vm0, %v8986_v49, %v8985_v23  ;;  %v792_v2 = vmul.f32 %v782_v62, %v5346_v24 }
 0x11c   :  { %546 = vrot.lane.b32.xlu1 %v5041_v5, %s4877_s27  ;;  %1114 = vmatpush.msrb.mxu0 %v824_v10  ;;  %v788_v28 = vmul.f32 %v781_v7, %v5346_v24 }
 0x11d   :  { %v5615_v63 = vpop.permute.xlu2 %4087  ;;  %v4033_v55 = vpop.permute.xlu0 %4032  ;;  %1030 = vmatmul.f32.vlgmr.msra.gmra.mxu3 %v5358_v39 }
 0x11e   :  { %v4090_v5 = vunpack.i.h.bf16 %v5615_v63  ;;  %v4089_v10 = vunpack.i.l.bf16 %v5615_v63  ;;  %v4035_v35 = vunpack.i.h.bf16 %v4033_v55  ;;  %v4034_v23 = vunpack.i.l.bf16 %v4033_v55  ;;  %v4038_v49 = vpop.permute.xlu1 %4037  ;;  %1115 = vmatpush.msrb.mxu0 %v820_v18 }
 0x11f   :  { %v4040_v52 = vunpack.i.h.bf16 %v4038_v49  ;;  %v4039_v32 = vunpack.i.l.bf16 %v4038_v49  ;;  %3819 = vmatmul.msk.f32.gmra.mxu2 %vm854_vm8, %v5613_v36  ;;  %v8988_v63 = vunpack.i.h.bf16 %v5478_v0  ;;  %v8989_v55 = vunpack.i.l.bf16 %v5478_v0 }
 0x120   :  { %1116 = vmatpush.msrb.mxu0 %v792_v2  ;;  %v750_v62 = vsel %vm476_vm1, %v4034_v23, %v4035_v35  ;;  %v748_v39 = vsel %vm476_vm1, %v4035_v35, %v4089_v10 }
 0x121   :  { %v718_v18 = vsel %vm439_vm2, %v8989_v55, %v8988_v63  ;;  %v760_v7 = vmul.f32 %v750_v62, %v5367_v19  ;;  %v761_v49 = vmul.f32 %v748_v39, %v5619_v14  ;;  %v749_v2 = vsel %vm476_vm1, %v4039_v32, %v4040_v52 }
 0x122   :  { %v747_v24 = vsel %vm476_vm1, %v4040_v52, %v4090_v5  ;;  %1117 = vmatpush.msrb.mxu0 %v788_v28  ;;  %v756_v35 = vmul.f32 %v749_v2, %v5367_v19  ;;  %v5654_v62 = vperm.slane %v5632_v46, 7  ;;  %v728_v28 = vmul.f32 %v718_v18, %v5402_v27  ;;  %v5660_v52 = vld [vmem:[#allocation15 + $0x70] sm:$0xff] }
 0x123   :  { %4157 = vrot.lane.b32.xlu2 %v8970_v43, %s4871_s7  ;;  %281 = vrot.lane.b32.xlu0 %v5067_v6, %s4875_s26  ;;  %v757_v39 = vmul.f32 %v747_v24, %v5619_v14  ;;  %v8812_v6 = vunpack.i.h.bf16 %v5518_v22 }
 0x124   :  { %8990 = vst [vmem:[#allocation78_spill] sm:$0xff] %v5654_v62  ;;  %4152 = vrot.lane.b32.xlu1 %v8970_v43, %s4877_s27  ;;  %1058 = vmatpush.msrb.mxu2 %v760_v7 }
 0x125   :  { %1190 = vmatpush.msrb.mxu3 %v761_v49  ;;  %v5662_v63 = vpop.permute.xlu2 %511  ;;  %v4048_v55 = vpop.permute.xlu0 %4047  ;;  %919 = vmatmul.f32.gmra.mxu0 %v5647_v29 }
 0x126   :  { %v521_v24 = vsel %vm8869_vm0, %v5662_v63, %v5113_v12  ;;  %v4050_v2 = vunpack.i.h.bf16 %v4048_v55  ;;  %v4049_v19 = vunpack.i.l.bf16 %v4048_v55  ;;  %v5670_v7 = vpop.permute.xlu1 %4052  ;;  %1059 = vmatpush.msrb.mxu2 %v756_v35  ;;  %1033 = vmatmul.f32.gmra.mxu3 %v5387_v38 }
 0x127   :  { %v533_v18 = vmul.f32 %v5654_v62, %v521_v24  ;;  %v8811_v49 = vunpack.i.h.bf16 %v5670_v7  ;;  %v4054_v50 = vunpack.i.l.bf16 %v5670_v7  ;;  %1191 = vmatpush.msrb.mxu3 %v757_v39  ;;  %3820 = vmatmul.msk.f32.gmra.mxu2 %vm854_vm8, %v5660_v52 }
 0x128   :  { %v5681_v12 = vsel %vm476_vm1, %v4089_v10, %v4049_v19  ;;  %1060 = vmatpush.msrb.mxu2 %v728_v28  ;;  %v752_v38 = vsel %vm476_vm1, %v4049_v19, %v4034_v23  ;;  %v751_v35 = vsel %vm476_vm1, %v4050_v2, %v4039_v32  ;;  %v8991_v10 = vunpack.i.l.bf16 %v5478_v0  ;;  %v5699_v23 = vld [vmem:[#allocation15 + $0xc0] sm:$0xff] }
 0x129   :  { %1278 = vmatpush.msra.mxu0 %v533_v18  ;;  %v759_v55 = vmul.f32 %v752_v38, %v5150_v25  ;;  %v717_v39 = vsel %vm439_vm2, %v4054_v50, %v8811_v49  ;;  %v8992_v28 = vunpack.i.l.bf16 %v5518_v22  ;;  %v755_v32 = vmul.f32 %v751_v35, %v5150_v25 }
 0x12a   :  { %v724_v24 = vmul.f32 %v717_v39, %v5402_v27  ;;  %v5704_v18 = vsel %vm476_vm1, %v4090_v5, %v4050_v2  ;;  %v8820_v38 = vunpack.i.h.bf16 %v5555_v20  ;;  %v719_v49 = vsel %vm439_vm2, %v8812_v6, %v4054_v50 }
 0x12b   :  { %v720_v19 = vsel %vm439_vm2, %v8992_v28, %v8991_v10  ;;  %926 = vmatpush.msra.mxu1 %v759_v55  ;;  %v5712_v10 = vld [vmem:[#allocation15 + $0x88] sm:$0xff]  ;;  %v723_v6 = vmul.f32 %v719_v49, %v5181_v34  ;;  %4172 = vrot.lane.b32.xlu2 %v8970_v43, %s4873_s25 }
 0x12c   :  { %1061 = vmatpush.msrb.mxu2 %v724_v24  ;;  %v727_v5 = vmul.f32 %v720_v19, %v5181_v34  ;;  %4167 = vrot.lane.b32.xlu1 %v8970_v43, %s4872_s15 }
 0x12d   :  { %v5714_v28 = vpop.permute.xlu2 %509  ;;  %v5716_v55 = vpop.permute.xlu0 %4062  ;;  %927 = vmatpush.msra.mxu1 %v755_v32  ;;  %922 = vmatmul.f32.gmra.mxu0 %v5699_v23 }
 0x12e   :  { %v520_v2 = vsel %vm8869_vm0, %v5714_v28, %v5117_v15  ;;  %v8815_v35 = vunpack.i.h.bf16 %v5716_v55  ;;  %v4064_v50 = vunpack.i.l.bf16 %v5716_v55  ;;  %v5726_v24 = vpop.permute.xlu1 %4067  ;;  %1062 = vmatpush.msrb.mxu2 %v8970_v43  ;;  %1036 = vmatmul.f32.gmra.mxu3 %v5425_v47  ;;  %v8993_v47 = vunpack.i.l.bf16 %v5555_v20 }
 0x12f   :  { %v8821_v32 = vunpack.i.h.bf16 %v5726_v24  ;;  %v4069_v19 = vunpack.i.l.bf16 %v5726_v24  ;;  %928 = vmatpush.msra.mxu1 %v727_v5  ;;  %v529_v39 = vmul.f32 %v5654_v62, %v520_v2  ;;  %3821 = vmatmul.msk.f32.gmra.mxu2 %vm854_vm8, %v5712_v10 }
 0x130   :  { %1063 = vmatpush.msrb.mxu2 %v8970_v43  ;;  %v688_v15 = vsel %vm402_vm3, %v4064_v50, %v8815_v35  ;;  %v656_v5 = vsel %vm365_vm4, %v8993_v47, %v8820_v38  ;;  %4162 = vrot.lane.b32.xlu0 %v8970_v43, %s4870_s6 }
 0x131   :  { %929 = vmatpush.msra.mxu1 %v723_v6  ;;  %1279 = vmatpush.msra.mxu0 %v529_v39  ;;  %v696_v49 = vmul.f32 %v688_v15, %v5434_v13  ;;  %v687_v2 = vsel %vm402_vm3, %v4069_v19, %v8821_v32  ;;  %v664_v35 = vmul.f32 %v656_v5, %v5497_v8  ;;  %v5761_v6 = vperm.slane %v5632_v46, 6  ;;  %v5763_v39 = vld [vmem:[#allocation15 + $0xa0] sm:$0xff] }
 0x132   :  { %v692_v27 = vmul.f32 %v687_v2, %v5434_v13 }
 0x133   :  { %1064 = vmatpush.msrb.mxu2 %v696_v49  ;;  %930 = vmatpush.msra.mxu1 %v8970_v43  ;;  %8994 = vst [vmem:[#allocation79_spill] sm:$0xff] %v5761_v6 }
 0x134   :  { %4187 = vrot.lane.b32.xlu2 %v8970_v43, %s4870_s6  ;;  %4182 = vrot.lane.b32.xlu1 %v8970_v43, %s4862_s17 }
 0x135   :  { %v5755_v34 = vpop.permute.xlu2 %474  ;;  %v5757_v25 = vpop.permute.xlu0 %4077  ;;  %1065 = vmatpush.msrb.mxu2 %v692_v27  ;;  %931 = vmatpush.msra.mxu1 %v8970_v43 }
 0x136   :  { %v484_v15 = vsel %vm476_vm1, %v5755_v34, %v5089_v9  ;;  %v8822_v47 = vunpack.i.h.bf16 %v5757_v25  ;;  %v8823_v5 = vunpack.i.l.bf16 %v5757_v25  ;;  %v5771_v49 = vpop.permute.xlu1 %4082  ;;  %3825 = vmatmul.msk.f32.vlgmr.msrb.gmra.mxu0 %vm854_vm8, %v5476_v44  ;;  %1039 = vmatmul.f32.gmra.mxu3 %v5468_v1 }
 0x137   :  { %v8824_v27 = vunpack.i.h.bf16 %v5771_v49  ;;  %v4084_v2 = vunpack.i.l.bf16 %v5771_v49  ;;  %1066 = vmatpush.msrb.mxu2 %v664_v35  ;;  %v496_v38 = vmul.f32 %v5761_v6, %v484_v15 }
 0x138   :  { %v690_v9 = vsel %vm402_vm3, %v8823_v5, %v4064_v50  ;;  %v689_v32 = vsel %vm402_vm3, %v8822_v47, %v4069_v19  ;;  %3822 = vmatmul.msk.f32.gmra.mxu2 %vm854_vm8, %v5763_v39  ;;  %v5800_v47 = vld [vmem:[#allocation15 + $0xb8] sm:$0xff]  ;;  %4177 = vrot.lane.b32.xlu0 %v8970_v43, %s4874_s1 }
 0x139   :  { %1280 = vmatpush.msra.mxu0 %v496_v38  ;;  %v695_v1 = vmul.f32 %v690_v9, %v5209_v42  ;;  %v655_v44 = vsel %vm365_vm4, %v4084_v2, %v8824_v27  ;;  %v691_v50 = vmul.f32 %v689_v32, %v5209_v42  ;;  %v5834_v42 = vld [vmem:[#allocation15 + $0xd0] sm:$0xff] }
 0x13a   :  { %v660_v35 = vmul.f32 %v655_v44, %v5497_v8 }
 0x13b   :  { %932 = vmatpush.msra.mxu1 %v695_v1 }
 0x13c   :  { %1067 = vmatpush.msrb.mxu2 %v660_v35  ;;  %v8996_v35 = vunpack.i.l.bf16 %v5555_v20  ;;  %4212 = vrot.lane.b32.xlu2 %v8970_v43, %s4873_s25 }
 0x13d   :  { %v5796_v15 = vpop.permute.xlu2 %540  ;;  %v5798_v19 = vpop.permute.xlu0 %4092  ;;  %933 = vmatpush.msra.mxu1 %v691_v50  ;;  %4197 = vrot.lane.b32.xlu1 %v8970_v43, %s4872_s15 }
 0x13e   :  { %v8825_v38 = vunpack.i.h.bf16 %v5798_v19  ;;  %v4094_v9 = vunpack.i.l.bf16 %v5798_v19  ;;  %v5804_v5 = vpop.permute.xlu1 %4097  ;;  %3826 = vmatmul.msk.f32.gmra.mxu0 %vm854_vm8, %v5516_v57  ;;  %1042 = vmatmul.f32.gmra.mxu3 %v5504_v33 }
 0x13f   :  { %8995 = vst [vmem:[#allocation80_spill] sm:$0xff] %v5804_v5  ;;  %v8833_v32 = vunpack.i.h.bf16 %v5804_v5  ;;  %v8832_v1 = vunpack.i.l.bf16 %v5804_v5 }
 0x140   :  { %v624_v44 = vsel %vm8872_vm5, %v4094_v9, %v8825_v38  ;;  %3823 = vmatmul.msk.f32.gmra.mxu2 %vm854_vm8, %v5800_v47  ;;  %4192 = vrot.lane.b32.xlu0 %v8970_v43, %s4875_s26 }
 0x141   :  { %v658_v57 = vsel %vm365_vm4, %v8832_v1, %v8996_v35  ;;  %v632_v33 = vmul.f32 %v624_v44, %v5511_v51  ;;  %v657_v50 = vsel %vm365_vm4, %v8833_v32, %v4084_v2  ;;  %v9000_v32 = vunpack.i.l.bf16 %v5518_v22 }
 0x142   :  { %v663_v27 = vmul.f32 %v658_v57, %v5232_v48  ;;  %v659_v38 = vmul.f32 %v657_v50, %v5232_v48  ;;  %v8998_v50 = vunpack.i.h.bf16 %v5478_v0 }
 0x143   :  { %1068 = vmatpush.msrb.mxu2 %v632_v33  ;;  %v5846_v33 = vperm.slane %v5594_v54, 5 }
 0x144   :  { %934 = vmatpush.msra.mxu1 %v663_v27  ;;  %4217 = vrot.lane.b32.xlu2 %v8970_v43, %s4874_s1 }
 0x145   :  { %v5830_v8 = vpop.permute.xlu2 %437  ;;  %v5832_v13 = vpop.permute.xlu0 %4102  ;;  %8997 = vst [vmem:[#allocation81_spill] sm:$0xff] %v5846_v33  ;;  %4202 = vrot.lane.b32.xlu1 %v8970_v43, %s4877_s27 }
 0x146   :  { %v8834_v35 = vunpack.i.h.bf16 %v5832_v13  ;;  %v4104_v44 = vunpack.i.l.bf16 %v5832_v13  ;;  %v4108_v1 = vpop.permute.xlu1 %4107  ;;  %935 = vmatpush.msra.mxu1 %v659_v38  ;;  %3827 = vmatmul.msk.f32.gmra.mxu0 %vm854_vm8, %v5553_v17 }
 0x147   :  { %v4110_v2 = vunpack.i.h.bf16 %v4108_v1  ;;  %v4109_v57 = vunpack.i.l.bf16 %v4108_v1  ;;  %1045 = vmatmul.f32.gmra.mxu3 %v5544_v21  ;;  %v8999_v21 = vunpack.i.h.bf16 %v5670_v7 }
 0x148   :  { %v623_v27 = vsel %vm8872_vm5, %v4104_v44, %v8834_v35  ;;  %3824 = vmatmul.msk.f32.gmra.mxu2 %vm854_vm8, %v5834_v42  ;;  %4227 = vrot.lane.b32.xlu0 %v8970_v43, %s4875_s26 }
 0x149   :  { %v628_v38 = vmul.f32 %v623_v27, %v5511_v51  ;;  %v716_v17 = vsel %vm439_vm2, %v8998_v50, %v4109_v57  ;;  %v715_v1 = vsel %vm439_vm2, %v8999_v21, %v4110_v2  ;;  %v5863_v35 = vsel %vm439_vm2, %v4109_v57, %v9000_v32 }
 0x14a   :  { %v729_v48 = vmul.f32 %v716_v17, %v5846_v33  ;;  %v9001_v27 = vunpack.i.h.bf16 %v5518_v22  ;;  %v725_v7 = vmul.f32 %v715_v1, %v5846_v33  ;;  %v5876_v51 = vperm.slane %v5594_v54, 3 }
 0x14b   :  { %1069 = vmatpush.msrb.mxu2 %v628_v38 }
 0x14c   :  { %v5870_v0 = vsel %vm439_vm2, %v4110_v2, %v9001_v27  ;;  %1192 = vmatpush.msrb.mxu3 %v729_v48  ;;  %9002 = vst [vmem:[#allocation82_spill] sm:$0xff] %v5876_v51  ;;  %v9003_v27 = vunpack.i.h.bf16 %v5716_v55  ;;  %v9005_v48 = vunpack.i.l.bf16 %v5757_v25  ;;  %4222 = vrot.lane.b32.xlu2 %v8970_v43, %s4862_s17 }
 0x14d   :  { %v4133_v50 = vpop.permute.xlu2 %4132  ;;  %v5873_v21 = vpop.permute.xlu0 %4112  ;;  %4207 = vrot.lane.b32.xlu1 %v8970_v43, %s4871_s7 }
 0x14e   :  { %v4135_v32 = vunpack.i.h.bf16 %v4133_v50  ;;  %v4134_v57 = vunpack.i.l.bf16 %v4133_v50  ;;  %v8839_v17 = vunpack.i.h.bf16 %v5873_v21  ;;  %v4114_v38 = vunpack.i.l.bf16 %v5873_v21  ;;  %v5880_v22 = vpop.permute.xlu1 %4117  ;;  %1193 = vmatpush.msrb.mxu3 %v725_v7  ;;  %3828 = vmatmul.msk.f32.gmra.mxu0 %vm854_vm8, %v5613_v36 }
 0x14f   :  { %v8844_v2 = vunpack.i.l.bf16 %v5880_v22  ;;  %1048 = vmatmul.f32.gmra.mxu3 %v5596_v4  ;;  %v9004_v36 = vunpack.i.h.bf16 %v5726_v24  ;;  %v9006_v24 = vunpack.i.h.bf16 %v5880_v22 }
 0x150   :  { %1194 = vmatpush.msrb.mxu3 %v8970_v43  ;;  %v592_v1 = vsel %vm8871_vm7, %v4114_v38, %v8839_v17  ;;  %v686_v7 = vsel %vm402_vm3, %v9003_v27, %v4134_v57  ;;  %v5904_v4 = vsel %vm402_vm3, %v4134_v57, %v9005_v48  ;;  %v9007_v57 = vunpack.i.h.bf16 %v5757_v25 }
 0x151   :  { %v685_v50 = vsel %vm402_vm3, %v9004_v36, %v4135_v32  ;;  %v626_v17 = vsel %vm8872_vm5, %v8844_v2, %v4094_v9  ;;  %v600_v55 = vmul.f32 %v592_v1, %v5537_v58  ;;  %v697_v27 = vmul.f32 %v686_v7, %v5876_v51  ;;  %v6011_v2 = vld [vmem:[#allocation15 + $0x20] sm:$0xff] }
 0x152   :  { %v625_v36 = vsel %vm8872_vm5, %v9006_v24, %v4104_v44  ;;  %1195 = vmatpush.msrb.mxu3 %v8970_v43  ;;  %v631_v5 = vmul.f32 %v626_v17, %v5273_v61  ;;  %v5922_v48 = vsel %vm402_vm3, %v4135_v32, %v9007_v57  ;;  %v693_v1 = vmul.f32 %v685_v50, %v5876_v51 }
 0x153   :  { %1070 = vmatpush.msrb.mxu2 %v600_v55  ;;  %v627_v9 = vmul.f32 %v625_v36, %v5273_v61  ;;  %v5933_v25 = vperm.slane %v5632_v46, 5 }
 0x154   :  { %936 = vmatpush.msra.mxu1 %v631_v5  ;;  %1196 = vmatpush.msrb.mxu3 %v697_v27  ;;  %v447_v5 = vsel %vm439_vm2, %v5830_v8, %v5105_v11 }
 0x155   :  { %v5926_v7 = vpop.permute.xlu0 %4122  ;;  %9008 = vst [vmem:[#allocation83_spill] sm:$0xff] %v5933_v25  ;;  %v459_v11 = vmul.f32 %v5933_v25, %v447_v5  ;;  %2174 = vrot.lane.b32.xlu2 %v8970_v43, %s4877_s27 }
 0x156   :  { %v8845_v44 = vunpack.i.h.bf16 %v5926_v7  ;;  %v4124_v24 = vunpack.i.l.bf16 %v5926_v7  ;;  %v5930_v17 = vpop.permute.xlu1 %472  ;;  %937 = vmatpush.msra.mxu1 %v627_v9  ;;  %1197 = vmatpush.msrb.mxu3 %v693_v1  ;;  %v5967_v1 = vpop.permute.xlu2 %534 }
 0x157   :  { %v483_v32 = vsel %vm476_vm1, %v5930_v17, %v5166_v30  ;;  %3829 = vmatmul.msk.f32.gmra.mxu0 %vm854_vm8, %v5660_v52  ;;  %1051 = vmatmul.f32.gmra.mxu3 %v5647_v29 }
 0x158   :  { %v492_v50 = vmul.f32 %v5761_v6, %v483_v32  ;;  %v591_v55 = vsel %vm8871_vm7, %v4124_v24, %v8845_v44 }
 0x159   :  { %v596_v27 = vmul.f32 %v591_v55, %v5537_v58 }
 0x15a   :  { %1281 = vmatpush.msra.mxu0 %v492_v50 }
 0x15b   :  { %1071 = vmatpush.msrb.mxu2 %v596_v27 }
 0x15c   :  { %1282 = vmatpush.msra.mxu0 %v459_v11 }
 0x15d   :  { %v5953_v30 = vpop.permute.xlu0 %544 }
 0x15e   :  { %v5955_v36 = vpop.permute.xlu1 %4127  ;;  %v554_v29 = vsel %vm8870_vm6, %v5796_v15, %v5953_v30 }
 0x15f   :  { %v8842_v52 = vunpack.i.h.bf16 %v5955_v36  ;;  %v8843_v57 = vunpack.i.l.bf16 %v5955_v36  ;;  %v568_v9 = vmul.f32 %v5559_v3, %v554_v29  ;;  %3830 = vmatmul.msk.f32.gmra.mxu0 %vm854_vm8, %v5712_v10  ;;  %1054 = vmatmul.f32.gmra.mxu3 %v5699_v23 }
 0x161   :  { %1072 = vmatpush.msrb.mxu2 %v568_v9  ;;  %v594_v5 = vsel %vm8871_vm7, %v8843_v57, %v4114_v38  ;;  %v593_v32 = vsel %vm8871_vm7, %v8842_v52, %v4124_v24  ;;  %v5987_v9 = vld [vmem:[#allocation15 + $0x8] sm:$0xff] }
 0x162   :  { %v599_v50 = vmul.f32 %v594_v5, %v5314_v40  ;;  %v595_v55 = vmul.f32 %v593_v32, %v5314_v40  ;;  %v5991_v5 = vpop.permute.xlu2 %4142  ;;  %v9009_v32 = vmov 1.0   ;;  %v6251_v40 = vld [vmem:[#allocation15] sm:$0xff] }
 0x164   :  { %938 = vmatpush.msra.mxu1 %v599_v50 }
 0x165   :  { %v539_v27 = vpop.permute.xlu0 %538 }
 0x166   :  { %v5979_v11 = vpop.permute.xlu1 %542  ;;  %939 = vmatpush.msra.mxu1 %v595_v55 }
 0x167   :  { %v553_v29 = vsel %vm8870_vm6, %v539_v27, %v5979_v11  ;;  %3831 = vmatmul.msk.f32.gmra.mxu0 %vm854_vm8, %v5763_v39  ;;  %v5989_v24 = vpop.f32.mrf.mxu0 }
 0x168   :  { %v564_v38 = vmul.f32 %v5559_v3, %v553_v29 }
 0x16a   :  { %1073 = vmatpush.msrb.mxu2 %v564_v38  ;;  %v555_v38 = vsel %vm8870_vm6, %v5967_v1, %v539_v27 }
 0x16b   :  { %1074 = vmatmul.f32.vlgmr.msrb.gmra.mxu2 %v5987_v9  ;;  %v563_v27 = vmul.f32 %v5290_v26, %v555_v38 }
 0x16c   :  { %1245 = vmatpush.msra.mxu2 %v9009_v32 }
 0x16d   :  { %v436_v50 = vpop.permute.xlu0 %435 }
 0x16e   :  { %v446_v55 = vsel %vm439_vm2, %v436_v50, %v5189_v37  ;;  %v5998_v52 = vpop.permute.xlu1 %536  ;;  %v6014_v37 = vperm.slane %v5594_v54, 7 }
 0x16f   :  { %v556_v3 = vsel %vm8870_vm6, %v5998_v52, %v5796_v15  ;;  %v455_v29 = vmul.f32 %v5933_v25, %v446_v55  ;;  %3832 = vmatmul.msk.f32.gmra.mxu0 %vm854_vm8, %v5800_v47  ;;  %v6016_v44 = vpop.f32.mrf.mxu0  ;;  %v515_v15 = vsel %vm8869_vm0, %v5339_v59, %v5662_v63  ;;  %v514_v55 = vsel %vm8869_vm0, %v5256_v56, %v5714_v28  ;;  %v6033_v63 = vpop.permute.xlu2 %4147  ;;  %v4431_v28 = vld [vmem:[#allocation9 + $0x18] sm:$0xff] }
 0x170   :  { %v567_v57 = vmul.f32 %v5290_v26, %v556_v3  ;;  %9010 = vst [vmem:[#allocation84_spill] sm:$0xff] %v6014_v37  ;;  %v4430_v3 = vld [vmem:[#allocation9 + $0x38] sm:$0xff]  ;;  %v478_v59 = vsel %vm476_vm1, %v5373_v53, %v5755_v34  ;;  %v528_v56 = vmul.f32 %v6014_v37, %v514_v55 }
 0x171   :  { %1283 = vmatpush.msra.mxu0 %v455_v29  ;;  %v532_v29 = vmul.f32 %v6014_v37, %v515_v15  ;;  %v6060_v15 = vld [vmem:[#allocation15 + $0x38] sm:$0xff] }
 0x172   :  { %940 = vmatpush.msra.mxu1 %v567_v57  ;;  %v6040_v57 = vperm.slane %v5594_v54, 2 }
 0x173   :  { %1077 = vmatmul.f32.gmra.mxu2 %v6011_v2  ;;  %1284 = vmatpush.msra.mxu0 %v4430_v3  ;;  %v495_v3 = vmul.f32 %v5619_v14, %v478_v59 }
 0x174   :  { %941 = vmatpush.msra.mxu1 %v563_v27  ;;  %9011 = vst [vmem:[#allocation85_spill] sm:$0xff] %v6040_v57  ;;  %v6046_v27 = vperm.slane %v5632_v46, 3 }
 0x175   :  { %942 = vmatmul.f32.vlgmr.msra.gmra.mxu1 %v5987_v9  ;;  %v6036_v26 = vpop.permute.xlu0 %4137  ;;  %1285 = vmatpush.msra.mxu0 %v4431_v28  ;;  %v477_v28 = vsel %vm476_vm1, %v5376_v60, %v5930_v17  ;;  %v9015_v60 = vunpack.i.h.bf16 %v5771_v49  ;;  %v9017_v49 = vunpack.i.l.bf16 %v5991_v5 }
 0x176   :  { %1146 = vmatpush.msrb.mxu1 %v532_v29  ;;  %v8850_v34 = vunpack.i.l.bf16 %v6036_v26  ;;  %v397_v53 = vpop.permute.xlu1 %396  ;;  %9012 = vst [vmem:[#allocation86_spill] sm:$0xff] %v6046_v27  ;;  %v9014_v58 = vunpack.i.h.bf16 %v6036_v26  ;;  %v6080_v29 = vperm.slane %v5594_v54, 1 }
 0x177   :  { %v404_v55 = vsel %vm402_vm3, %v397_v53, %v5216_v45  ;;  %3833 = vmatmul.msk.f32.gmra.mxu0 %vm854_vm8, %v5834_v42  ;;  %v9013_v45 = vunpack.i.h.bf16 %v5555_v20  ;;  %v8848_v20 = vunpack.i.l.bf16 %v6033_v63 }
 0x178   :  { %1147 = vmatpush.msrb.mxu1 %v528_v56  ;;  %v422_v38 = vmul.f32 %v6046_v27, %v404_v55  ;;  %v653_v17 = vsel %vm365_vm4, %v9015_v60, %v9014_v58  ;;  %v441_v55 = vsel %vm439_vm2, %v5399_v31, %v5830_v8  ;;  %9016 = vst [vmem:[#allocation87_spill] sm:$0xff] %v6080_v29  ;;  %v9018_v58 = vunpack.i.h.bf16 %v5798_v19  ;;  %v6090_v60 = vpop.f32.mrf.mxu0 }
 0x179   :  { %v654_v59 = vsel %vm365_vm4, %v9013_v45, %v8850_v34  ;;  %v491_v45 = vmul.f32 %v5619_v14, %v477_v28  ;;  %v661_v31 = vmul.f32 %v653_v17, %v6040_v57  ;;  %v440_v8 = vsel %vm439_vm2, %v5316_v41, %v436_v50  ;;  %v9022_v50 = vld [vmem:[#allocation49_spill] sm:$0xff] }
 0x17a   :  { %v665_v56 = vmul.f32 %v654_v59, %v6040_v57  ;;  %1148 = vmatpush.msrb.mxu1 %v495_v3  ;;  %1286 = vmatpush.msra.mxu0 %v422_v38  ;;  %v622_v59 = vsel %vm8872_vm5, %v9018_v58, %v9017_v49  ;;  %v8849_v38 = vunpack.i.h.bf16 %v6033_v63  ;;  %v458_v3 = vmul.f32 %v5846_v33, %v441_v55 }
 0x17b   :  { %1080 = vmatmul.f32.gmra.mxu2 %v6060_v15  ;;  %v9019_v19 = vunpack.i.h.bf16 %v5991_v5  ;;  %v9020_v28 = vunpack.i.h.bf16 %v5832_v13  ;;  %v633_v17 = vmul.f32 %v622_v59, %v6080_v29  ;;  %v6108_v41 = vperm.slane %v5594_v54, 0  ;;  %v9024_v59 = vld [vmem:[#allocation44_spill] sm:$0xff] }
 0x17c   :  { %1198 = vmatpush.msrb.mxu3 %v665_v56  ;;  %1149 = vmatpush.msrb.mxu1 %v491_v45  ;;  %v454_v13 = vmul.f32 %v5846_v33, %v440_v8  ;;  %v9023_v58 = vunpack.i.h.bf16 %v5873_v21  ;;  %v6127_v8 = vld [vmem:[#allocation15 + $0x50] sm:$0xff]  ;;  %v9026_v21 = vunpack.i.h.bf16 %v5926_v7  ;;  %v6237_v33 = vld [vmem:[#allocation12 + $0x38] ss:$0 sm:$0xff] }
 0x17d   :  { %v621_v49 = vsel %vm8872_vm5, %v9020_v28, %v9019_v19  ;;  %945 = vmatmul.f32.gmra.mxu1 %v6011_v2  ;;  %v395_v56 = vpop.permute.xlu0 %394  ;;  %9021 = vst [vmem:[#allocation88_spill] sm:$0xff] %v6108_v41  ;;  %v6120_v19 = vpop.permute.xlu2 %548 }
 0x17e   :  { %1199 = vmatpush.msrb.mxu3 %v661_v31  ;;  %1150 = vmatpush.msrb.mxu1 %v458_v3  ;;  %v403_v55 = vsel %vm402_vm3, %v395_v56, %v9022_v50  ;;  %v360_v45 = vpop.permute.xlu1 %359  ;;  %v590_v31 = vsel %vm8871_vm7, %v9023_v58, %v8848_v20  ;;  %v629_v3 = vmul.f32 %v621_v49, %v6080_v29  ;;  %v6130_v50 = vperm.slane %v5632_v46, 2  ;;  %v9027_v49 = vld [vmem:[#allocation56_spill] sm:$0xff] }
 0x17f   :  { %v367_v54 = vsel %vm365_vm4, %v360_v45, %v9024_v59  ;;  %v418_v28 = vmul.f32 %v6046_v27, %v403_v55  ;;  %v589_v58 = vsel %vm8871_vm7, %v9026_v21, %v8849_v38  ;;  %v406_v55 = vsel %vm402_vm3, %v9027_v49, %v397_v53  ;;  %v4432_v59 = vld [vmem:[#allocation9 + $0x30] sm:$0xff] }
 0x180   :  { %1200 = vmatpush.msrb.mxu3 %v633_v17  ;;  %1151 = vmatpush.msrb.mxu1 %v454_v13  ;;  %9025 = vst [vmem:[#allocation49_spill] sm:$0xff] %v6130_v50  ;;  %v601_v17 = vmul.f32 %v590_v31, %v6108_v41  ;;  %v6142_v13 = vld [vmem:[#allocation12 + $0x30] ss:$0 sm:$0xff]  ;;  %v385_v20 = vmul.f32 %v6130_v50, %v367_v54  ;;  %v6149_v21 = vpop.f32.mrf.mxu0 }
 0x181   :  { %1287 = vmatpush.msra.mxu0 %v418_v28  ;;  %v552_v7 = vsel %vm8870_vm6, %v5953_v30, %v6120_v19  ;;  %v597_v31 = vmul.f32 %v589_v58, %v6108_v41  ;;  %v4433_v28 = vld [vmem:[#allocation9 + $0x10] sm:$0xff]  ;;  %v421_v54 = vmul.f32 %v5876_v51, %v406_v55  ;;  %v9030_v58 = vld [vmem:[#allocation50_spill] sm:$0xff] }
 0x182   :  { %1201 = vmatpush.msrb.mxu3 %v629_v3  ;;  %1152 = vmatpush.msrb.mxu1 %v4432_v59  ;;  %v9028_v3 = vld [vmem:[#allocation68_spill] sm:$0xff]  ;;  %v569_v30 = vmul.f32 %v6142_v13, %v552_v7  ;;  %v9029_v59 = vld [vmem:[#allocation69_spill] sm:$0xff] }
 0x183   :  { %1083 = vmatmul.f32.gmra.mxu2 %v6127_v8  ;;  %v405_v53 = vsel %vm402_vm3, %v9028_v3, %v395_v56  ;;  %1288 = vmatpush.msra.mxu0 %v385_v20  ;;  %v9032_v38 = vld [vmem:[#allocation53_spill] sm:$0xff] }
 0x184   :  { %1202 = vmatpush.msrb.mxu3 %v601_v17  ;;  %1153 = vmatpush.msrb.mxu1 %v4433_v28  ;;  %v369_v17 = vsel %vm365_vm4, %v9029_v59, %v360_v45  ;;  %v417_v20 = vmul.f32 %v5876_v51, %v405_v53  ;;  %v9031_v28 = vld [vmem:[#allocation60_spill] sm:$0xff]  ;;  %v6174_v45 = vperm.slane %v5632_v46, 1  ;;  %v6177_v59 = vld [vmem:[#allocation15 + $0x68] sm:$0xff]  ;;  %v762_v51 = vmul.f32 %v5681_v12, %v5761_v6 }
 0x185   :  { %948 = vmatmul.f32.gmra.mxu1 %v6060_v15  ;;  %v358_v49 = vpop.permute.xlu0 %357 }
 0x186   :  { %1203 = vmatpush.msrb.mxu3 %v597_v31  ;;  %1154 = vmatpush.msrb.mxu1 %v421_v54  ;;  %v366_v56 = vsel %vm365_vm4, %v358_v49, %v9030_v58  ;;  %v323_v3 = vpop.permute.xlu1 %322  ;;  %v368_v55 = vsel %vm365_vm4, %v9031_v28, %v358_v49  ;;  %9033 = vst [vmem:[#allocation44_spill] sm:$0xff] %v6174_v45  ;;  %v9034_v58 = vld [vmem:[#allocation72_spill] sm:$0xff]  ;;  %v9035_v28 = vld [vmem:[#allocation47_spill] sm:$0xff] }
 0x187   :  { %v330_v7 = vsel %vm8872_vm5, %v323_v3, %v9032_v38  ;;  %v381_v31 = vmul.f32 %v6130_v50, %v366_v56  ;;  %v384_v54 = vmul.f32 %v6040_v57, %v369_v17  ;;  %v380_v53 = vmul.f32 %v6040_v57, %v368_v55  ;;  %v6233_v57 = vld [vmem:[#allocation15 + $0x98] sm:$0xff] }
 0x188   :  { %1204 = vmatpush.msrb.mxu3 %v569_v30  ;;  %1155 = vmatpush.msrb.mxu1 %v417_v20  ;;  %v348_v49 = vmul.f32 %v6174_v45, %v330_v7  ;;  %v332_v38 = vsel %vm8872_vm5, %v9034_v58, %v323_v3  ;;  %v284_v30 = vpop.permute.xlu2 %283  ;;  %v6185_v56 = vpop.f32.mrf.mxu0  ;;  %v9036_v3 = vld [vmem:[#allocation73_spill] sm:$0xff] }
 0x189   :  { %1289 = vmatpush.msra.mxu0 %v381_v31  ;;  %v347_v17 = vmul.f32 %v6080_v29, %v332_v38 }
 0x18a   :  { %1156 = vmatpush.msrb.mxu1 %v384_v54  ;;  %v9037_v54 = vld [vmem:[#allocation61_spill] sm:$0xff] }
 0x18b   :  { %1086 = vmatmul.f32.gmra.mxu2 %v6177_v59  ;;  %1290 = vmatpush.msra.mxu0 %v348_v49  ;;  %v9038_v49 = vld [vmem:[#allocation55_spill] sm:$0xff] }
 0x18c   :  { %1157 = vmatpush.msrb.mxu1 %v380_v53  ;;  %v295_v53 = vsel %vm8871_vm7, %v9037_v54, %v284_v30  ;;  %v293_v58 = vsel %vm8871_vm7, %v284_v30, %v9038_v49 }
 0x18d   :  { %951 = vmatmul.f32.gmra.mxu1 %v6127_v8  ;;  %v321_v20 = vpop.permute.xlu0 %320  ;;  %v310_v30 = vmul.f32 %v6108_v41, %v295_v53  ;;  %v9040_v53 = vld [vmem:[#allocation57_spill] sm:$0xff] }
 0x18e   :  { %1158 = vmatpush.msrb.mxu1 %v347_v17  ;;  %v329_v55 = vsel %vm8872_vm5, %v321_v20, %v9035_v28  ;;  %v6192_v7 = vpop.permute.xlu1 %546  ;;  %v331_v31 = vsel %vm8872_vm5, %v9036_v3, %v321_v20  ;;  %v6210_v20 = vld [vmem:[#allocation15 + $0x80] sm:$0xff]  ;;  %v6213_v3 = vperm.slane %v5632_v46, 0 }
 0x18f   :  { %v343_v38 = vmul.f32 %v6080_v29, %v331_v31  ;;  %v551_v17 = vsel %vm8870_vm6, %v5979_v11, %v6192_v7  ;;  %v344_v28 = vmul.f32 %v6174_v45, %v329_v55  ;;  %v6219_v55 = vpop.f32.mrf.mxu2 }
 0x190   :  { %v565_v34 = vmul.f32 %v6142_v13, %v551_v17  ;;  %9039 = vst [vmem:[#allocation56_spill] sm:$0xff] %v6213_v3  ;;  %v311_v31 = vmul.f32 %v6213_v3, %v293_v58  ;;  %v4158_v11 = vpop.permute.xlu2 %4157  ;;  %v6223_v54 = vpop.f32.mrf.mxu0  ;;  %v9041_v58 = vld [vmem:[#allocation76_spill] sm:$0xff] }
 0x191   :  { %1159 = vmatpush.msrb.mxu1 %v343_v38  ;;  %1291 = vmatpush.msra.mxu0 %v344_v28  ;;  %v4159_v29 = vunpack.i.l.bf16 %v4158_v11  ;;  %v4160_v12 = vunpack.i.h.bf16 %v4158_v11 }
 0x192   :  { %1205 = vmatpush.msrb.mxu3 %v565_v34 }
 0x193   :  { %1089 = vmatmul.f32.gmra.mxu2 %v6210_v20  ;;  %1160 = vmatpush.msrb.mxu1 %v310_v30 }
 0x194   :  { %1292 = vmatpush.msra.mxu0 %v311_v31  ;;  %1206 = vmatmul.f32.vlgmr.msrb.gmra.mxu3 %v5987_v9 }
 0x195   :  { %954 = vmatmul.f32.gmra.mxu1 %v6177_v59  ;;  %v282_v46 = vpop.permute.xlu0 %281  ;;  %1377 = vmatpush.msra.mxu3 %v9009_v32 }
 0x196   :  { %v292_v34 = vsel %vm8871_vm7, %v282_v46, %v9040_v53  ;;  %v4153_v49 = vpop.permute.xlu1 %4152  ;;  %v294_v38 = vsel %vm8871_vm7, %v9041_v58, %v282_v46  ;;  %v9042_v53 = vld [vmem:[#allocation75_spill] sm:$0xff] }
 0x197   :  { %v4155_v17 = vunpack.i.h.bf16 %v4153_v49  ;;  %v4154_v28 = vunpack.i.l.bf16 %v4153_v49  ;;  %v306_v30 = vmul.f32 %v6108_v41, %v294_v38  ;;  %v307_v31 = vmul.f32 %v6213_v3, %v292_v34  ;;  %v9044_v49 = vld [vmem:[#allocation52_spill] sm:$0xff] }
 0x198   :  { %v9043_v14 = vunpack.i.l.bf16 %v9042_v53  ;;  %v9045_v58 = vunpack.i.l.bf16 %v9044_v49  ;;  %v9046_v38 = vunpack.i.h.bf16 %v9042_v53 }
 0x199   :  { %1161 = vmatpush.msrb.mxu1 %v306_v30  ;;  %1293 = vmatpush.msra.mxu0 %v307_v31  ;;  %v9047_v31 = vld [vmem:[#allocation63_spill] sm:$0xff] }
 0x19a   :  { %v812_v46 = vsel %vm8870_vm6, %v9043_v14, %v4154_v28  ;;  %v818_v34 = vsel %vm8870_vm6, %v4154_v28, %v9045_v58  ;;  %v811_v41 = vsel %vm8870_vm6, %v9046_v38, %v4155_v17  ;;  %1294 = vmatmul.f32.vlgmr.msra.gmra.mxu0 %v6251_v40  ;;  %v758_v28 = vmul.f32 %v5704_v18, %v5761_v6  ;;  %v9049_v58 = vld [vmem:[#allocation65_spill] sm:$0xff] }
 0x19b   :  { %3936 = vmatpush.msra.mxu1 %v762_v51  ;;  %v825_v30 = vmul.f32 %v6142_v13, %v812_v46  ;;  %v826_v14 = vmul.f32 %v6237_v33, %v818_v34  ;;  %1092 = vmatmul.f32.gmra.mxu2 %v6233_v57  ;;  %v9048_v53 = vunpack.i.l.bf16 %v9047_v31  ;;  %v821_v49 = vmul.f32 %v6142_v13, %v811_v41  ;;  %v9051_v34 = vld [vmem:[#allocation66_spill] sm:$0xff] }
 0x19c   :  { %1322 = vmatpush.msrb.mxu0 %v762_v51  ;;  %v9050_v38 = vunpack.i.l.bf16 %v9049_v58  ;;  %v9052_v61 = vunpack.i.l.bf16 %v9051_v34  ;;  %v9053_v41 = vunpack.i.h.bf16 %v9049_v58  ;;  %1209 = vmatmul.f32.gmra.mxu3 %v6011_v2  ;;  %v6298_v58 = vld [vmem:[#allocation15 + $0x18] sm:$0xff]  ;;  %v9058_v34 = vunpack.i.l.bf16 %v6036_v26 }
 0x19d   :  { %v817_v11 = vsel %vm8870_vm6, %v4155_v17, %v9048_v53  ;;  %1246 = vmatpush.msra.mxu2 %v825_v30  ;;  %1378 = vmatpush.msra.mxu3 %v826_v14  ;;  %v730_v17 = vmul.f32 %v5863_v35, %v5933_v25  ;;  %v9054_v30 = vld [vmem:[#allocation67_spill] sm:$0xff]  ;;  %v726_v53 = vmul.f32 %v5870_v0, %v5933_v25 }
 0x19e   :  { %v780_v46 = vsel %vm8869_vm0, %v9050_v38, %v4159_v29  ;;  %v786_v51 = vsel %vm8869_vm0, %v4159_v29, %v9052_v61  ;;  %957 = vmatmul.f32.gmra.mxu1 %v6210_v20  ;;  %1323 = vmatpush.msrb.mxu0 %v758_v28  ;;  %v822_v18 = vmul.f32 %v6237_v33, %v817_v11  ;;  %v9055_v14 = vunpack.i.l.bf16 %v9054_v30  ;;  %v6284_v29 = vpop.f32.mrf.mxu2  ;;  %v9056_v38 = vld [vmem:[#allocation80_spill] sm:$0xff] }
 0x19f   :  { %3937 = vmatpush.msra.mxu1 %v758_v28  ;;  %1247 = vmatpush.msra.mxu2 %v821_v49  ;;  %v779_v13 = vsel %vm8869_vm0, %v9053_v41, %v4160_v12  ;;  %v793_v31 = vmul.f32 %v780_v46, %v6014_v37  ;;  %v794_v35 = vmul.f32 %v786_v51, %v5654_v62  ;;  %v6288_v28 = vpop.f32.mrf.mxu0  ;;  %v6295_v49 = vld [vmem:[#allocation15 + $0xb0] sm:$0xff]  ;;  %v9057_v46 = vunpack.i.l.bf16 %v9056_v38  ;;  %v6321_v41 = vld [vmem:[#allocation15 + $0xc8] sm:$0xff] }
 0x1a0   :  { %v785_v61 = vsel %vm8869_vm0, %v4160_v12, %v9055_v14  ;;  %1379 = vmatpush.msra.mxu3 %v822_v18  ;;  %1324 = vmatpush.msrb.mxu0 %v730_v17  ;;  %v789_v12 = vmul.f32 %v779_v13, %v6014_v37  ;;  %v698_v0 = vmul.f32 %v5904_v4, %v6046_v27  ;;  %v9059_v4 = vunpack.i.h.bf16 %v9056_v38 }
 0x1a1   :  { %3938 = vmatpush.msra.mxu1 %v730_v17  ;;  %1248 = vmatpush.msra.mxu2 %v793_v31  ;;  %v790_v11 = vmul.f32 %v785_v61, %v5654_v62  ;;  %v652_v51 = vsel %vm365_vm4, %v9058_v34, %v9057_v46  ;;  %v694_v17 = vmul.f32 %v5922_v48, %v6046_v27  ;;  %v9060_v30 = vunpack.i.h.bf16 %v6036_v26  ;;  %v6334_v48 = vld [vmem:[#allocation15 + $0x30] sm:$0xff] }
 0x1a2   :  { %1380 = vmatpush.msra.mxu3 %v794_v35  ;;  %1325 = vmatpush.msrb.mxu0 %v726_v53  ;;  %v666_v61 = vmul.f32 %v652_v51, %v6130_v50  ;;  %v9061_v31 = vunpack.i.l.bf16 %v5880_v22  ;;  %v9062_v35 = vunpack.i.l.bf16 %v5991_v5  ;;  %v9065_v46 = vunpack.i.l.bf16 %v5955_v36 }
 0x1a3   :  { %3939 = vmatpush.msra.mxu1 %v726_v53  ;;  %1249 = vmatpush.msra.mxu2 %v789_v12  ;;  %v651_v14 = vsel %vm365_vm4, %v9060_v30, %v9059_v4  ;;  %v9063_v12 = vunpack.i.h.bf16 %v5880_v22  ;;  %v9066_v34 = vunpack.i.l.bf16 %v6033_v63  ;;  %v9067_v51 = vunpack.i.h.bf16 %v5955_v36 }
 0x1a4   :  { %1381 = vmatpush.msra.mxu3 %v790_v11  ;;  %1095 = vmatmul.f32.gmra.mxu2 %v6295_v49  ;;  %v620_v26 = vsel %vm8872_vm5, %v9062_v35, %v9061_v31  ;;  %v662_v53 = vmul.f32 %v651_v14, %v6130_v50  ;;  %v9064_v11 = vunpack.i.h.bf16 %v5991_v5  ;;  %v558_v36 = vsel %vm8870_vm6, %v6120_v19, %v5998_v52  ;;  %v6379_v31 = vld [vmem:[#allocation15 + $0x10] sm:$0xff] }
 0x1a5   :  { %1297 = vmatmul.f32.gmra.mxu0 %v6298_v58  ;;  %3940 = vmatpush.msra.mxu1 %v8970_v43  ;;  %v634_v38 = vmul.f32 %v620_v26, %v6174_v45  ;;  %v588_v22 = vsel %vm8871_vm7, %v9066_v34, %v9065_v46  ;;  %v557_v26 = vsel %vm8870_vm6, %v6192_v7, %v5967_v1  ;;  %v4439_v1 = vld [vmem:[#allocation15 + $0x60] sm:$0xff]  ;;  %v4440_v7 = vld [vmem:[#allocation15 + $0x28] sm:$0xff]  ;;  %v4443_v34 = vld [vmem:[#allocation15 + $0x90] sm:$0xff] }
 0x1a6   :  { %1326 = vmatpush.msrb.mxu0 %v8970_v43  ;;  %960 = vmatmul.f32.gmra.mxu1 %v6233_v57  ;;  %v6317_v18 = vpop.f32.mrf.mxu2  ;;  %v602_v14 = vmul.f32 %v588_v22, %v6213_v3  ;;  %v570_v52 = vmul.f32 %v6237_v33, %v558_v36  ;;  %v566_v19 = vmul.f32 %v6237_v33, %v557_v26  ;;  %v1031_v33 = vpop.f32.mrf.mxu3  ;;  %v4444_v22 = vld [vmem:[#allocation15 + $0x58] sm:$0xff] }
 0x1a7   :  { %3941 = vmatpush.msra.mxu1 %v8970_v43  ;;  %1212 = vmatmul.f32.gmra.mxu3 %v6060_v15  ;;  %v6323_v13 = vpop.f32.mrf.mxu0 }
 0x1a8   :  { %1327 = vmatpush.msrb.mxu0 %v8970_v43  ;;  %2311 = vmatpush.msrb.mxu3 %v9009_v32 }
 0x1a9   :  { %3942 = vmatpush.msra.mxu1 %v698_v0 }
 0x1aa   :  { %1328 = vmatpush.msrb.mxu0 %v698_v0  ;;  %v619_v0 = vsel %vm8872_vm5, %v9064_v11, %v9063_v12  ;;  %v4441_v11 = vld [vmem:[#allocation15 + $0x78] sm:$0xff] }
 0x1ab   :  { %3943 = vmatpush.msra.mxu1 %v694_v17  ;;  %v630_v5 = vmul.f32 %v619_v0, %v6174_v45  ;;  %v4442_v0 = vld [vmem:[#allocation15 + $0x40] sm:$0xff] }
 0x1ac   :  { %1329 = vmatpush.msrb.mxu0 %v694_v17  ;;  %1098 = vmatmul.f32.gmra.mxu2 %v6321_v41  ;;  %v9068_v17 = vunpack.i.h.bf16 %v6033_v63  ;;  %v4437_v63 = vld [vmem:[#allocation15 + $0x48] sm:$0xff] }
 0x1ad   :  { %1300 = vmatmul.f32.gmra.mxu0 %v6334_v48  ;;  %3944 = vmatpush.msra.mxu1 %v666_v61 }
 0x1ae   :  { %1330 = vmatpush.msrb.mxu0 %v666_v61  ;;  %963 = vmatmul.f32.gmra.mxu1 %v6295_v49  ;;  %v587_v4 = vsel %vm8871_vm7, %v9068_v17, %v9067_v51  ;;  %v6368_v30 = vpop.f32.mrf.mxu2  ;;  %v1034_v46 = vpop.f32.mrf.mxu3  ;;  %v4445_v17 = vld [vmem:[#allocation15 + $0xa8] sm:$0xff] }
 0x1af   :  { %3945 = vmatpush.msra.mxu1 %v662_v53  ;;  %1215 = vmatmul.f32.gmra.mxu3 %v6127_v8  ;;  %v6373_v61 = vpop.f32.mrf.mxu0  ;;  %v598_v35 = vmul.f32 %v587_v4, %v6213_v3  ;;  %v4446_v4 = vld [vmem:[#allocation15 + $0x70] sm:$0xff] }
 0x1b0   :  { %1331 = vmatpush.msrb.mxu0 %v662_v53 }
 0x1b1   :  { %3946 = vmatpush.msra.mxu1 %v634_v38 }
 0x1b2   :  { %1332 = vmatpush.msrb.mxu0 %v634_v38 }
 0x1b3   :  { %3947 = vmatpush.msra.mxu1 %v630_v5 }
 0x1b4   :  { %1333 = vmatpush.msrb.mxu0 %v630_v5  ;;  %3834 = vmatmul.msk.f32.vlgmr.msra.gmra.mxu2 %vm854_vm8, %v6379_v31 }
 0x1b5   :  { %1303 = vmatmul.f32.gmra.mxu0 %v4437_v63  ;;  %3948 = vmatpush.msra.mxu1 %v602_v14 }
 0x1b6   :  { %1334 = vmatpush.msrb.mxu0 %v602_v14  ;;  %966 = vmatmul.f32.gmra.mxu1 %v6321_v41  ;;  %v6399_v53 = vpop.f32.mrf.mxu2  ;;  %v1037_v51 = vpop.f32.mrf.mxu3 }
 0x1b7   :  { %3949 = vmatpush.msra.mxu1 %v598_v35  ;;  %1218 = vmatmul.f32.gmra.mxu3 %v6177_v59  ;;  %v1119_v12 = vpop.f32.mrf.mxu0 }
 0x1b8   :  { %1335 = vmatpush.msrb.mxu0 %v598_v35 }
 0x1b9   :  { %3950 = vmatpush.msra.mxu1 %v570_v52 }
 0x1ba   :  { %1336 = vmatpush.msrb.mxu0 %v570_v52 }
 0x1bb   :  { %3951 = vmatpush.msra.mxu1 %v566_v19 }
 0x1bc   :  { %1337 = vmatpush.msrb.mxu0 %v566_v19  ;;  %3835 = vmatmul.msk.f32.gmra.mxu2 %vm854_vm8, %v4440_v7 }
 0x1bd   :  { %1306 = vmatmul.f32.gmra.mxu0 %v4439_v1 }
 0x1be   :  { %2253 = vmatpush.msra.mxu0 %v9009_v32  ;;  %1162 = vmatmul.f32.vlgmr.msrb.gmra.mxu1 %v6251_v40  ;;  %v6412_v40 = vpop.f32.mrf.mxu2  ;;  %v6441_v36 = vpop.f32.mrf.mxu3 }
 0x1bf   :  { %1221 = vmatmul.f32.gmra.mxu3 %v6210_v20  ;;  %v1122_v38 = vpop.f32.mrf.mxu0 }
 0x1c4   :  { %3836 = vmatmul.msk.f32.gmra.mxu2 %vm854_vm8, %v4442_v0 }
 0x1c5   :  { %1309 = vmatmul.f32.gmra.mxu0 %v4441_v11 }
 0x1c6   :  { %1165 = vmatmul.f32.gmra.mxu1 %v6298_v58  ;;  %v6426_v58 = vpop.f32.mrf.mxu2 }
 0x1c7   :  { %1224 = vmatmul.f32.gmra.mxu3 %v6233_v57  ;;  %v1125_v5 = vpop.f32.mrf.mxu0 }
 0x1cc   :  { %3837 = vmatmul.msk.f32.gmra.mxu2 %vm854_vm8, %v4444_v22 }
 0x1cd   :  { %1312 = vmatmul.f32.gmra.mxu0 %v4443_v34 }
 0x1ce   :  { %1168 = vmatmul.f32.gmra.mxu1 %v6334_v48  ;;  %v6434_v48 = vpop.f32.mrf.mxu2 }
 0x1cf   :  { %1227 = vmatmul.f32.gmra.mxu3 %v6295_v49  ;;  %v6436_v14 = vpop.f32.mrf.mxu0 }
 0x1d4   :  { %3838 = vmatmul.msk.f32.gmra.mxu2 %vm854_vm8, %v4446_v4 }
 0x1d5   :  { %1315 = vmatmul.f32.gmra.mxu0 %v4445_v17 }
 0x1d6   :  { %1171 = vmatmul.f32.gmra.mxu1 %v4437_v63  ;;  %v6446_v63 = vpop.f32.mrf.mxu2 }
 0x1d7   :  { %1230 = vmatmul.f32.gmra.mxu3 %v6321_v41  ;;  %v6450_v35 = vpop.f32.mrf.mxu0 }
 0x1dc   :  { %3839 = vmatmul.msk.f32.gmra.mxu2 %vm854_vm8, %v5712_v10 }
 0x1dd   :  { %1318 = vmatmul.f32.gmra.mxu0 %v5699_v23  ;;  %v6452_v23 = vpop.f32.mrf.mxu3 }
 0x1de   :  { %1174 = vmatmul.f32.gmra.mxu1 %v4439_v1 }
 0x1df   :  { %3843 = vmatmul.msk.f32.vlgmr.msra.gmra.mxu3 %vm854_vm8, %v6379_v31  ;;  %v6457_v26 = vpop.f32.mrf.mxu0 }
 0x1e4   :  { %3840 = vmatmul.msk.f32.gmra.mxu2 %vm854_vm8, %v5763_v39 }
 0x1e5   :  { %1338 = vmatmul.f32.vlgmr.msrb.gmra.mxu0 %v5987_v9  ;;  %v6460_v52 = vpop.f32.mrf.mxu3 }
 0x1e6   :  { %1177 = vmatmul.f32.gmra.mxu1 %v4441_v11 }
 0x1e7   :  { %3844 = vmatmul.msk.f32.gmra.mxu3 %vm854_vm8, %v4440_v7 }
 0x1ec   :  { %3841 = vmatmul.msk.f32.gmra.mxu2 %vm854_vm8, %v5800_v47 }
 0x1ee   :  { %1180 = vmatmul.f32.gmra.mxu1 %v4443_v34  ;;  %v1075_v10 = vpop.f32.mrf.mxu2  ;;  %v6480_v34 = vpop.f32.mrf.mxu3 }
 0x1ef   :  { %v1076_v31 = vadd.f32 %v1075_v10, %v1031_v33  ;;  %3845 = vmatmul.msk.f32.gmra.mxu3 %vm854_vm8, %v4442_v0 }
 0x1f1   :  { %v1120_v9 = vadd.f32 %v1119_v12, %v1076_v31 }
 0x1f2   :  { %v943_v39 = vpop.f32.mrf.mxu1 }
 0x1f3   :  { %v6462_v19 = vmax.f32 %v1120_v9, 0.0  ;;  %v944_v1 = vadd.f32 %v943_v39, %v5989_v24 }
 0x1f4   :  { %3842 = vmatmul.msk.f32.gmra.mxu2 %vm854_vm8, %v5834_v42  ;;  %v6477_v42 = vpop.f32.mrf.mxu0 }
 0x1f5   :  { %9069 = vst [vmem:[#allocation68_spill] sm:$0xff] %v6462_v19  ;;  %v988_v47 = vadd.f32 %v6219_v55, %v944_v1  ;;  %2048 = vrot.lane.b32.xlu2 %v6462_v19, %s4877_s27 }
 0x1f6   :  { %1183 = vmatmul.f32.gmra.mxu1 %v4445_v17  ;;  %v1078_v7 = vpop.f32.mrf.mxu2 }
 0x1f7   :  { %v6470_v33 = vmax.f32 %v988_v47, 0.0  ;;  %v1079_v12 = vadd.f32 %v1078_v7, %v1034_v46  ;;  %3846 = vmatmul.msk.f32.gmra.mxu3 %vm854_vm8, %v4444_v22 }
 0x1f9   :  { %v1123_v11 = vadd.f32 %v1122_v38, %v1079_v12  ;;  %2046 = vrot.lane.b32.xlu0 %v6470_v33, %s4877_s27  ;;  %1982 = vrot.lane.b32.xlu1 %v6470_v33, %s4873_s25  ;;  %v4447_v38 = vld [vmem:[#allocation15 + $0xc0] sm:$0xff] }
 0x1fa   :  { %v946_v24 = vpop.f32.mrf.mxu1 }
 0x1fb   :  { %v3853_v55 = vmul.f32 -1.442695, %v1123_v11  ;;  %v947_v0 = vadd.f32 %v946_v24, %v6016_v44  ;;  %v4448_v24 = vld [vmem:[#allocation15 + $0x88] sm:$0xff] }
 0x1fc   :  { %v6491_v1 = vpop.f32.mrf.mxu0 }
 0x1fd   :  { %4238 = vpow2.f32 %v3853_v55  ;;  %v991_v46 = vadd.f32 %v6284_v29, %v947_v0  ;;  %2032 = vrot.lane.b32.xlu2 %v6462_v19, %s4871_s7 }
 0x1fe   :  { %1186 = vmatmul.f32.gmra.mxu1 %v4447_v38  ;;  %v1081_v22 = vpop.f32.mrf.mxu2 }
 0x1ff   :  { %v3852_v17 = vmul.f32 -1.442695, %v991_v46  ;;  %v1082_v10 = vadd.f32 %v1081_v22, %v1037_v51  ;;  %3847 = vmatmul.msk.f32.gmra.mxu3 %vm854_vm8, %v4446_v4 }
 0x201   :  { %4240 = vpow2.f32 %v3852_v17  ;;  %v1126_v31 = vadd.f32 %v1125_v5, %v1082_v10  ;;  %2030 = vrot.lane.b32.xlu0 %v6470_v33, %s4871_s7  ;;  %1966 = vrot.lane.b32.xlu1 %v6470_v33, %s4874_s1  ;;  %v6498_v5 = vpop.f32.mrf.mxu3 }
 0x202   :  { %v949_v44 = vpop.f32.mrf.mxu1 }
 0x203   :  { %v4239_v29 = vpop.eup %4238  ;;  %v3857_v9 = vmul.f32 -1.442695, %v1126_v31  ;;  %v950_v39 = vadd.f32 %v949_v44, %v6090_v60 }
 0x204   :  { %v6493_v47 = vadd.f32 1.0, %v4239_v29  ;;  %v6522_v17 = vpop.f32.mrf.mxu0 }
 0x205   :  { %4242 = vpow2.f32 %v3857_v9  ;;  %v994_v51 = vadd.f32 %v6317_v18, %v950_v39  ;;  %1984 = vrot.lane.b32.xlu2 %v6462_v19, %s4873_s25 }
 0x206   :  { %4244 = vrcp.f32 %v6493_v47  ;;  %1341 = vmatmul.f32.vlgmr.msra.gmra.mxu1 %v6011_v2  ;;  %v1084_v4 = vpop.f32.mrf.mxu2  ;;  %vm1466_vm9 = vweird.f32 %v6493_v47 }
 0x207   :  { %v4241_v7 = vpop.eup %4240  ;;  %v3856_v12 = vmul.f32 -1.442695, %v994_v51  ;;  %v1085_v60 = vadd.f32 %v1084_v4, %v6441_v36  ;;  %3848 = vmatmul.msk.f32.gmra.mxu3 %vm854_vm8, %v4448_v24  ;;  %v1470_v51 = vand.u32 2147483647, %v6493_v47  ;;  %v4449_v4 = vld [vmem:[#allocation15 + $0xa0] sm:$0xff] }
 0x208   :  { %v6503_v11 = vadd.f32 1.0, %v4241_v7 }
 0x209   :  { %4246 = vpow2.f32 %v3856_v12  ;;  %v1129_v18 = vadd.f32 %v6436_v14, %v1085_v60  ;;  %2014 = vrot.lane.b32.xlu0 %v6470_v33, %s4870_s6  ;;  %1950 = vrot.lane.b32.xlu1 %v6470_v33, %s4862_s17  ;;  %v6527_v9 = vpop.f32.mrf.mxu3  ;;  %v1472_v60 = vand.u32 2147483648, %v6493_v47  ;;  %vm6561_vm11 = vcmp.eq.f32.partialorder %v1470_v51, 8.507059e+37 }
 0x20a   :  { %4248 = vrcp.f32 %v6503_v11  ;;  %v952_v2 = vpop.f32.mrf.mxu1  ;;  %v1455_v24 = vand.u32 2147483647, %v6503_v11  ;;  %vm1451_vm12 = vweird.f32 %v6503_v11 }
 0x20b   :  { %v4243_v55 = vpop.eup %4242  ;;  %v3861_v0 = vmul.f32 -1.442695, %v1129_v18  ;;  %v953_v36 = vadd.f32 %v952_v2, %v6149_v21  ;;  %v1457_v18 = vand.u32 2147483648, %v6503_v11 }
 0x20c   :  { %v6513_v46 = vpop.eup %4244  ;;  %v6515_v38 = vadd.f32 1.0, %v4243_v55  ;;  %vm6591_vm14 = vcmp.eq.f32.partialorder %v1455_v24, 8.507059e+37 }
 0x20d   :  { %v1462_v14 = vmul.f32 %v6513_v46, %v6493_v47  ;;  %4250 = vpow2.f32 %v3861_v0  ;;  %v997_v22 = vadd.f32 %v6368_v30, %v953_v36  ;;  %1968 = vrot.lane.b32.xlu2 %v6462_v19, %s4874_s1  ;;  %vm1467_vm10 = vweird.f32 %v6513_v46 }
 0x20e   :  { %4252 = vrcp.f32 %v6515_v38  ;;  %1344 = vmatmul.f32.gmra.mxu1 %v6060_v15  ;;  %v1087_v21 = vpop.f32.mrf.mxu2  ;;  %v1532_v0 = vand.u32 2147483648, %v6515_v38  ;;  %vm6575_vm13 = vmor %vm1466_vm9, %vm1467_vm10  ;;  %vm1526_vm9 = vweird.f32 %v6515_v38 }
 0x20f   :  { %v4247_v10 = vpop.eup %4246  ;;  %v1463_v31 = vsub.f32 1.0, %v1462_v14  ;;  %v3860_v44 = vmul.f32 -1.442695, %v997_v22  ;;  %v1088_v29 = vadd.f32 %v1087_v21, %v6452_v23  ;;  %3849 = vmatmul.msk.f32.gmra.mxu3 %vm854_vm8, %v4449_v4  ;;  %v6568_v4 = vor.u32 1.1754944e-38, %v1457_v18 }
 0x210   :  { %v6529_v39 = vpop.eup %4248  ;;  %v6531_v30 = vadd.f32 1.0, %v4247_v10 }
 0x211   :  { %v1447_v15 = vmul.f32 %v6529_v39, %v6503_v11  ;;  %4254 = vpow2.f32 %v3860_v44  ;;  %v1132_v7 = vadd.f32 %v6450_v35, %v1088_v29  ;;  %1998 = vrot.lane.b32.xlu0 %v6470_v33, %s4872_s15  ;;  %1934 = vrot.lane.b32.xlu1 %v6470_v33, %s4875_s26  ;;  %v1464_v23 = vmul.f32 %v6513_v46, %v1463_v31 }
 0x212   :  { %v955_v12 = vpop.f32.mrf.mxu1  ;;  %4256 = vrcp.f32 %v6531_v30  ;;  %v1473_v29 = vor.u32 1.1754944e-38, %v1472_v60  ;;  %vm1452_vm15 = vweird.f32 %v6529_v39 }
 0x213   :  { %v4251_v2 = vpop.eup %4250  ;;  %v3865_v35 = vmul.f32 -1.442695, %v1132_v7  ;;  %v956_v55 = vadd.f32 %v955_v12, %v6185_v56  ;;  %v1448_v14 = vsub.f32 1.0, %v1447_v15  ;;  %v1465_v21 = vadd.f32 %v6513_v46, %v1464_v23 }
 0x214   :  { %v6550_v36 = vpop.eup %4252  ;;  %v6552_v22 = vadd.f32 1.0, %v4251_v2  ;;  %v6582_v12 = vor.u32 1.1754944e-38, %v1532_v0 }
 0x215   :  { %v1522_v10 = vmul.f32 %v6550_v36, %v6515_v38  ;;  %4258 = vpow2.f32 %v3865_v35  ;;  %v1000_v31 = vadd.f32 %v6399_v53, %v956_v55  ;;  %1952 = vrot.lane.b32.xlu2 %v6462_v19, %s4862_s17  ;;  %v1449_v47 = vmul.f32 %v6529_v39, %v1448_v14  ;;  %v4450_v35 = vld [vmem:[#allocation15 + $0xb8] sm:$0xff] }
 0x216   :  { %4260 = vrcp.f32 %v6552_v22  ;;  %1347 = vmatmul.f32.gmra.mxu1 %v6127_v8  ;;  %v1090_v44 = vpop.f32.mrf.mxu2  ;;  %v1530_v8 = vand.u32 2147483647, %v6515_v38  ;;  %v1624_v60 = vand.u32 2147483648, %v6552_v22  ;;  %v1622_v24 = vand.u32 2147483647, %v6552_v22 }
 0x217   :  { %v4255_v15 = vpop.eup %4254  ;;  %v3864_v7 = vmul.f32 -1.442695, %v1000_v31  ;;  %v1091_v53 = vadd.f32 %v1090_v44, %v6460_v52  ;;  %v6579_v23 = vpop.f32.mrf.mxu0  ;;  %v1469_v52 = vsel %vm6575_vm13, %v6513_v46, %v1465_v21  ;;  %3850 = vmatmul.msk.f32.gmra.mxu3 %vm854_vm8, %v4450_v35  ;;  %v1523_v0 = vsub.f32 1.0, %v1522_v10 }
 0x218   :  { %v6585_v18 = vadd.f32 1.0, %v4255_v15  ;;  %v6596_v55 = vpop.eup %4256  ;;  %v6602_v46 = vpop.f32.mrf.mxu3  ;;  %v1450_v21 = vadd.f32 %v6529_v39, %v1449_v47  ;;  %vm1618_vm10 = vweird.f32 %v6552_v22  ;;  %v1625_v51 = vor.u32 1.1754944e-38, %v1624_v60 }
 0x219   :  { %4262 = vpow2.f32 %v3864_v7  ;;  %v1135_v31 = vadd.f32 %v6457_v26, %v1091_v53  ;;  %2016 = vrot.lane.b32.xlu0 %v6462_v19, %s4870_s6  ;;  %v1474_v26 = vsel %vm6561_vm11, %v1473_v29, %v1469_v52  ;;  %v1507_v53 = vmul.f32 %v6596_v55, %v6531_v30  ;;  %vm6627_vm11 = vmor %vm1451_vm12, %vm1452_vm15 }
 0x21a   :  { %4264 = vrcp.f32 %v6585_v18  ;;  %v1609_v47 = vand.u32 2147483648, %v6585_v18  ;;  %v1524_v56 = vmul.f32 %v6550_v36, %v1523_v0  ;;  %vm1527_vm13 = vweird.f32 %v6550_v36 }
 0x21b   :  { %v958_v14 = vpop.f32.mrf.mxu1  ;;  %v4259_v44 = vpop.eup %4258  ;;  %4266 = vtanh.f32 %v1135_v31  ;;  %vm6636_vm0 = vcmp.eq.f32.partialorder %v1622_v24, 8.507059e+37  ;;  %v1607_v11 = vand.u32 2147483647, %v6585_v18  ;;  %vm1603_vm12 = vweird.f32 %v6585_v18  ;;  %vm6687_vm6 = vmor %vm1526_vm9, %vm1527_vm13 }
 0x21c   :  { %v959_v15 = vadd.f32 %v958_v14, %v6223_v54  ;;  %v6613_v7 = vpop.eup %4260  ;;  %v6618_v35 = vadd.f32 1.0, %v4259_v44  ;;  %vm6648_vm15 = vcmp.eq.f32.partialorder %v1530_v8, 8.507059e+37  ;;  %vm1511_vm9 = vweird.f32 %v6531_v30 }
 0x21d   :  { %v1614_v10 = vmul.f32 %v6613_v7, %v6552_v22  ;;  %1936 = vrot.lane.b32.xlu2 %v6462_v19, %s4875_s26 }
 0x21e   :  { %v1003_v62 = vadd.f32 %v6412_v40, %v959_v15  ;;  %4268 = vrcp.f32 %v6618_v35  ;;  %v1454_v40 = vsel %vm6627_vm11, %v6529_v39, %v1450_v21  ;;  %1350 = vmatmul.f32.gmra.mxu1 %v6177_v59  ;;  %v1093_v60 = vpop.f32.mrf.mxu2  ;;  %v1684_v0 = vand.u32 2147483648, %v6618_v35  ;;  %v6657_v59 = vpop.permute.xlu2 %4172 }
 0x21f   :  { %v4263_v52 = vpop.eup %4262  ;;  %v1615_v31 = vsub.f32 1.0, %v1614_v10  ;;  %v1094_v24 = vadd.f32 %v1093_v60, %v6480_v34  ;;  %v1508_v39 = vsub.f32 1.0, %v1507_v53  ;;  %v1610_v21 = vor.u32 1.1754944e-38, %v1609_v47  ;;  %v4451_v10 = vld [vmem:[#allocation15 + $0xd0] sm:$0xff] }
 0x220   :  { %4270 = vtanh.f32 %v1003_v62  ;;  %v6652_v44 = vpop.eup %4264  ;;  %v6654_v15 = vadd.f32 1.0, %v4263_v52  ;;  %vm1619_vm11 = vweird.f32 %v6613_v7  ;;  %3851 = vmatmul.msk.f32.gmra.mxu3 %vm854_vm8, %v4451_v10  ;;  %v1459_v53 = vsel %vm6591_vm14, %v6568_v4, %v1454_v40 }
 0x221   :  { %v4267_v62 = vpop.eup %4266  ;;  %v1616_v34 = vmul.f32 %v6613_v7, %v1615_v31  ;;  %v1599_v8 = vmul.f32 %v6652_v44, %v6585_v18  ;;  %v1525_v47 = vadd.f32 %v6550_v36, %v1524_v56  ;;  %2000 = vrot.lane.b32.xlu0 %v6462_v19, %s4872_s15  ;;  %vm6672_vm8 = vcmp.eq.f32.partialorder %v1607_v11, 8.507059e+37  ;;  %v6691_v11 = vpop.f32.mrf.mxu3  ;;  %vm1620_vm7 = vmor %vm1618_vm10, %vm1619_vm11 }
 0x222   :  { %v6667_v54 = vpop.f32.mrf.mxu0  ;;  %4272 = vrcp.f32 %v6654_v15  ;;  %v1138_v52 = vadd.f32 %v6477_v42, %v1094_v24  ;;  %v1682_v31 = vand.u32 2147483647, %v6618_v35  ;;  %vm1678_vm14 = vweird.f32 %v6618_v35 }
 0x223   :  { %v1600_v10 = vsub.f32 1.0, %v1599_v8  ;;  %v6679_v4 = vor.u32 1.1754944e-38, %v1684_v0  ;;  %v1669_v2 = vand.u32 2147483648, %v6654_v15  ;;  %v1617_v56 = vadd.f32 %v6613_v7, %v1616_v34  ;;  %v961_v42 = vpop.f32.mrf.mxu1 }
 0x224   :  { %v4269_v24 = vpop.eup %4268  ;;  %v1887_v0 = vmul.f32 %v4267_v62, %v1474_v26  ;;  %vm1604_vm5 = vweird.f32 %v6652_v44  ;;  %v962_v34 = vadd.f32 %v961_v42, %v6288_v28  ;;  %v1509_v38 = vmul.f32 %v6596_v55, %v1508_v39 }
 0x225   :  { %v1601_v37 = vmul.f32 %v6652_v44, %v1600_v10  ;;  %v1674_v3 = vmul.f32 %v4269_v24, %v6618_v35  ;;  %v1621_v32 = vsel %vm1620_vm7, %v6613_v7, %v1617_v56  ;;  %v1529_v22 = vsel %vm6687_vm6, %v6550_v36, %v1525_v47 }
 0x226   :  { %v4271_v8 = vpop.eup %4270  ;;  %v1626_v26 = vsel %vm6636_vm0, %v1625_v51, %v1621_v32  ;;  %vm6709_vm10 = vcmp.eq.f32.partialorder %v1682_v31, 8.507059e+37  ;;  %4274 = vtanh.f32 %v1138_v52  ;;  %v1006_v39 = vadd.f32 %v6426_v58, %v962_v34  ;;  %1353 = vmatmul.f32.gmra.mxu1 %v6210_v20  ;;  %vm1605_vm0 = vmor %vm1603_vm12, %vm1604_vm5 }
 0x227   :  { %v1675_v62 = vsub.f32 1.0, %v1674_v3  ;;  %vm1663_vm13 = vweird.f32 %v6654_v15  ;;  %v6716_v7 = vor.u32 1.1754944e-38, %v1669_v2  ;;  %v1879_v10 = vmul.f32 0.0, %v1626_v26  ;;  %v1096_v47 = vpop.f32.mrf.mxu2 }
 0x228   :  { %v1602_v36 = vadd.f32 %v6652_v44, %v1601_v37  ;;  %v4273_v29 = vpop.eup %4272  ;;  %v1886_v32 = vmul.f32 %v4271_v8, %v1459_v53  ;;  %v1534_v20 = vsel %vm6648_vm15, %v6582_v12, %v1529_v22  ;;  %vm1679_vm6 = vweird.f32 %v4269_v24  ;;  %v6737_v12 = vpop.permute.xlu2 %4187 }
 0x229   :  { %v1097_v3 = vadd.f32 %v1096_v47, %v6498_v5  ;;  %v1676_v58 = vmul.f32 %v4269_v24, %v1675_v62  ;;  %v1659_v51 = vmul.f32 %v4273_v29, %v6654_v15  ;;  %v6728_v52 = vadd.f32 %v1887_v0, %v1879_v10  ;;  %vm1680_vm7 = vmor %vm1678_vm14, %vm1679_vm6 }
 0x22a   :  { %v1606_v37 = vsel %vm1605_vm0, %v6652_v44, %v1602_v36  ;;  %v6731_v31 = vpop.f32.mrf.mxu0  ;;  %v1510_v53 = vadd.f32 %v6596_v55, %v1509_v38  ;;  %vm1512_vm5 = vweird.f32 %v6596_v55  ;;  %4276 = vtanh.f32 %v1006_v39  ;;  %v6741_v40 = vpop.f32.mrf.mxu3 }
 0x22b   :  { %v1611_v18 = vsel %vm6672_vm8, %v1610_v21, %v1606_v37  ;;  %v1660_v5 = vsub.f32 1.0, %v1659_v51  ;;  %3679 = vst [vmem:[#allocation30 + $0x8] sm:$0xff] %v6728_v52  ;;  %v1677_v2 = vadd.f32 %v4269_v24, %v1676_v58  ;;  %v1517_v56 = vand.u32 2147483648, %v6531_v30  ;;  %v964_v44 = vpop.f32.mrf.mxu1  ;;  %vm6756_vm15 = vmor %vm1511_vm9, %vm1512_vm5 }
 0x22c   :  { %v1878_v14 = vmul.f32 0.0, %v1611_v18  ;;  %v4275_v42 = vpop.eup %4274  ;;  %3687 = vst [vmem:[#allocation32 + $0x8] sm:$0xff] %v6728_v52  ;;  %vm1664_vm12 = vweird.f32 %v4273_v29  ;;  %v1667_v21 = vand.u32 2147483647, %v6654_v15  ;;  %v1141_v60 = vadd.f32 %v6491_v1, %v1097_v3 }
 0x22d   :  { %v8878_v0 = vunpack.i.h.bf16 %v6737_v12  ;;  %v1661_v34 = vmul.f32 %v4273_v29, %v1660_v5  ;;  %v1681_v8 = vsel %vm1680_vm7, %v4269_v24, %v1677_v2  ;;  %v4189_v35 = vunpack.i.l.bf16 %v6737_v12  ;;  %vm1665_vm11 = vmor %vm1663_vm13, %vm1664_vm12 }
 0x22e   :  { %v6750_v38 = vadd.f32 %v1886_v32, %v1878_v14  ;;  %v1686_v1 = vsel %vm6709_vm10, %v6679_v4, %v1681_v8  ;;  %v1514_v26 = vsel %vm6756_vm15, %v6596_v55, %v1510_v53  ;;  %v3869_v39 = vmul.f32 -1.442695, %v1141_v60  ;;  %1356 = vmatmul.f32.gmra.mxu1 %v6233_v57  ;;  %v6809_v8 = vpop.permute.xlu0 %4162 }
 0x22f   :  { %v965_v24 = vadd.f32 %v964_v44, %v6323_v13  ;;  %v1883_v62 = vmul.f32 0.0, %v1686_v1  ;;  %v1891_v10 = vmul.f32 %v4275_v42, %v1534_v20  ;;  %v1662_v36 = vadd.f32 %v4273_v29, %v1661_v34  ;;  %v1099_v28 = vpop.f32.mrf.mxu2  ;;  %v6814_v1 = vpop.permute.xlu1 %4167 }
 0x230   :  { %3678 = vst [vmem:[#allocation30] sm:$0xff] %v6750_v38  ;;  %v6776_v4 = vsel %vm476_vm1, %v8878_v0, %v4189_v35  ;;  %v4277_v55 = vpop.eup %4276  ;;  %v1518_v13 = vor.u32 1.1754944e-38, %v1517_v56  ;;  %4278 = vpow2.f32 %v3869_v39  ;;  %v1100_v47 = vadd.f32 %v1099_v28, %v6527_v9 }
 0x231   :  { %9090 = vst [vmem:[#allocation69_spill] sm:$0xff] %v6776_v4  ;;  %v1009_v57 = vadd.f32 %v6434_v48, %v965_v24  ;;  %v6784_v32 = vadd.f32 %v1891_v10, %v1883_v62  ;;  %v9091_v20 = vand.u32 2147483647, %v6531_v30  ;;  %v1666_v3 = vsel %vm1665_vm11, %v4273_v29, %v1662_v36  ;;  %v6820_v10 = vpop.permute.xlu2 %4212 }
 0x232   :  { %3686 = vst [vmem:[#allocation32] sm:$0xff] %v6750_v38  ;;  %vm1668_vm14 = vcmp.eq.f32.partialorder %v1667_v21, 8.507059e+37  ;;  %v6788_v58 = vpop.f32.mrf.mxu0  ;;  %v1144_v15 = vadd.f32 %v6522_v17, %v1100_v47  ;;  %v6793_v5 = vpop.f32.mrf.mxu3 }
 0x233   :  { %vm1516_vm8 = vcmp.eq.f32.partialorder %v9091_v20, 8.507059e+37  ;;  %v1671_v37 = vsel %vm1668_vm14, %v6716_v7, %v1666_v3  ;;  %v3868_v18 = vmul.f32 -1.442695, %v1009_v57  ;;  %3683 = vst [vmem:[#allocation30 + $0x28] sm:$0xff] %v6784_v32  ;;  %v967_v9 = vpop.f32.mrf.mxu1 }
 0x234   :  { %v1519_v51 = vsel %vm1516_vm8, %v1518_v13, %v1514_v26  ;;  %v1882_v48 = vmul.f32 0.0, %v1671_v37  ;;  %3691 = vst [vmem:[#allocation32 + $0x28] sm:$0xff] %v6784_v32  ;;  %v3873_v30 = vmul.f32 -1.442695, %v1144_v15  ;;  %v968_v29 = vadd.f32 %v967_v9, %v6373_v61 }
 0x235   :  { %v1890_v53 = vmul.f32 %v4277_v55, %v1519_v51  ;;  %4280 = vpow2.f32 %v3868_v18  ;;  %v8888_v18 = vunpack.i.l.bf16 %v6809_v8 }
 0x236   :  { %v4279_v2 = vpop.eup %4278  ;;  %4282 = vpow2.f32 %v3873_v30  ;;  %v1012_v7 = vadd.f32 %v6446_v63, %v968_v29  ;;  %1359 = vmatmul.f32.gmra.mxu1 %v6295_v49  ;;  %v6853_v9 = vpop.permute.xlu0 %4177 }
 0x237   :  { %v1898_v14 = vadd.f32 %v1890_v53, %v1882_v48  ;;  %v6799_v17 = vadd.f32 1.0, %v4279_v2  ;;  %v1251_v56 = vpop.f32.mrf.mxu2  ;;  %v6857_v29 = vpop.permute.xlu1 %4182 }
 0x238   :  { %v3872_v44 = vmul.f32 -1.442695, %v1012_v7 }
 0x239   :  { %3682 = vst [vmem:[#allocation30 + $0x20] sm:$0xff] %v1898_v14  ;;  %4284 = vrcp.f32 %v6799_v17  ;;  %v1782_v55 = vand.u32 2147483647, %v6799_v17  ;;  %vm1778_vm9 = vweird.f32 %v6799_v17 }
 0x23a   :  { %3690 = vst [vmem:[#allocation32 + $0x20] sm:$0xff] %v1898_v14  ;;  %v6802_v42 = vpop.f32.mrf.mxu0  ;;  %4286 = vpow2.f32 %v3872_v44  ;;  %v6806_v34 = vpop.f32.mrf.mxu3 }
 0x23b   :  { %v4281_v21 = vpop.eup %4280  ;;  %v1163_v60 = vpop.f32.mrf.mxu1  ;;  %vm6848_vm10 = vcmp.eq.f32.partialorder %v1782_v55, 8.507059e+37 }
 0x23c   :  { %v6804_v61 = vadd.f32 1.0, %v4281_v21  ;;  %v4283_v63 = vpop.eup %4282  ;;  %v1208_v49 = vadd.f32 %v6602_v46, %v1163_v60 }
 0x23d   :  { %v6812_v22 = vadd.f32 1.0, %v4283_v63 }
 0x23e   :  { %4288 = vrcp.f32 %v6804_v61  ;;  %v1252_v26 = vadd.f32 %v1251_v56, %v1208_v49  ;;  %1362 = vmatmul.f32.gmra.mxu1 %v6321_v41  ;;  %v1784_v41 = vand.u32 2147483648, %v6799_v17  ;;  %vm1763_vm13 = vweird.f32 %v6804_v61 }
 0x23f   :  { %v6817_v39 = vpop.eup %4284  ;;  %4290 = vrcp.f32 %v6812_v22  ;;  %v1254_v24 = vpop.f32.mrf.mxu2  ;;  %v1769_v2 = vand.u32 2147483648, %v6804_v61  ;;  %vm1838_vm0 = vweird.f32 %v6812_v22  ;;  %v1842_v60 = vand.u32 2147483647, %v6812_v22 }
 0x240   :  { %v4287_v62 = vpop.eup %4286  ;;  %v6822_v46 = vmax.f32 %v1252_v26, 0.0  ;;  %4292 = vtanh.f32 %v6750_v38  ;;  %v1774_v38 = vmul.f32 %v6817_v39, %v6799_v17  ;;  %v1785_v48 = vor.u32 1.1754944e-38, %v1784_v41  ;;  %v6873_v41 = vpop.permute.xlu2 %4217 }
 0x241   :  { %v6824_v36 = vadd.f32 1.0, %v4287_v62  ;;  %4294 = vtanh.f32 %v1898_v14  ;;  %vm1779_vm5 = vweird.f32 %v6817_v39 }
 0x242   :  { %v6826_v28 = vpop.f32.mrf.mxu0  ;;  %2050 = vrot.lane.b32.xlu0 %v6822_v46, %s4877_s27  ;;  %2018 = vrot.lane.b32.xlu1 %v6822_v46, %s4870_s6  ;;  %v6836_v47 = vpop.f32.mrf.mxu3  ;;  %vm1780_vm11 = vmor %vm1778_vm9, %vm1779_vm5  ;;  %vm9107_vm5 = vcmp.lt.s32.totalorder %v5119_v16, 9 }
 0x243   :  { %4296 = vrcp.f32 %v6824_v36  ;;  %v1166_v57 = vpop.f32.mrf.mxu1  ;;  %vm1823_vm14 = vweird.f32 %v6824_v36  ;;  %v1827_v17 = vand.u32 2147483647, %v6824_v36 }
 0x244   :  { %v4289_v13 = vpop.eup %4288  ;;  %v1211_v3 = vadd.f32 %v6691_v11, %v1166_v57  ;;  %4298 = vtanh.f32 %v6784_v32  ;;  %v1767_v32 = vand.u32 2147483647, %v6804_v61 }
 0x245   :  { %v1759_v51 = vmul.f32 %v4289_v13, %v6804_v61  ;;  %v6845_v37 = vpop.eup %4290  ;;  %4300 = vtanh.f32 %v6728_v52  ;;  %v1775_v52 = vsub.f32 1.0, %v1774_v38  ;;  %vm1764_vm6 = vweird.f32 %v4289_v13 }
 0x246   :  { %v1255_v53 = vadd.f32 %v1254_v24, %v1211_v3  ;;  %v4293_v30 = vpop.eup %4292  ;;  %v1834_v7 = vmul.f32 %v6845_v37, %v6812_v22  ;;  %v1844_v24 = vand.u32 2147483648, %v6812_v22  ;;  %vm1768_vm7 = vcmp.eq.f32.partialorder %v1767_v32, 8.507059e+37  ;;  %vm1765_vm12 = vmor %vm1763_vm13, %vm1764_vm6 }
 0x247   :  { %v1760_v11 = vsub.f32 1.0, %v1759_v51  ;;  %v1257_v14 = vpop.f32.mrf.mxu2  ;;  %v6863_v56 = vpop.eup %4294  ;;  %v1776_v62 = vmul.f32 %v6817_v39, %v1775_v52  ;;  %vm1839_vm15 = vweird.f32 %v6845_v37  ;;  %vm1843_vm13 = vcmp.eq.f32.partialorder %v1842_v60, 8.507059e+37 }
 0x248   :  { %v3854_v44 = vmul.f32 -1.442695, %v1255_v53  ;;  %v1835_v26 = vsub.f32 1.0, %v1834_v7  ;;  %v1770_v7 = vor.u32 1.1754944e-38, %v1769_v2  ;;  %vm6905_vm9 = vmor %vm1838_vm0, %vm1839_vm15  ;;  %v2152_v22 = vsel %vm476_vm1, %v4189_v35, %v8888_v18 }
 0x249   :  { %v1761_v21 = vmul.f32 %v4289_v13, %v1760_v11  ;;  %v6866_v63 = vpop.eup %4296  ;;  %v1829_v11 = vand.u32 2147483648, %v6824_v36  ;;  %vm1828_vm0 = vcmp.eq.f32.partialorder %v1827_v17, 8.507059e+37  ;;  %v9099_v17 = vunpack.i.l.bf16 %v6814_v1 }
 0x24a   :  { %v6868_v49 = vpop.f32.mrf.mxu0  ;;  %v4299_v55 = vpop.eup %4298  ;;  %4302 = vpow2.f32 %v3854_v44  ;;  %2034 = vrot.lane.b32.xlu0 %v6822_v46, %s4871_s7  ;;  %2002 = vrot.lane.b32.xlu1 %v6822_v46, %s4872_s15  ;;  %v1819_v57 = vmul.f32 %v6866_v63, %v6824_v36  ;;  %v1836_v52 = vmul.f32 %v6845_v37, %v1835_v26  ;;  %v1777_v44 = vadd.f32 %v6817_v39, %v1776_v62 }
 0x24b   :  { %v1762_v38 = vadd.f32 %v4289_v13, %v1761_v21  ;;  %v4301_v3 = vpop.eup %4300  ;;  %v1169_v51 = vpop.f32.mrf.mxu1  ;;  %vm1824_vm8 = vweird.f32 %v6866_v63  ;;  %vm9102_vm6 = vcmp.lt.s32.totalorder %v5119_v16, 8 }
 0x24c   :  { %v6881_v53 = vpop.f32.mrf.mxu3  ;;  %v1214_v0 = vadd.f32 %v6741_v40, %v1169_v51  ;;  %v1820_v20 = vsub.f32 1.0, %v1819_v57  ;;  %v1837_v32 = vadd.f32 %v6845_v37, %v1836_v52  ;;  %v1781_v2 = vsel %vm1780_vm11, %v6817_v39, %v1777_v44 }
 0x24d   :  { %v1766_v21 = vsel %vm1765_vm12, %v4289_v13, %v1762_v38  ;;  %v1786_v13 = vsel %vm6848_vm10, %v1785_v48, %v1781_v2  ;;  %v1845_v39 = vor.u32 1.1754944e-38, %v1844_v24  ;;  %v6925_v24 = vpop.permute.xlu1 %4197  ;;  %vm6931_vm10 = vmor %vm1823_vm14, %vm1824_vm8  ;;  %vm9116_vm8 = vcmp.lt.s32.totalorder %v5119_v16, 119 }
 0x24e   :  { %v1771_v61 = vsel %vm1768_vm7, %v1770_v7, %v1766_v21  ;;  %v1258_v26 = vadd.f32 %v1257_v14, %v1214_v0  ;;  %v1821_v62 = vmul.f32 %v6866_v63, %v1820_v20  ;;  %v6909_v20 = vpop.permute.xlu0 %4192  ;;  %v1841_v48 = vsel %vm6905_vm9, %v6845_v37, %v1837_v32  ;;  %v6946_v32 = vpop.permute.xlu2 %4222  ;;  %vm9118_vm14 = vmmov %vm9116_vm8 }
 0x24f   :  { %v1926_v40 = vmul.f32 %v4293_v30, %v1771_v61  ;;  %v1260_v57 = vpop.f32.mrf.mxu2  ;;  %v1927_v30 = vmul.f32 %v4301_v3, %v1786_v13  ;;  %v1830_v3 = vor.u32 1.1754944e-38, %v1829_v11  ;;  %v1846_v7 = vsel %vm1843_vm13, %v1845_v39, %v1841_v48 }
 0x250   :  { %v4303_v0 = vpop.eup %4302  ;;  %v3858_v14 = vmul.f32 -1.442695, %v1258_v26  ;;  %v1822_v15 = vadd.f32 %v6866_v63, %v1821_v62  ;;  %v8881_v35 = vunpack.i.l.bf16 %v6925_v24  ;;  %v1931_v44 = vmul.f32 %v4299_v55, %v1846_v7  ;;  %v9098_v62 = vld [vmem:[#allocation43_spill] sm:$0xff] }
 0x251   :  { %3670 = vst [vmem:[#allocation29] sm:$0xff] %v1926_v40  ;;  %v6915_v51 = vadd.f32 1.0, %v4303_v0  ;;  %v8885_v11 = vunpack.i.l.bf16 %v6657_v59  ;;  %v8880_v61 = vunpack.i.l.bf16 %v6820_v10  ;;  %v8882_v55 = vunpack.i.l.bf16 %v6853_v9 }
 0x252   :  { %v6923_v60 = vpop.f32.mrf.mxu0  ;;  %4304 = vpow2.f32 %v3858_v14  ;;  %1986 = vrot.lane.b32.xlu1 %v6822_v46, %s4873_s25  ;;  %v1826_v52 = vsel %vm6931_vm10, %v6866_v63, %v1822_v15  ;;  %3671 = vst [vmem:[#allocation29 + $0x8] sm:$0xff] %v1927_v30  ;;  %v8879_v63 = vunpack.i.l.bf16 %v6873_v41  ;;  %v2154_v40 = vmul.f32 %v2152_v22, %v9098_v62  ;;  %v9100_v30 = vld [vmem:[#allocation45_spill] sm:$0xff] }
 0x253   :  { %4306 = vrcp.f32 %v6915_v51  ;;  %v1172_v36 = vpop.f32.mrf.mxu1  ;;  %v1831_v26 = vsel %vm1828_vm0, %v1830_v3, %v1826_v52  ;;  %3675 = vst [vmem:[#allocation29 + $0x28] sm:$0xff] %v1931_v44  ;;  %v2136_v39 = vsel %vm439_vm2, %v8881_v35, %v9099_v17  ;;  %v8884_v0 = vunpack.i.l.bf16 %v6857_v29  ;;  %v9101_v44 = vld [vmem:[#allocation46_spill] sm:$0xff] }
 0x254   :  { %v6942_v21 = vpop.f32.mrf.mxu3  ;;  %v1217_v2 = vadd.f32 %v6793_v5, %v1172_v36  ;;  %v1930_v13 = vmul.f32 %v6863_v56, %v1831_v26  ;;  %v8883_v5 = vunpack.i.l.bf16 %v6946_v32  ;;  %2211 = vmatpush.msrb.mxu2 %v2154_v40  ;;  %v2138_v22 = vmul.f32 %v2136_v39, %v9100_v30 }
 0x255   :  { %v2121_v3 = vsel %vm402_vm3, %v8880_v61, %v8885_v11  ;;  %v2105_v7 = vsel %vm365_vm4, %v8879_v63, %v8882_v55  ;;  %v9105_v63 = vld [vmem:[#allocation51_spill] sm:$0xff]  ;;  %v7002_v55 = vpop.permute.xlu1 %4202  ;;  %v1487_v18 = vand.u32 2147483648, %v6915_v51  ;;  %vm1481_vm12 = vweird.f32 %v6915_v51 }
 0x256   :  { %v1261_v38 = vadd.f32 %v1260_v57, %v1217_v2  ;;  %3674 = vst [vmem:[#allocation29 + $0x20] sm:$0xff] %v1930_v13  ;;  %v6980_v52 = vpop.permute.xlu0 %4227  ;;  %2212 = vmatpush.msrb.mxu2 %v2138_v22  ;;  %v2122_v36 = vmul.f32 %v2121_v3, %v9101_v44  ;;  %v8887_v13 = vunpack.i.l.bf16 %v6909_v20  ;;  %v6999_v22 = vpop.permute.xlu2 %2174  ;;  %vm9121_vm0 = vcmp.lt.s32.totalorder %v5119_v16, 120 }
 0x257   :  { %v1263_v14 = vpop.f32.mrf.mxu2  ;;  %v8886_v39 = vunpack.i.l.bf16 %v6980_v52  ;;  %9104 = vst [vmem:[#allocation50_spill] sm:$0xff] %v6999_v22 }
 0x258   :  { %v4305_v15 = vpop.eup %4304  ;;  %v3862_v48 = vmul.f32 -1.442695, %v1261_v38  ;;  %v2089_v38 = vsel %vm9102_vm6, %v8883_v5, %v8884_v0  ;;  %2213 = vmatpush.msrb.mxu2 %v8970_v43  ;;  %9106 = vst [vmem:[#allocation60_spill] sm:$0xff] %v7002_v55 }
 0x259   :  { %v6962_v56 = vpop.eup %4306  ;;  %v6964_v57 = vadd.f32 1.0, %v4305_v15  ;;  %v9103_v15 = vld [vmem:[#allocation48_spill] sm:$0xff]  ;;  %v2090_v61 = vmul.f32 %v2089_v38, %v9105_v63 }
 0x25a   :  { %v6966_v37 = vpop.f32.mrf.mxu0  ;;  %4308 = vpow2.f32 %v3862_v48  ;;  %v1477_v2 = vmul.f32 %v6962_v56, %v6915_v51  ;;  %v2106_v48 = vmul.f32 %v2105_v7, %v9103_v15  ;;  %2214 = vmatpush.msrb.mxu2 %v2122_v36  ;;  %v9108_v36 = vld [vmem:[#allocation54_spill] sm:$0xff]  ;;  %vm1482_vm7 = vweird.f32 %v6962_v56 }
 0x25b   :  { %v1175_v26 = vpop.f32.mrf.mxu1  ;;  %4310 = vrcp.f32 %v6964_v57  ;;  %vm7072_vm11 = vmor %vm1481_vm12, %vm1482_vm7  ;;  %vm1541_vm9 = vweird.f32 %v6964_v57 }
 0x25c   :  { %v6985_v40 = vpop.f32.mrf.mxu3  ;;  %v1220_v17 = vadd.f32 %v6806_v34, %v1175_v26  ;;  %v1478_v35 = vsub.f32 1.0, %v1477_v2  ;;  %2215 = vmatpush.msrb.mxu2 %v2106_v48  ;;  %v2073_v34 = vsel %vm9107_vm5, %v8886_v39, %v8887_v13  ;;  %v1485_v48 = vand.u32 2147483647, %v6915_v51 }
 0x25d   :  { %v2074_v26 = vmul.f32 %v2073_v34, %v9108_v36  ;;  %v8892_v36 = vunpack.i.l.bf16 %v7002_v55 }
 0x25e   :  { %v1264_v3 = vadd.f32 %v1263_v14, %v1220_v17  ;;  %2216 = vmatpush.msrb.mxu2 %v2090_v61  ;;  %v1479_v13 = vmul.f32 %v6962_v56, %v1478_v35  ;;  %vm7061_vm15 = vcmp.eq.f32.partialorder %v1485_v48, 8.507059e+37 }
 0x25f   :  { %v1266_v5 = vpop.f32.mrf.mxu2 }
 0x260   :  { %v4309_v0 = vpop.eup %4308  ;;  %v3866_v11 = vmul.f32 -1.442695, %v1264_v3  ;;  %v4165_v3 = vunpack.i.h.bf16 %v6809_v8  ;;  %2217 = vmatpush.msrb.mxu2 %v2074_v26 }
 0x261   :  { %v7010_v7 = vadd.f32 1.0, %v4309_v0  ;;  %v7013_v38 = vpop.eup %4310 }
 0x262   :  { %v1339_v14 = vpop.f32.mrf.mxu0  ;;  %4312 = vpow2.f32 %v3866_v11  ;;  %v1537_v61 = vmul.f32 %v7013_v38, %v6964_v57  ;;  %vm1542_vm5 = vweird.f32 %v7013_v38 }
 0x263   :  { %v1340_v17 = vadd.f32 %v1339_v14, %v6579_v23  ;;  %4314 = vrcp.f32 %v7010_v7  ;;  %v1178_v39 = vpop.f32.mrf.mxu1  ;;  %v8891_v14 = vunpack.i.h.bf16 %v7002_v55  ;;  %v1637_v44 = vand.u32 2147483647, %v7010_v7 }
 0x264   :  { %v1383_v0 = vpop.f32.mrf.mxu3  ;;  %v1223_v2 = vadd.f32 %v6836_v47, %v1178_v39  ;;  %v9109_v47 = vunpack.i.h.bf16 %v6737_v12  ;;  %vm1633_vm13 = vweird.f32 %v7010_v7 }
 0x265   :  { %v1384_v11 = vadd.f32 %v1383_v0, %v1340_v17  ;;  %v1480_v17 = vadd.f32 %v6962_v56, %v1479_v13  ;;  %v2183_v48 = vsel %vm9116_vm8, %v8892_v36, %v8891_v14  ;;  %v7096_v36 = vld [vmem:[#allocation12 + $0x20] ss:$0 sm:$0xff]  ;;  %vm7118_vm6 = vcmp.eq.f32.partialorder %v1637_v44, 8.507059e+37 }
 0x266   :  { %v1267_v34 = vadd.f32 %v1266_v5, %v1223_v2  ;;  %v7037_v39 = vsel %vm476_vm1, %v4165_v3, %v9109_v47  ;;  %v7046_v2 = vpop.permute.xlu2 %2048 }
 0x267   :  { %v7030_v35 = vmax.f32 %v1384_v11, 0.0  ;;  %v1269_v0 = vpop.f32.mrf.mxu2  ;;  %v9110_v11 = vunpack.i.l.bf16 %v6809_v8  ;;  %v1538_v8 = vsub.f32 1.0, %v1537_v61  ;;  %v1488_v61 = vor.u32 1.1754944e-38, %v1487_v18 }
 0x268   :  { %v4313_v23 = vpop.eup %4312  ;;  %4316 = vtanh.f32 %v1267_v34  ;;  %v1639_v34 = vand.u32 2147483648, %v7010_v7  ;;  %v1484_v12 = vsel %vm7072_vm11, %v6962_v56, %v1480_v17  ;;  %v1545_v56 = vand.u32 2147483647, %v6964_v57  ;;  %v7102_v17 = vld [vmem:[#allocation12 + $0x28] ss:$0 sm:$0xff]  ;;  %vm7197_vm11 = vmor %vm1541_vm9, %vm1542_vm5 }
 0x269   :  { %v2151_v5 = vsel %vm476_vm1, %v9110_v11, %v4165_v3  ;;  %2036 = vrot.lane.b32.xlu2 %v7030_v35, %s4871_s7  ;;  %1988 = vrot.lane.b32.xlu0 %v7030_v35, %s4873_s25  ;;  %v7055_v13 = vpop.eup %4314  ;;  %v7057_v26 = vadd.f32 1.0, %v4313_v23  ;;  %v7059_v3 = vpop.permute.xlu1 %4207  ;;  %v1539_v23 = vmul.f32 %v7013_v38, %v1538_v8  ;;  %v1489_v8 = vsel %vm7061_vm15, %v1488_v61, %v1484_v12  ;;  %v9125_v11 = vld [vmem:[#allocation59_spill] sm:$0xff]  ;;  %vm9134_vm15 = vmmov %vm9121_vm0 }
 0x26a   :  { %9111 = vst [vmem:[#allocation53_spill] sm:$0xff] %v7059_v3  ;;  %2052 = vrot.lane.b32.xlu1 %v7030_v35, %s4877_s27  ;;  %v1629_v51 = vmul.f32 %v7055_v13, %v7010_v7  ;;  %vm1634_vm10 = vweird.f32 %v7055_v13  ;;  %v9119_v27 = vunpack.i.h.bf16 %v7059_v3  ;;  %v2155_v61 = vmul.f32 %v2151_v5, %v9125_v11 }
 0x26b   :  { %4318 = vrcp.f32 %v7057_v26  ;;  %v1181_v63 = vpop.f32.mrf.mxu1  ;;  %v7088_v15 = vpop.permute.xlu0 %2046  ;;  %vm1635_vm7 = vmor %vm1633_vm13, %vm1634_vm10  ;;  %v7136_v44 = vadd.f32 %v7013_v38, %v1539_v23  ;;  %vm7150_vm12 = vcmp.eq.f32.partialorder %v1545_v56, 8.507059e+37  ;;  %v9130_v5 = vunpack.i.l.bf16 %v6814_v1 }
 0x26c   :  { %9117 = vst [vmem:[#allocation72_spill] sm:$0xff] %v7088_v15  ;;  %v1630_v18 = vsub.f32 1.0, %v1629_v51  ;;  %v1226_v45 = vadd.f32 %v6881_v53, %v1181_v63  ;;  %v2056_v14 = vsel %vm9118_vm14, %v7088_v15, %v7046_v2  ;;  %v2187_v51 = vmul.f32 %v7102_v17, %v2183_v48  ;;  %2269 = vmatpush.msrb.mxu1 %v2155_v61 }
 0x26d   :  { %v2058_v47 = vmul.f32 %v7096_v36, %v2056_v14  ;;  %v1547_v63 = vand.u32 2147483648, %v6964_v57  ;;  %v1640_v14 = vor.u32 1.1754944e-38, %v1639_v34  ;;  %v9120_v48 = vunpack.i.l.bf16 %v7059_v3  ;;  %v9126_v34 = vld [vmem:[#allocation77_spill] sm:$0xff] }
 0x26e   :  { %v1631_v53 = vmul.f32 %v7055_v13, %v1630_v18  ;;  %v4317_v15 = vpop.eup %4316  ;;  %v1270_v50 = vadd.f32 %v1269_v0, %v1226_v45  ;;  %2312 = vmatpush.msrb.mxu3 %v2187_v51  ;;  %v9124_v0 = vld [vmem:[#allocation58_spill] sm:$0xff]  ;;  %v7143_v51 = vmul.f32 %v7037_v39, %v9126_v34  ;;  %v9129_v3 = vunpack.i.h.bf16 %v6814_v1  ;;  %v9136_v1 = vld [vmem:[#allocation81_spill] sm:$0xff] }
 0x26f   :  { %2218 = vmatpush.msrb.mxu2 %v2058_v47  ;;  %v2167_v18 = vsel %vm9121_vm0, %v9120_v48, %v9119_v27  ;;  %v1272_v45 = vpop.f32.mrf.mxu2  ;;  %v1699_v27 = vand.u32 2147483648, %v7057_v26  ;;  %v1697_v61 = vand.u32 2147483647, %v7057_v26  ;;  %v9143_v57 = vunpack.i.h.bf16 %v6820_v10 }
 0x270   :  { %v1632_v25 = vadd.f32 %v7055_v13, %v1631_v53  ;;  %v2171_v12 = vmul.f32 %v2167_v18, %v9124_v0  ;;  %v7145_v53 = vpop.permute.xlu2 %2032  ;;  %v1888_v18 = vmul.f32 %v4317_v15, %v1489_v8  ;;  %v2135_v39 = vsel %vm439_vm2, %v9130_v5, %v9129_v3 }
 0x271   :  { %1972 = vrot.lane.b32.xlu2 %v7030_v35, %s4874_s1  ;;  %2004 = vrot.lane.b32.xlu0 %v7030_v35, %s4872_s15  ;;  %v7128_v47 = vpop.eup %4318  ;;  %4320 = vtanh.f32 %v1270_v50  ;;  %v9133_v56 = vmov %v9129_v3  ;;  %vm1693_vm14 = vweird.f32 %v7057_v26  ;;  %vm1698_vm13 = vcmp.eq.f32.partialorder %v1697_v61, 8.507059e+37 }
 0x272   :  { %2020 = vrot.lane.b32.xlu1 %v7030_v35, %s4870_s6  ;;  %v1689_v48 = vmul.f32 %v7128_v47, %v7057_v26  ;;  %v1636_v7 = vsel %vm1635_vm7, %v7055_v13, %v1632_v25  ;;  %2313 = vmatpush.msrb.mxu3 %v2171_v12  ;;  %v9131_v25 = vld [vmem:[#allocation62_spill] sm:$0xff]  ;;  %v9132_v13 = vunpack.i.h.bf16 %v6925_v24  ;;  %vm1694_vm8 = vweird.f32 %v7128_v47 }
 0x273   :  { %v1641_v34 = vsel %vm7118_vm6, %v1640_v14, %v1636_v7  ;;  %v1184_v6 = vpop.f32.mrf.mxu1  ;;  %v7162_v19 = vpop.permute.xlu0 %2030  ;;  %v2139_v15 = vmul.f32 %v2135_v39, %v9131_v25  ;;  %v9135_v7 = vld [vmem:[#allocation42_spill] sm:$0xff]  ;;  %vm1695_vm9 = vmor %vm1693_vm14, %vm1694_vm8  ;;  %v1700_v26 = vor.u32 1.1754944e-38, %v1699_v27  ;;  %vm9156_vm10 = vcmp.lt.s32.totalorder %v5119_v16, 8 }
 0x274   :  { %3952 = vmatpush.msra.mxu3 %v7143_v51  ;;  %v2134_v8 = vsel %vm439_vm2, %v9133_v56, %v9132_v13  ;;  %v1690_v3 = vsub.f32 1.0, %v1689_v48  ;;  %v1880_v12 = vmul.f32 0.0, %v1641_v34  ;;  %v1229_v4 = vadd.f32 %v6942_v21, %v1184_v6  ;;  %v7177_v14 = vpop.f32.mrf.mxu3  ;;  %vm9159_vm0 = vmmov %vm9156_vm10 }
 0x275   :  { %v2040_v50 = vsel %vm9134_vm15, %v7162_v19, %v7145_v53  ;;  %2270 = vmatpush.msrb.mxu1 %v2139_v15  ;;  %v7182_v39 = vmul.f32 %v2134_v8, %v9136_v1  ;;  %v9138_v48 = vunpack.i.h.bf16 %v6657_v59  ;;  %v9139_v34 = vunpack.i.l.bf16 %v6657_v59 }
 0x276   :  { %v2042_v5 = vmul.f32 %v2040_v50, %v9135_v7  ;;  %v1691_v21 = vmul.f32 %v7128_v47, %v1690_v3  ;;  %v7191_v13 = vadd.f32 %v1888_v18, %v1880_v12  ;;  %v1273_v56 = vadd.f32 %v1272_v45, %v1229_v4  ;;  %v9142_v18 = vld [vmem:[#allocation64_spill] sm:$0xff] }
 0x277   :  { %9137 = vst [vmem:[#allocation47_spill] sm:$0xff] %v7182_v39  ;;  %v2120_v6 = vsel %vm402_vm3, %v9139_v34, %v9138_v48  ;;  %v1544_v8 = vsel %vm7197_vm11, %v7013_v38, %v7136_v44  ;;  %v1548_v50 = vor.u32 1.1754944e-38, %v1547_v63  ;;  %3953 = vmatpush.msra.mxu3 %v7182_v39  ;;  %v9144_v12 = vmov %v9138_v48  ;;  %v9145_v63 = vld [vmem:[#allocation82_spill] sm:$0xff]  ;;  %v4321_v59 = vpop.eup %4320  ;;  %2271 = vmatpush.msrb.mxu1 %v8970_v43  ;;  %v1275_v15 = vpop.f32.mrf.mxu2 }
 0x278   :  { %2219 = vmatpush.msrb.mxu2 %v2042_v5  ;;  %v2123_v3 = vmul.f32 %v2120_v6, %v9142_v18  ;;  %v2119_v48 = vsel %vm402_vm3, %v9144_v12, %v9143_v57  ;;  %3680 = vst [vmem:[#allocation30 + $0x10] sm:$0xff] %v7191_v13  ;;  %v1692_v45 = vadd.f32 %v7128_v47, %v1691_v21  ;;  %v3870_v38 = vmul.f32 -1.442695, %v1273_v56  ;;  %v9151_v56 = vld [vmem:[#allocation70_spill] sm:$0xff]  ;;  %v9152_v12 = vld [vmem:[#allocation85_spill] sm:$0xff] }
 0x279   :  { %2158 = vrot.lane.b32.xlu2 %v8970_v43, %s4871_s7  ;;  %1940 = vrot.lane.b32.xlu0 %v7030_v35, %s4875_s26  ;;  %v7222_v44 = vmul.f32 %v2119_v48, %v9145_v63  ;;  %3688 = vst [vmem:[#allocation32 + $0x10] sm:$0xff] %v7191_v13  ;;  %v9147_v4 = vunpack.i.h.bf16 %v6853_v9  ;;  %v9148_v5 = vunpack.i.l.bf16 %v6853_v9  ;;  %v9149_v6 = vunpack.i.h.bf16 %v6873_v41 }
 0x27a   :  { %1956 = vrot.lane.b32.xlu1 %v7030_v35, %s4862_s17  ;;  %v1696_v27 = vsel %vm1695_vm9, %v7128_v47, %v1692_v45  ;;  %4322 = vpow2.f32 %v3870_v38  ;;  %3954 = vmatpush.msra.mxu3 %v8970_v43  ;;  %v9155_v47 = vunpack.i.l.bf16 %v6857_v29  ;;  %v9157_v38 = vunpack.i.h.bf16 %v6946_v32 }
 0x27b   :  { %9146 = vst [vmem:[#allocation73_spill] sm:$0xff] %v7222_v44  ;;  %v2104_v34 = vsel %vm365_vm4, %v9148_v5, %v9147_v4  ;;  %v9150_v21 = vmov %v9147_v4  ;;  %v1549_v4 = vsel %vm7150_vm12, %v1548_v50, %v1544_v8  ;;  %v1701_v5 = vsel %vm1698_vm13, %v1700_v26, %v1696_v27  ;;  %v1187_v39 = vpop.f32.mrf.mxu1  ;;  %v7250_v9 = vpop.permute.xlu0 %2014  ;;  %2272 = vmatpush.msrb.mxu1 %v2123_v3  ;;  %v9160_v3 = vld [vmem:[#allocation71_spill] sm:$0xff]  ;;  %vm9181_vm13 = vmmov %vm9159_vm0 }
 0x27c   :  { %v2103_v61 = vsel %vm365_vm4, %v9150_v21, %v9149_v6  ;;  %v2107_v57 = vmul.f32 %v2104_v34, %v9151_v56  ;;  %v9154_v6 = vunpack.i.h.bf16 %v6857_v29  ;;  %v1884_v8 = vmul.f32 0.0, %v1701_v5  ;;  %3955 = vmatpush.msra.mxu3 %v7222_v44  ;;  %v1389_v29 = vpop.f32.mrf.mxu3 }
 0x27d   :  { %v7246_v48 = vmul.f32 %v2103_v61, %v9152_v12  ;;  %v1892_v50 = vmul.f32 %v4321_v59, %v1549_v4  ;;  %v1232_v26 = vadd.f32 %v6985_v40, %v1187_v39  ;;  %v9161_v61 = vld [vmem:[#allocation87_spill] sm:$0xff]  ;;  %v4195_v59 = vunpack.i.h.bf16 %v6909_v20 }
 0x27e   :  { %v2088_v45 = vsel %vm9156_vm10, %v9155_v47, %v9154_v6  ;;  %v9158_v34 = vmov %v9154_v6  ;;  %2273 = vmatpush.msrb.mxu1 %v2107_v57  ;;  %v4230_v40 = vunpack.i.h.bf16 %v6980_v52  ;;  %v9163_v57 = vunpack.i.l.bf16 %v6925_v24 }
 0x27f   :  { %9153 = vst [vmem:[#allocation61_spill] sm:$0xff] %v7246_v48  ;;  %v2087_v23 = vsel %vm9159_vm0, %v9158_v34, %v9157_v38  ;;  %v2091_v21 = vmul.f32 %v2088_v45, %v9160_v3  ;;  %v7270_v6 = vadd.f32 %v1892_v50, %v1884_v8  ;;  %v1276_v47 = vadd.f32 %v1275_v15, %v1232_v26 }
 0x280   :  { %v7268_v27 = vmul.f32 %v2087_v23, %v9161_v61  ;;  %3956 = vmatpush.msra.mxu3 %v7246_v48  ;;  %v4323_v38 = vpop.eup %4322  ;;  %v9164_v4 = vunpack.i.h.bf16 %v6925_v24  ;;  %v9165_v8 = vunpack.i.l.bf16 %v6909_v20  ;;  %vm9166_vm6 = vcmp.lt.s32.totalorder %v5119_v16, 9 }
 0x281   :  { %2274 = vmatpush.msrb.mxu1 %v2091_v21  ;;  %3684 = vst [vmem:[#allocation30 + $0x30] sm:$0xff] %v7270_v6  ;;  %v3874_v39 = vmul.f32 -1.442695, %v1276_v47  ;;  %1938 = vrot.lane.b32.xlu2 %v6822_v46, %s4875_s26  ;;  %v1752_v15 = vadd.f32 1.0, %v4323_v38  ;;  %vm9167_vm5 = vmmov %vm9166_vm6  ;;  %v9168_v21 = vld [vmem:[#allocation74_spill] sm:$0xff]  ;;  %v9169_v47 = vld [vmem:[#allocation88_spill] sm:$0xff] }
 0x282   :  { %9162 = vst [vmem:[#allocation55_spill] sm:$0xff] %v7268_v27  ;;  %1970 = vrot.lane.b32.xlu0 %v6822_v46, %s4874_s1  ;;  %1954 = vrot.lane.b32.xlu1 %v6822_v46, %s4862_s17  ;;  %v7290_v5 = vsel %vm439_vm2, %v9164_v4, %v9163_v57  ;;  %v2072_v50 = vsel %vm9166_vm6, %v9165_v8, %v4195_v59  ;;  %v9171_v57 = vunpack.i.l.bf16 %v6820_v10  ;;  %v9172_v4 = vunpack.i.h.bf16 %v6820_v10  ;;  %vm9176_vm12 = vmmov %vm9167_vm5 }
 0x283   :  { %3692 = vst [vmem:[#allocation32 + $0x30] sm:$0xff] %v7270_v6  ;;  %3957 = vmatpush.msra.mxu3 %v7268_v27  ;;  %4324 = vpow2.f32 %v3874_v39  ;;  %v1342_v45 = vpop.f32.mrf.mxu1  ;;  %v7292_v34 = vpop.permute.xlu0 %1998  ;;  %v2071_v26 = vsel %vm9167_vm5, %v4195_v59, %v4230_v40  ;;  %v2075_v24 = vmul.f32 %v2072_v50, %v9168_v21  ;;  %vm9174_vm7 = vcmp.lt.s32.totalorder %v5119_v16, 119 }
 0x284   :  { %4326 = vrcp.f32 %v1752_v15  ;;  %v1343_v23 = vadd.f32 %v1342_v45, %v6667_v54  ;;  %v7303_v38 = vmul.f32 %v2071_v26, %v9169_v47  ;;  %v7312_v54 = vsel %vm402_vm3, %v9172_v4, %v9171_v57  ;;  %v1392_v45 = vpop.f32.mrf.mxu3  ;;  %v7342_v27 = vpop.permute.xlu1 %1982 }
 0x285   :  { %2275 = vmatpush.msrb.mxu1 %v2075_v24  ;;  %vm1793_vm11 = vweird.f32 %v1752_v15 }
 0x286   :  { %9170 = vst [vmem:[#allocation57_spill] sm:$0xff] %v7303_v38  ;;  %v1387_v39 = vadd.f32 %v7177_v14, %v1343_v23  ;;  %3958 = vmatpush.msra.mxu3 %v7303_v38  ;;  %v9173_v14 = vunpack.i.l.bf16 %v7002_v55 }
 0x288   :  { %v3855_v59 = vmul.f32 -1.442695, %v1387_v39  ;;  %v2184_v23 = vsel %vm9174_vm7, %v6999_v22, %v9173_v14  ;;  %v1797_v22 = vand.u32 2147483647, %v1752_v15 }
 0x289   :  { %v4325_v20 = vpop.eup %4324  ;;  %v2186_v39 = vmul.f32 %v7096_v36, %v2184_v23  ;;  %v9178_v23 = vunpack.i.h.bf16 %v6873_v41 }
 0x28a   :  { %2180 = vrot.lane.b32.xlu0 %v8970_v43, %s4877_s27  ;;  %v4327_v8 = vpop.eup %4326  ;;  %v7317_v50 = vadd.f32 1.0, %v4325_v20  ;;  %2164 = vrot.lane.b32.xlu1 %v8970_v43, %s4871_s7  ;;  %4328 = vpow2.f32 %v3855_v59  ;;  %v9175_v20 = vunpack.i.l.bf16 %v6980_v52  ;;  %vm1798_vm14 = vcmp.eq.f32.partialorder %v1797_v22, 8.507059e+37 }
 0x28b   :  { %v1789_v10 = vmul.f32 %v4327_v8, %v1752_v15  ;;  %v1345_v26 = vpop.f32.mrf.mxu1  ;;  %v7327_v24 = vpop.permute.xlu0 %2016  ;;  %2254 = vmatpush.msra.mxu0 %v2186_v39  ;;  %vm1794_vm15 = vweird.f32 %v4327_v8  ;;  %v9179_v22 = vunpack.i.l.bf16 %v6946_v32 }
 0x28c   :  { %4330 = vrcp.f32 %v7317_v50  ;;  %v1346_v57 = vadd.f32 %v1345_v26, %v6731_v31  ;;  %v2024_v4 = vsel %vm476_vm1, %v7250_v9, %v7327_v24  ;;  %v7339_v59 = vsel %vm9176_vm12, %v4230_v40, %v9175_v20  ;;  %vm1795_vm8 = vmor %vm1793_vm11, %vm1794_vm15 }
 0x28d   :  { %v2026_v14 = vmul.f32 %v2024_v4, %v9098_v62  ;;  %v1790_v38 = vsub.f32 1.0, %v1789_v10  ;;  %v9177_v31 = vunpack.i.l.bf16 %v6873_v41  ;;  %v1799_v40 = vand.u32 2147483648, %v1752_v15 }
 0x28e   :  { %v1390_v36 = vadd.f32 %v1389_v29, %v1346_v57  ;;  %4332 = vtanh.f32 %v7191_v13  ;;  %v1395_v57 = vpop.f32.mrf.mxu3  ;;  %vm1853_vm10 = vweird.f32 %v7317_v50 }
 0x28f   :  { %v7350_v26 = vsel %vm365_vm4, %v9178_v23, %v9177_v31  ;;  %2220 = vmatpush.msrb.mxu2 %v2026_v14  ;;  %v1791_v52 = vmul.f32 %v4327_v8, %v1790_v38  ;;  %v1800_v13 = vor.u32 1.1754944e-38, %v1799_v40  ;;  %v9180_v40 = vunpack.i.h.bf16 %v6946_v32 }
 0x290   :  { %v4329_v4 = vpop.eup %4328  ;;  %v3859_v39 = vmul.f32 -1.442695, %v1390_v36 }
 0x291   :  { %v1792_v20 = vadd.f32 %v4327_v8, %v1791_v52  ;;  %v7354_v41 = vadd.f32 1.0, %v4329_v4 }
 0x292   :  { %v4331_v10 = vpop.eup %4330  ;;  %4334 = vpow2.f32 %v3859_v39  ;;  %v1859_v39 = vand.u32 2147483648, %v7317_v50 }
 0x293   :  { %v1849_v29 = vmul.f32 %v4331_v10, %v7317_v50  ;;  %v1348_v31 = vpop.f32.mrf.mxu1  ;;  %v7356_v23 = vpop.permute.xlu0 %2000  ;;  %4336 = vtanh.f32 %v7270_v6  ;;  %v1796_v52 = vsel %vm1795_vm8, %v4327_v8, %v1792_v20  ;;  %vm1854_vm9 = vweird.f32 %v4331_v10 }
 0x294   :  { %v1349_v38 = vadd.f32 %v1348_v31, %v6788_v58  ;;  %v2008_v14 = vsel %vm439_vm2, %v7292_v34, %v7356_v23  ;;  %v4333_v15 = vpop.eup %4332  ;;  %v1801_v62 = vsel %vm1798_vm14, %v1800_v13, %v1796_v52  ;;  %v7372_v58 = vsel %vm9181_vm13, %v9180_v40, %v9179_v22  ;;  %vm1855_vm0 = vmor %vm1853_vm10, %vm1854_vm9  ;;  %v7383_v52 = vpop.permute.xlu2 %1984 }
 0x295   :  { %v1850_v36 = vsub.f32 1.0, %v1849_v29  ;;  %v2010_v4 = vmul.f32 %v2008_v14, %v9100_v30  ;;  %v1928_v55 = vmul.f32 %v4333_v15, %v1801_v62  ;;  %4338 = vrcp.f32 %v7354_v41  ;;  %v7376_v29 = vpop.permute.xlu1 %1966 }
 0x296   :  { %v1393_v6 = vadd.f32 %v1392_v45, %v1349_v38  ;;  %v1857_v8 = vand.u32 2147483647, %v7317_v50  ;;  %v1860_v14 = vor.u32 1.1754944e-38, %v1859_v39  ;;  %vm1496_vm7 = vweird.f32 %v7354_v41 }
 0x297   :  { %v1851_v31 = vmul.f32 %v4331_v10, %v1850_v36  ;;  %2221 = vmatpush.msrb.mxu2 %v2010_v4  ;;  %3672 = vst [vmem:[#allocation29 + $0x10] sm:$0xff] %v1928_v55  ;;  %v1398_v55 = vpop.f32.mrf.mxu3 }
 0x298   :  { %v4335_v20 = vpop.eup %4334  ;;  %v3863_v13 = vmul.f32 -1.442695, %v1393_v6  ;;  %vm1858_vm6 = vcmp.eq.f32.partialorder %v1857_v8, 8.507059e+37 }
 0x299   :  { %v1852_v45 = vadd.f32 %v4331_v10, %v1851_v31  ;;  %v4337_v32 = vpop.eup %4336  ;;  %2222 = vmatpush.msrb.mxu2 %v6470_v33  ;;  %v7381_v38 = vadd.f32 1.0, %v4335_v20 }
 0x29a   :  { %4340 = vpow2.f32 %v3863_v13 }
 0x29b   :  { %v1856_v62 = vsel %vm1855_vm0, %v4331_v10, %v1852_v45  ;;  %v1351_v36 = vpop.f32.mrf.mxu1  ;;  %v7386_v6 = vpop.eup %4338  ;;  %4342 = vrcp.f32 %v7381_v38  ;;  %vm1556_vm9 = vweird.f32 %v7381_v38  ;;  %vm2198_vm0 = vcmask 195584  }
 0x29c   :  { %v1352_v15 = vadd.f32 %v1351_v36, %v6802_v42  ;;  %v1861_v4 = vsel %vm1858_vm6, %v1860_v14, %v1856_v62  ;;  %v1492_v10 = vmul.f32 %v7386_v6, %v7354_v41  ;;  %v7396_v45 = vpop.permute.xlu2 %1968  ;;  %vm1497_vm5 = vweird.f32 %v7386_v6 }
 0x29d   :  { %v1932_v50 = vmul.f32 %v4337_v32, %v1861_v4  ;;  %v7391_v31 = vpop.permute.xlu1 %1950  ;;  %vm7412_vm15 = vmor %vm1496_vm7, %vm1497_vm5  ;;  %vm9186_vm6 = vcmp.lt.s32.totalorder %v5119_v16, 119 }
 0x29e   :  { %v1396_v33 = vadd.f32 %v1395_v57, %v1352_v15  ;;  %v1493_v20 = vsub.f32 1.0, %v1492_v10 }
 0x29f   :  { %3676 = vst [vmem:[#allocation29 + $0x30] sm:$0xff] %v1932_v50  ;;  %v1401_v62 = vpop.f32.mrf.mxu3 }
 0x2a0   :  { %v4341_v22 = vpop.eup %4340  ;;  %v3867_v39 = vmul.f32 -1.442695, %v1396_v33  ;;  %v1494_v36 = vmul.f32 %v7386_v6, %v1493_v20 }
 0x2a1   :  { %v1593_v40 = vadd.f32 1.0, %v4341_v22  ;;  %v7393_v8 = vpop.eup %4342  ;;  %v1502_v22 = vand.u32 2147483648, %v7354_v41 }
 0x2a2   :  { %4344 = vpow2.f32 %v3867_v39  ;;  %v1552_v32 = vmul.f32 %v7393_v8, %v7381_v38  ;;  %vm1557_vm13 = vweird.f32 %v7393_v8 }
 0x2a3   :  { %4346 = vrcp.f32 %v1593_v40  ;;  %v1354_v42 = vpop.f32.mrf.mxu1  ;;  %vm1648_vm8 = vweird.f32 %v1593_v40  ;;  %vm7456_vm7 = vmor %vm1556_vm9, %vm1557_vm13  ;;  %vm9191_vm9 = vcmp.lt.s32.totalorder %v5119_v16, 8  ;;  %vm9192_vm13 = vcmp.lt.s32.totalorder %v5119_v16, 9 }
 0x2a4   :  { %v1355_v13 = vadd.f32 %v1354_v42, %v6826_v28  ;;  %v1553_v33 = vsub.f32 1.0, %v1552_v32  ;;  %v1500_v28 = vand.u32 2147483647, %v7354_v41  ;;  %v1495_v42 = vadd.f32 %v7386_v6, %v1494_v36  ;;  %v7421_v44 = vpop.permute.xlu2 %1952 }
 0x2a5   :  { %v7406_v10 = vpop.permute.xlu1 %1934  ;;  %v1503_v41 = vor.u32 1.1754944e-38, %v1502_v22 }
 0x2a6   :  { %v1399_v57 = vadd.f32 %v1398_v55, %v1355_v13  ;;  %v1654_v13 = vand.u32 2147483648, %v1593_v40  ;;  %vm7416_vm11 = vcmp.eq.f32.partialorder %v1500_v28, 8.507059e+37  ;;  %v1554_v36 = vmul.f32 %v7393_v8, %v1553_v33 }
 0x2a7   :  { %v1404_v33 = vpop.f32.mrf.mxu3 }
 0x2a8   :  { %v4345_v14 = vpop.eup %4344  ;;  %4348 = vtanh.f32 %v1399_v57  ;;  %v1652_v57 = vand.u32 2147483647, %v1593_v40  ;;  %v1655_v47 = vor.u32 1.1754944e-38, %v1654_v13 }
 0x2a9   :  { %v4347_v15 = vpop.eup %4346  ;;  %v7401_v4 = vadd.f32 1.0, %v4345_v14 }
 0x2aa   :  { %v1644_v50 = vmul.f32 %v4347_v15, %v1593_v40  ;;  %vm1649_vm12 = vweird.f32 %v4347_v15  ;;  %vm1653_vm10 = vcmp.eq.f32.partialorder %v1652_v57, 8.507059e+37  ;;  %v7430_v40 = vld [vmem:[#allocation17 + $0x8] sm:$0xff] }
 0x2ab   :  { %4350 = vrcp.f32 %v7401_v4  ;;  %v1357_v55 = vpop.f32.mrf.mxu1  ;;  %vm1650_vm14 = vmor %vm1648_vm8, %vm1649_vm12  ;;  %3880 = vmatmul.msk.f32.vlgmr.msrb.gmra.mxu3 %vm2198_vm0, %v7430_v40  ;;  %v1714_v30 = vand.u32 2147483648, %v7401_v4  ;;  %vm1708_vm12 = vweird.f32 %v7401_v4 }
 0x2ac   :  { %v1645_v39 = vsub.f32 1.0, %v1644_v50  ;;  %v1358_v20 = vadd.f32 %v1357_v55, %v6868_v49  ;;  %v1499_v49 = vsel %vm7412_vm15, %v7386_v6, %v1495_v42  ;;  %v1555_v42 = vadd.f32 %v7393_v8, %v1554_v36 }
 0x2ad   :  { %v1504_v6 = vsel %vm7416_vm11, %v1503_v41, %v1499_v49  ;;  %v1712_v36 = vand.u32 2147483647, %v7401_v4 }
 0x2ae   :  { %v1646_v14 = vmul.f32 %v4347_v15, %v1645_v39  ;;  %v1402_v50 = vadd.f32 %v1401_v62, %v1358_v20  ;;  %v4349_v48 = vpop.eup %4348  ;;  %v1560_v62 = vand.u32 2147483647, %v7381_v38 }
 0x2af   :  { %v1889_v61 = vmul.f32 %v4349_v48, %v1504_v6  ;;  %v1715_v6 = vor.u32 1.1754944e-38, %v1714_v30  ;;  %vm1713_vm8 = vcmp.eq.f32.partialorder %v1712_v36, 8.507059e+37 }
 0x2b0   :  { %v1647_v55 = vadd.f32 %v4347_v15, %v1646_v14  ;;  %4352 = vtanh.f32 %v1402_v50  ;;  %vm1561_vm11 = vcmp.eq.f32.partialorder %v1560_v62, 8.507059e+37 }
 0x2b1   :  { %v4351_v39 = vpop.eup %4350 }
 0x2b2   :  { %v1704_v28 = vmul.f32 %v4351_v39, %v7401_v4  ;;  %v1651_v20 = vsel %vm1650_vm14, %v4347_v15, %v1647_v55  ;;  %vm1709_vm5 = vweird.f32 %v4351_v39  ;;  %vm9189_vm14 = vcmp.lt.s32.totalorder %v5119_v16, 120 }
 0x2b3   :  { %v1656_v22 = vsel %vm1653_vm10, %v1655_v47, %v1651_v20  ;;  %v1360_v13 = vpop.f32.mrf.mxu1  ;;  %v1562_v47 = vand.u32 2147483648, %v7381_v38  ;;  %vm1710_vm15 = vmor %vm1708_vm12, %vm1709_vm5 }
 0x2b4   :  { %v1705_v14 = vsub.f32 1.0, %v1704_v28  ;;  %v1881_v32 = vmul.f32 0.0, %v1656_v22  ;;  %v1361_v15 = vadd.f32 %v1360_v13, %v6923_v60  ;;  %v7438_v57 = vpop.permute.xlu0 %2050  ;;  %v7440_v55 = vpop.permute.xlu1 %2018 }
 0x2b5   :  { %v2055_v50 = vsel %vm9186_vm6, %v7046_v2, %v7438_v57  ;;  %v1559_v2 = vsel %vm7456_vm7, %v7393_v8, %v1555_v42  ;;  %v1563_v38 = vor.u32 1.1754944e-38, %v1562_v47  ;;  %v1407_v42 = vpop.f32.mrf.mxu3  ;;  %vm9198_vm7 = vmmov %vm9189_vm14 }
 0x2b6   :  { %v1706_v49 = vmul.f32 %v4351_v39, %v1705_v14  ;;  %v7449_v41 = vadd.f32 %v1889_v61, %v1881_v32  ;;  %v2059_v60 = vmul.f32 %v7102_v17, %v2055_v50  ;;  %v1405_v28 = vadd.f32 %v1404_v33, %v1361_v15  ;;  %v7465_v17 = vld [vmem:[#allocation17 + $0x18] sm:$0xff]  ;;  %v4353_v20 = vpop.eup %4352  ;;  %v7468_v33 = vpop.permute.xlu2 %1936 }
 0x2b7   :  { %v1564_v13 = vsel %vm1561_vm11, %v1563_v38, %v1559_v2  ;;  %3881 = vmatmul.msk.f32.gmra.mxu3 %vm2198_vm0, %v7465_v17 }
 0x2b8   :  { %3681 = vst [vmem:[#allocation30 + $0x18] sm:$0xff] %v7449_v41  ;;  %v1707_v61 = vadd.f32 %v4351_v39, %v1706_v49  ;;  %2276 = vmatpush.msrb.mxu1 %v2059_v60  ;;  %v3871_v22 = vmul.f32 -1.442695, %v1405_v28  ;;  %v1893_v15 = vmul.f32 %v4353_v20, %v1564_v13  ;;  %v7494_v28 = vld [vmem:[#allocation17 + $0x28] sm:$0xff] }
 0x2b9   :  { %3689 = vst [vmem:[#allocation32 + $0x18] sm:$0xff] %v7449_v41 }
 0x2ba   :  { %v1711_v4 = vsel %vm1710_vm15, %v4351_v39, %v1707_v61  ;;  %4354 = vpow2.f32 %v3871_v22  ;;  %v2023_v39 = vsel %vm476_vm1, %v7327_v24, %v7440_v55  ;;  %v9190_v22 = vld [vmem:[#allocation68_spill] sm:$0xff] }
 0x2bb   :  { %v1716_v14 = vsel %vm1713_vm8, %v1715_v6, %v1711_v4  ;;  %v1363_v8 = vpop.f32.mrf.mxu1  ;;  %v2027_v48 = vmul.f32 %v2023_v39, %v9125_v11  ;;  %v1976_v6 = vsel %vm365_vm4, %v7376_v29, %v7396_v45  ;;  %v1960_v4 = vsel %vm9191_vm9, %v7391_v31, %v7421_v44  ;;  %vm9204_vm9 = vmmov %vm9198_vm7 }
 0x2bc   :  { %v1885_v32 = vmul.f32 0.0, %v1716_v14  ;;  %v1364_v30 = vadd.f32 %v1363_v8, %v6966_v37  ;;  %v7473_v47 = vpop.permute.xlu0 %2034  ;;  %v7475_v50 = vpop.permute.xlu1 %2002  ;;  %v1979_v14 = vmul.f32 %v1976_v6, %v9151_v56  ;;  %v7517_v8 = vld [vmem:[#allocation17 + $0x38] sm:$0xff] }
 0x2bd   :  { %v2039_v62 = vsel %vm9189_vm14, %v7145_v53, %v7473_v47  ;;  %v2007_v37 = vsel %vm439_vm2, %v7356_v23, %v7475_v50  ;;  %v1992_v23 = vsel %vm402_vm3, %v7342_v27, %v7383_v52 }
 0x2be   :  { %v7485_v36 = vadd.f32 %v1893_v15, %v1885_v32  ;;  %v2043_v49 = vmul.f32 %v2039_v62, %v9124_v0  ;;  %v1408_v60 = vadd.f32 %v1407_v42, %v1364_v30  ;;  %v2011_v61 = vmul.f32 %v2007_v37, %v9131_v25 }
 0x2bf   :  { %3882 = vmatmul.msk.f32.gmra.mxu3 %vm2198_vm0, %v7494_v28  ;;  %v1995_v38 = vmul.f32 %v1992_v23, %v9142_v18  ;;  %v1944_v42 = vsel %vm9192_vm13, %v7406_v10, %v7468_v33  ;;  %v1963_v30 = vmul.f32 %v1960_v4, %v9160_v3  ;;  %v9200_v3 = vld [vmem:[#allocation49_spill] sm:$0xff]  ;;  %vm9206_vm13 = vcmp.lt.s32.totalorder %v5119_v16, 119 }
 0x2c0   :  { %3685 = vst [vmem:[#allocation30 + $0x38] sm:$0xff] %v7485_v36  ;;  %v3875_v24 = vmul.f32 -1.442695, %v1408_v60  ;;  %2277 = vmatpush.msrb.mxu1 %v2043_v49  ;;  %v4355_v2 = vpop.eup %4354  ;;  %v1947_v49 = vmul.f32 %v1944_v42, %v9168_v21  ;;  %v7532_v60 = vld [vmem:[#allocation17] sm:$0xff]  ;;  %v2109_v56 = vmul.f32 %v7350_v26, %v9200_v3 }
 0x2c1   :  { %3693 = vst [vmem:[#allocation32 + $0x38] sm:$0xff] %v7485_v36  ;;  %v1753_v53 = vadd.f32 1.0, %v4355_v2  ;;  %3765 = dma.vmem_to_hbm [thread:$0]  %s3758_s9, 1024, %s3760_s24, [#allocation31], %s4855_s21, %s4855_s21, %s4856_s22  }
 0x2c2   :  { %4356 = vpow2.f32 %v3875_v24  ;;  %2278 = vmatpush.msrb.mxu1 %v2027_v48  ;;  %v9193_v48 = vld [vmem:[#allocation79_spill] sm:$0xff]  ;;  %v9194_v24 = vld [vmem:[#allocation69_spill] sm:$0xff] }
 0x2c3   :  { %v7498_v20 = vpop.permute.xlu2 %2036  ;;  %4358 = vrcp.f32 %v1753_v53  ;;  %v2157_v2 = vmul.f32 %v9194_v24, %v9193_v48  ;;  %v1812_v6 = vand.u32 2147483647, %v1753_v53  ;;  %vm1808_vm6 = vweird.f32 %v1753_v53 }
 0x2c4   :  { %2279 = vmatpush.msrb.mxu1 %v2011_v61  ;;  %v1814_v61 = vand.u32 2147483648, %v1753_v53 }
 0x2c5   :  { %vm1813_vm12 = vcmp.eq.f32.partialorder %v1812_v6, 8.507059e+37 }
 0x2c6   :  { %2280 = vmatpush.msrb.mxu1 %v9190_v22 }
 0x2c7   :  { %3883 = vmatmul.msk.f32.gmra.mxu3 %vm2198_vm0, %v7517_v8 }
 0x2c8   :  { %v4357_v13 = vpop.eup %4356  ;;  %2281 = vmatpush.msrb.mxu1 %v1995_v38  ;;  %v9195_v38 = vld [vmem:[#allocation83_spill] sm:$0xff] }
 0x2c9   :  { %v7523_v32 = vadd.f32 1.0, %v4357_v13  ;;  %v4359_v15 = vpop.eup %4358  ;;  %v2141_v22 = vmul.f32 %v7290_v5, %v9195_v38 }
 0x2ca   :  { %2282 = vmatpush.msrb.mxu1 %v1979_v14  ;;  %v1804_v62 = vmul.f32 %v4359_v15, %v1753_v53  ;;  %vm1809_vm10 = vweird.f32 %v4359_v15 }
 0x2cb   :  { %v7526_v39 = vpop.permute.xlu2 %1972  ;;  %4360 = vrcp.f32 %v7523_v32  ;;  %vm1810_vm5 = vmor %vm1808_vm6, %vm1809_vm10  ;;  %v1874_v18 = vand.u32 2147483648, %v7523_v32  ;;  %v1872_v6 = vand.u32 2147483647, %v7523_v32  ;;  %vm1868_vm11 = vweird.f32 %v7523_v32 }
 0x2cc   :  { %2283 = vmatpush.msrb.mxu1 %v1963_v30  ;;  %v1805_v37 = vsub.f32 1.0, %v1804_v62  ;;  %4362 = vtanh.f32 %v7449_v41  ;;  %v1815_v30 = vor.u32 1.1754944e-38, %v1814_v61  ;;  %v7543_v41 = vpop.permute.xlu1 %1986  ;;  %v9196_v62 = vld [vmem:[#allocation53_spill] sm:$0xff]  ;;  %vm9207_vm10 = vmmov %vm9198_vm7 }
 0x2cd   :  { %4364 = vtanh.f32 %v7485_v36  ;;  %v9203_v36 = vld [vmem:[#allocation56_spill] sm:$0xff]  ;;  %vm1873_vm14 = vcmp.eq.f32.partialorder %v1872_v6, 8.507059e+37  ;;  %vm9209_vm6 = vmmov %vm9206_vm13 }
 0x2ce   :  { %2284 = vmatpush.msrb.mxu1 %v1947_v49  ;;  %v1806_v23 = vmul.f32 %v4359_v15, %v1805_v37  ;;  %v9197_v49 = vunpack.i.l.bf16 %v9196_v62 }
 0x2cf   :  { %2285 = vmatmul.f32.vlgmr.msrb.gmra.mxu1 %v7532_v60 }
 0x2d0   :  { %2385 = vmatpush.msra.mxu1 %v2157_v2  ;;  %v1807_v13 = vadd.f32 %v4359_v15, %v1806_v23  ;;  %v9199_v2 = vld [vmem:[#allocation86_spill] sm:$0xff] }
 0x2d1   :  { %v4361_v4 = vpop.eup %4360  ;;  %v2125_v23 = vmul.f32 %v7312_v54, %v9199_v2  ;;  %v9201_v54 = vld [vmem:[#allocation44_spill] sm:$0xff] }
 0x2d2   :  { %v1864_v14 = vmul.f32 %v4361_v4, %v7523_v32  ;;  %2386 = vmatpush.msra.mxu1 %v2141_v22  ;;  %v1811_v24 = vsel %vm1810_vm5, %v4359_v15, %v1807_v13  ;;  %v4363_v5 = vpop.eup %4362  ;;  %v7554_v22 = vld [vmem:[#allocation17 + $0x10] sm:$0xff]  ;;  %vm1869_vm15 = vweird.f32 %v4361_v4  ;;  %v2093_v26 = vmul.f32 %v7372_v58, %v9201_v54 }
 0x2d3   :  { %v7541_v42 = vpop.permute.xlu2 %2158  ;;  %v1816_v21 = vsel %vm1813_vm12, %v1815_v30, %v1811_v24  ;;  %v9202_v13 = vmov 1.0   ;;  %vm1870_vm8 = vmor %vm1868_vm11, %vm1869_vm15  ;;  %vm9214_vm5 = vcmp.lt.s32.totalorder %v5119_v16, 9 }
 0x2d4   :  { %v2168_v37 = vsel %vm9198_vm7, %v7541_v42, %v9197_v49  ;;  %2387 = vmatpush.msra.mxu1 %v8970_v43  ;;  %v1865_v61 = vsub.f32 1.0, %v1864_v14  ;;  %v1929_v49 = vmul.f32 %v4363_v5, %v1816_v21  ;;  %v1875_v14 = vor.u32 1.1754944e-38, %v1874_v18  ;;  %vm9220_vm11 = vmmov %vm9214_vm5 }
 0x2d5   :  { %v2170_v53 = vmul.f32 %v2168_v37, %v9135_v7  ;;  %v2077_v37 = vmul.f32 %v7339_v59, %v9203_v36  ;;  %v2038_v18 = vsel %vm9204_vm9, %v7473_v47, %v7498_v20  ;;  %v9205_v59 = vld [vmem:[#allocation46_spill] sm:$0xff]  ;;  %vm9215_vm7 = vcmp.lt.s32.totalorder %v5119_v16, 8  ;;  %vm9231_vm9 = vmmov %vm9209_vm6 }
 0x2d6   :  { %2388 = vmatpush.msra.mxu1 %v2125_v23  ;;  %v1866_v15 = vmul.f32 %v4361_v4, %v1865_v61  ;;  %3673 = vst [vmem:[#allocation29 + $0x18] sm:$0xff] %v1929_v49  ;;  %v9208_v61 = vld [vmem:[#allocation72_spill] sm:$0xff]  ;;  %vm9218_vm12 = vmmov %vm9215_vm7 }
 0x2d7   :  { %2255 = vmatpush.msra.mxu0 %v2170_v53  ;;  %2288 = vmatmul.f32.gmra.mxu1 %v7554_v22  ;;  %v4365_v53 = vpop.eup %4364  ;;  %vm9219_vm15 = vmmov %vm9215_vm7 }
 0x2d8   :  { %3876 = vmatmul.msk.f32.vlgmr.msra.gmra.mxu0 %vm2198_vm0, %v7430_v40  ;;  %2389 = vmatpush.msra.mxu1 %v2109_v56  ;;  %v1867_v21 = vadd.f32 %v4361_v4, %v1866_v15  ;;  %v1977_v56 = vsel %vm365_vm4, %v7526_v39, %v7376_v29  ;;  %v7585_v29 = vld [vmem:[#allocation17 + $0x20] sm:$0xff]  ;;  %v7594_v15 = vld [vmem:[#allocation12 + $0x30] ss:$0 sm:$0xff] }
 0x2d9   :  { %2369 = vmatpush.msrb.mxu0 %v9202_v13 }
 0x2da   :  { %2390 = vmatpush.msra.mxu1 %v2093_v26  ;;  %v1871_v24 = vsel %vm1870_vm8, %v4361_v4, %v1867_v21  ;;  %v9210_v26 = vld [vmem:[#allocation48_spill] sm:$0xff]  ;;  %v7600_v21 = vld [vmem:[#allocation12 + $0x38] ss:$0 sm:$0xff]  ;;  %vm9222_vm8 = vmmov %vm9214_vm5 }
 0x2db   :  { %v1989_v30 = vpop.permute.xlu0 %1988  ;;  %v1876_v32 = vsel %vm1873_vm14, %v1875_v14, %v1871_v24  ;;  %vm9229_vm14 = vmmov %vm9209_vm6 }
 0x2dc   :  { %v1993_v58 = vsel %vm402_vm3, %v1989_v30, %v7342_v27  ;;  %v2053_v5 = vpop.permute.xlu1 %2052  ;;  %2391 = vmatpush.msra.mxu1 %v2077_v37  ;;  %v2041_v27 = vsel %vm9207_vm10, %v7498_v20, %v7162_v19  ;;  %v1933_v6 = vmul.f32 %v4365_v53, %v1876_v32  ;;  %v9211_v37 = vld [vmem:[#allocation84_spill] sm:$0xff]  ;;  %v9212_v19 = vld [vmem:[#allocation78_spill] sm:$0xff] }
 0x2dd   :  { %v1994_v4 = vmul.f32 %v1993_v58, %v9205_v59  ;;  %v2054_v23 = vsel %vm9206_vm13, %v7438_v57, %v2053_v5  ;;  %v2057_v49 = vsel %vm9209_vm6, %v2053_v5, %v9208_v61  ;;  %v1978_v57 = vmul.f32 %v1977_v56, %v9210_v26  ;;  %v7628_v61 = vld [vmem:[#allocation17 + $0x30] sm:$0xff]  ;;  %vm9233_vm13 = vmmov %vm9207_vm10 }
 0x2de   :  { %v7597_v47 = vmul.f32 %v7594_v15, %v2054_v23  ;;  %v2061_v14 = vmul.f32 %v7600_v21, %v2057_v49  ;;  %v7604_v24 = vmul.f32 %v2038_v18, %v9211_v37  ;;  %3677 = vst [vmem:[#allocation29 + $0x38] sm:$0xff] %v1933_v6  ;;  %v2045_v20 = vmul.f32 %v2041_v27, %v9212_v19 }
 0x2df   :  { %2223 = vmatpush.msrb.mxu2 %v1994_v4  ;;  %2291 = vmatmul.f32.gmra.mxu1 %v7585_v29  ;;  %v9213_v4 = vld [vmem:[#allocation77_spill] sm:$0xff] }
 0x2e0   :  { %3959 = vmatpush.msra.mxu3 %v7597_v47  ;;  %2392 = vmatpush.msra.mxu1 %v2061_v14  ;;  %v9216_v14 = vld [vmem:[#allocation51_spill] sm:$0xff] }
 0x2e1   :  { %2224 = vmatpush.msrb.mxu2 %v1978_v57  ;;  %3877 = vmatmul.msk.f32.gmra.mxu0 %vm2198_vm0, %v7465_v17 }
 0x2e2   :  { %3960 = vmatpush.msra.mxu3 %v7604_v24  ;;  %2393 = vmatpush.msra.mxu1 %v2045_v20 }
 0x2e3   :  { %v2005_v56 = vpop.permute.xlu0 %2004 }
 0x2e4   :  { %v2021_v58 = vpop.permute.xlu1 %2020  ;;  %v2006_v5 = vsel %vm439_vm2, %v7475_v50, %v2005_v56  ;;  %v2009_v32 = vsel %vm439_vm2, %v2005_v56, %v7292_v34  ;;  %v9217_v56 = vld [vmem:[#allocation54_spill] sm:$0xff] }
 0x2e5   :  { %v2022_v53 = vsel %vm476_vm1, %v7440_v55, %v2021_v58  ;;  %v2025_v18 = vsel %vm476_vm1, %v2021_v58, %v7250_v9  ;;  %v7631_v50 = vmul.f32 %v2006_v5, %v9136_v1  ;;  %v2013_v34 = vmul.f32 %v2009_v32, %v9195_v38  ;;  %v1939_v5 = vpop.permute.xlu2 %1938 }
 0x2e6   :  { %v7625_v23 = vmul.f32 %v2022_v53, %v9213_v4  ;;  %v2029_v27 = vmul.f32 %v2025_v18, %v9193_v48  ;;  %v1991_v9 = vsel %vm402_vm3, %v7383_v52, %v7543_v41  ;;  %v1990_v55 = vsel %vm402_vm3, %v7543_v41, %v1989_v30 }
 0x2e7   :  { %2294 = vmatmul.f32.gmra.mxu1 %v7628_v61  ;;  %v7647_v6 = vmul.f32 %v1991_v9, %v9145_v63  ;;  %v1997_v57 = vmul.f32 %v1990_v55, %v9199_v2  ;;  %v9223_v9 = vld [vmem:[#allocation87_spill] sm:$0xff] }
 0x2e8   :  { %3961 = vmatpush.msra.mxu3 %v7625_v23  ;;  %2394 = vmatpush.msra.mxu1 %v2029_v27 }
 0x2e9   :  { %3878 = vmatmul.msk.f32.gmra.mxu0 %vm2198_vm0, %v7494_v28 }
 0x2ea   :  { %3962 = vmatpush.msra.mxu3 %v7631_v50  ;;  %2395 = vmatpush.msra.mxu1 %v2013_v34  ;;  %v9221_v34 = vld [vmem:[#allocation47_spill] sm:$0xff] }
 0x2eb   :  { %v1941_v49 = vpop.permute.xlu0 %1940 }
 0x2ec   :  { %3963 = vmatpush.msra.mxu3 %v6822_v46  ;;  %2396 = vmatpush.msra.mxu1 %v7030_v35  ;;  %v1957_v52 = vpop.permute.xlu1 %1956  ;;  %v1945_v41 = vsel %vm9214_vm5, %v1941_v49, %v7406_v10 }
 0x2ed   :  { %v1961_v30 = vsel %vm9215_vm7, %v1957_v52, %v7391_v31  ;;  %v1946_v58 = vmul.f32 %v1945_v41, %v9217_v56 }
 0x2ee   :  { %v1962_v20 = vmul.f32 %v1961_v30, %v9216_v14  ;;  %3964 = vmatpush.msra.mxu3 %v7647_v6  ;;  %2397 = vmatpush.msra.mxu1 %v1997_v57 }
 0x2f0   :  { %2225 = vmatpush.msrb.mxu2 %v1962_v20  ;;  %v9227_v20 = vld [vmem:[#allocation60_spill] sm:$0xff] }
 0x2f1   :  { %3879 = vmatmul.msk.f32.gmra.mxu0 %vm2198_vm0, %v7517_v8 }
 0x2f2   :  { %2226 = vmatpush.msrb.mxu2 %v1946_v58  ;;  %v9228_v58 = vunpack.i.h.bf16 %v9227_v20 }
 0x2f3   :  { %2227 = vmatmul.f32.vlgmr.msrb.gmra.mxu2 %v7532_v60 }
 0x2f4   :  { %v1971_v35 = vpop.permute.xlu0 %1970  ;;  %2327 = vmatpush.msra.mxu2 %v7143_v51  ;;  %v1955_v32 = vpop.permute.xlu1 %1954 }
 0x2f5   :  { %v1974_v31 = vsel %vm365_vm4, %v1971_v35, %v7526_v39  ;;  %v1975_v10 = vsel %vm365_vm4, %v7396_v45, %v1971_v35  ;;  %v1958_v27 = vsel %vm9218_vm12, %v1955_v32, %v1957_v52  ;;  %v1959_v51 = vsel %vm9219_vm15, %v7421_v44, %v1955_v32  ;;  %v9224_v52 = vld [vmem:[#allocation88_spill] sm:$0xff] }
 0x2f6   :  { %v1980_v53 = vmul.f32 %v1975_v10, %v9152_v12  ;;  %v1981_v18 = vmul.f32 %v1974_v31, %v9200_v3  ;;  %v1943_v39 = vsel %vm9220_vm11, %v7468_v33, %v1939_v5  ;;  %2328 = vmatpush.msra.mxu2 %v9221_v34  ;;  %v1942_v45 = vsel %vm9222_vm8, %v1939_v5, %v1941_v49  ;;  %v9225_v33 = vld [vmem:[#allocation73_spill] sm:$0xff] }
 0x2f7   :  { %v1964_v55 = vmul.f32 %v1959_v51, %v9223_v9  ;;  %v1965_v57 = vmul.f32 %v1958_v27, %v9201_v54  ;;  %v1948_v41 = vmul.f32 %v1943_v39, %v9224_v52  ;;  %v1949_v44 = vmul.f32 %v1942_v45, %v9203_v36  ;;  %v9226_v49 = vld [vmem:[#allocation61_spill] sm:$0xff]  ;;  %v9234_v39 = vld [vmem:[#allocation55_spill] sm:$0xff] }
 0x2f8   :  { %3965 = vmatpush.msra.mxu3 %v1980_v53  ;;  %2398 = vmatpush.msra.mxu1 %v1981_v18  ;;  %v9232_v18 = vunpack.i.h.bf16 %v9196_v62 }
 0x2f9   :  { %2329 = vmatpush.msra.mxu2 %v8970_v43  ;;  %v9230_v43 = vld [vmem:[#allocation50_spill] sm:$0xff] }
 0x2fa   :  { %3966 = vmatpush.msra.mxu3 %v1964_v55  ;;  %2399 = vmatpush.msra.mxu1 %v1965_v57 }
 0x2fb   :  { %2330 = vmatpush.msra.mxu2 %v9225_v33 }
 0x2fc   :  { %2230 = vmatmul.f32.gmra.mxu2 %v7554_v22  ;;  %v2181_v30 = vpop.permute.xlu0 %2180  ;;  %3967 = vmatpush.msra.mxu3 %v1948_v41  ;;  %v2165_v31 = vpop.permute.xlu1 %2164 }
 0x2fd   :  { %2331 = vmatpush.msra.mxu2 %v9226_v49  ;;  %v2182_v5 = vsel %vm9229_vm14, %v9228_v58, %v2181_v30  ;;  %v2185_v35 = vsel %vm9231_vm9, %v2181_v30, %v9230_v43  ;;  %2400 = vmatpush.msra.mxu1 %v1949_v44  ;;  %v2166_v27 = vsel %vm9233_vm13, %v9232_v18, %v2165_v31 }
 0x2fe   :  { %v2188_v10 = vmul.f32 %v7594_v15, %v2182_v5  ;;  %v2189_v32 = vmul.f32 %v7600_v21, %v2185_v35  ;;  %v2169_v51 = vsel %vm9207_vm10, %v2165_v31, %v7541_v42  ;;  %2352 = vmatmul.f32.vlgmr.msra.gmra.mxu3 %v7628_v61  ;;  %v2172_v34 = vmul.f32 %v2166_v27, %v9211_v37  ;;  %v9235_v15 = vld [vmem:[#allocation57_spill] sm:$0xff] }
 0x2ff   :  { %2332 = vmatpush.msra.mxu2 %v9234_v39  ;;  %2427 = vmatpush.msrb.mxu3 %v9202_v13  ;;  %v2173_v62 = vmul.f32 %v2169_v51, %v9212_v19 }
 0x300   :  { %2370 = vmatpush.msrb.mxu0 %v2188_v10  ;;  %2401 = vmatmul.f32.vlgmr.msra.gmra.mxu1 %v7532_v60 }
 0x301   :  { %2333 = vmatpush.msra.mxu2 %v9235_v15  ;;  %2428 = vmatpush.msrb.mxu3 %v2189_v32 }
 0x302   :  { %2371 = vmatpush.msrb.mxu0 %v2172_v34  ;;  %2912 = vmatpush.msrb.mxu1 %v9202_v13 }
 0x303   :  { %2334 = vmatpush.msra.mxu2 %v7597_v47  ;;  %2429 = vmatpush.msrb.mxu3 %v2173_v62 }
 0x304   :  { %2233 = vmatmul.f32.gmra.mxu2 %v7585_v29  ;;  %3884 = vmatmul.msk.f32.vlgmr.msrb.gmra.mxu0 %vm2198_vm0, %v7430_v40 }
 0x305   :  { %2335 = vmatpush.msra.mxu2 %v7604_v24  ;;  %2883 = vmatpush.msra.mxu0 %v9202_v13 }
 0x306   :  { %3888 = vmatmul.msk.f32.vlgmr.msrb.gmra.mxu3 %vm2198_vm0, %v7430_v40 }
 0x307   :  { %2336 = vmatpush.msra.mxu2 %v7625_v23  ;;  %2941 = vmatpush.msra.mxu3 %v9202_v13 }
 0x308   :  { %2404 = vmatmul.f32.gmra.mxu1 %v7554_v22 }
 0x309   :  { %2337 = vmatpush.msra.mxu2 %v7631_v50 }
 0x30b   :  { %2338 = vmatpush.msra.mxu2 %v6822_v46 }
 0x30c   :  { %2236 = vmatmul.f32.gmra.mxu2 %v7628_v61  ;;  %3885 = vmatmul.msk.f32.gmra.mxu0 %vm2198_vm0, %v7465_v17 }
 0x30d   :  { %2339 = vmatpush.msra.mxu2 %v7647_v6 }
 0x30e   :  { %3889 = vmatmul.msk.f32.gmra.mxu3 %vm2198_vm0, %v7465_v17 }
 0x30f   :  { %2340 = vmatpush.msra.mxu2 %v1980_v53 }
 0x310   :  { %2407 = vmatmul.f32.gmra.mxu1 %v7585_v29 }
 0x311   :  { %2341 = vmatpush.msra.mxu2 %v1964_v55 }
 0x313   :  { %2342 = vmatpush.msra.mxu2 %v1948_v41 }
 0x314   :  { %2343 = vmatmul.f32.vlgmr.msra.gmra.mxu2 %v7532_v60  ;;  %3886 = vmatmul.msk.f32.gmra.mxu0 %vm2198_vm0, %v7494_v28 }
 0x315   :  { %2854 = vmatpush.msrb.mxu2 %v9202_v13 }
 0x316   :  { %3890 = vmatmul.msk.f32.gmra.mxu3 %vm2198_vm0, %v7494_v28 }
 0x318   :  { %2410 = vmatmul.f32.gmra.mxu1 %v7628_v61 }
 0x31c   :  { %2346 = vmatmul.f32.gmra.mxu2 %v7554_v22  ;;  %3887 = vmatmul.msk.f32.gmra.mxu0 %vm2198_vm0, %v7517_v8 }
 0x31e   :  { %3891 = vmatmul.msk.f32.gmra.mxu3 %vm2198_vm0, %v7517_v8 }
 0x324   :  { %2349 = vmatmul.f32.gmra.mxu2 %v7585_v29 }
 0x32e   :  { %v2315_v46 = vpop.f32.mrf.mxu3 }
 0x33a   :  { %v2318_v42 = vpop.f32.mrf.mxu3 }
 0x342   :  { %v2321_v61 = vpop.f32.mrf.mxu3 }
 0x34a   :  { %v2324_v57 = vpop.f32.mrf.mxu3 }
 0x34c   :  { %v2286_v40 = vpop.f32.mrf.mxu1 }
 0x34d   :  { %v2316_v17 = vadd.f32 %v2315_v46, %v2286_v40 }
 0x34f   :  { %v3893_v60 = vmul.f32 -1.442695, %v2316_v17 }
 0x351   :  { %4366 = vpow2.f32 %v3893_v60 }
 0x354   :  { %v2289_v47 = vpop.f32.mrf.mxu1 }
 0x355   :  { %v2319_v28 = vadd.f32 %v2318_v42, %v2289_v47  ;;  %v2257_v23 = vpop.f32.mrf.mxu0 }
 0x357   :  { %v4367_v21 = vpop.eup %4366  ;;  %v3897_v24 = vmul.f32 -1.442695, %v2319_v28 }
 0x358   :  { %v2456_v22 = vadd.f32 1.0, %v4367_v21 }
 0x359   :  { %4368 = vpow2.f32 %v3897_v24 }
 0x35a   :  { %4370 = vrcp.f32 %v2456_v22  ;;  %vm2479_vm6 = vweird.f32 %v2456_v22  ;;  %v2483_v33 = vand.u32 2147483647, %v2456_v22  ;;  %v2485_v49 = vand.u32 2147483648, %v2456_v22 }
 0x35c   :  { %v2292_v50 = vpop.f32.mrf.mxu1  ;;  %vm2484_vm12 = vcmp.eq.f32.partialorder %v2483_v33, 8.507059e+37  ;;  %v2486_v32 = vor.u32 1.1754944e-38, %v2485_v49 }
 0x35d   :  { %v2322_v41 = vadd.f32 %v2321_v61, %v2292_v50 }
 0x35e   :  { %v2260_v45 = vpop.f32.mrf.mxu0 }
 0x35f   :  { %v4369_v6 = vpop.eup %4368 }
 0x360   :  { %v4371_v8 = vpop.eup %4370  ;;  %v2532_v53 = vadd.f32 1.0, %v4369_v6 }
 0x361   :  { %v2475_v29 = vmul.f32 %v4371_v8, %v2456_v22  ;;  %vm2480_vm5 = vweird.f32 %v4371_v8 }
 0x362   :  { %4372 = vrcp.f32 %v2532_v53  ;;  %vm7749_vm7 = vmor %vm2479_vm6, %vm2480_vm5  ;;  %vm2555_vm15 = vweird.f32 %v2532_v53  ;;  %v2561_v10 = vand.u32 2147483648, %v2532_v53  ;;  %v2559_v51 = vand.u32 2147483647, %v2532_v53 }
 0x363   :  { %v2476_v55 = vsub.f32 1.0, %v2475_v29  ;;  %4374 = vtanh.f32 %v2322_v41 }
 0x364   :  { %v2295_v30 = vpop.f32.mrf.mxu1  ;;  %v2562_v15 = vor.u32 1.1754944e-38, %v2561_v10  ;;  %vm2560_vm14 = vcmp.eq.f32.partialorder %v2559_v51, 8.507059e+37 }
 0x365   :  { %v2477_v44 = vmul.f32 %v4371_v8, %v2476_v55  ;;  %v2325_v20 = vadd.f32 %v2324_v57, %v2295_v30 }
 0x366   :  { %v7755_v39 = vpop.f32.mrf.mxu0 }
 0x367   :  { %v2478_v58 = vadd.f32 %v4371_v8, %v2477_v44  ;;  %v3901_v35 = vmul.f32 -1.442695, %v2325_v20 }
 0x368   :  { %v4373_v5 = vpop.eup %4372 }
 0x369   :  { %v2551_v31 = vmul.f32 %v4373_v5, %v2532_v53  ;;  %4376 = vpow2.f32 %v3901_v35  ;;  %v2482_v27 = vsel %vm7749_vm7, %v4371_v8, %v2478_v58  ;;  %vm2556_vm11 = vweird.f32 %v4373_v5  ;;  %v4375_v62 = vpop.eup %4374 }
 0x36a   :  { %v2487_v46 = vsel %vm2484_vm12, %v2486_v32, %v2482_v27  ;;  %vm2557_vm8 = vmor %vm2555_vm15, %vm2556_vm11 }
 0x36b   :  { %v2552_v18 = vsub.f32 1.0, %v2551_v31  ;;  %v2680_v42 = vmul.f32 %v4375_v62, %v2487_v46 }
 0x36d   :  { %v2553_v34 = vmul.f32 %v4373_v5, %v2552_v18 }
 0x36e   :  { %v2266_v61 = vpop.f32.mrf.mxu0 }
 0x36f   :  { %v2554_v40 = vadd.f32 %v4373_v5, %v2553_v34  ;;  %v4377_v17 = vpop.eup %4376 }
 0x370   :  { %v2612_v47 = vadd.f32 1.0, %v4377_v17 }
 0x371   :  { %v2558_v60 = vsel %vm2557_vm8, %v4373_v5, %v2554_v40 }
 0x372   :  { %v2563_v28 = vsel %vm2560_vm14, %v2562_v15, %v2558_v60  ;;  %4378 = vrcp.f32 %v2612_v47  ;;  %v2641_v29 = vand.u32 2147483648, %v2612_v47  ;;  %vm2635_vm9 = vweird.f32 %v2612_v47 }
 0x373   :  { %v2676_v21 = vmul.f32 0.0, %v2563_v28  ;;  %v2639_v57 = vand.u32 2147483647, %v2612_v47 }
 0x374   :  { %v2642_v49 = vor.u32 1.1754944e-38, %v2641_v29 }
 0x375   :  { %v2684_v24 = vadd.f32 %v2680_v42, %v2676_v21  ;;  %vm2640_vm6 = vcmp.eq.f32.partialorder %v2639_v57, 8.507059e+37 }
 0x376   :  { %v2228_v22 = vpop.f32.mrf.mxu2 }
 0x377   :  { %v2258_v50 = vadd.f32 %v2257_v23, %v2228_v22  ;;  %3663 = vst [vmem:[#allocation26 + $0x8] sm:$0xff] %v2684_v24 }
 0x378   :  { %3667 = vst [vmem:[#allocation27 + $0x8] sm:$0xff] %v2684_v24  ;;  %v4379_v8 = vpop.eup %4378 }
 0x379   :  { %v3892_v6 = vmul.f32 -1.442695, %v2258_v50  ;;  %v2631_v53 = vmul.f32 %v4379_v8, %v2612_v47  ;;  %vm2636_vm13 = vweird.f32 %v4379_v8 }
 0x37a   :  { %vm2637_vm10 = vmor %vm2635_vm9, %vm2636_vm13 }
 0x37b   :  { %4380 = vpow2.f32 %v3892_v6  ;;  %v2632_v55 = vsub.f32 1.0, %v2631_v53 }
 0x37c   :  { %4382 = vtanh.f32 %v2684_v24 }
 0x37d   :  { %v2633_v44 = vmul.f32 %v4379_v8, %v2632_v55  ;;  %v2402_v30 = vpop.f32.mrf.mxu1 }
 0x37f   :  { %v2231_v41 = vpop.f32.mrf.mxu2  ;;  %v2634_v5 = vadd.f32 %v4379_v8, %v2633_v44 }
 0x380   :  { %v2261_v33 = vadd.f32 %v2260_v45, %v2231_v41 }
 0x381   :  { %v7757_v20 = vpop.f32.mrf.mxu3  ;;  %v2373_v23 = vpop.f32.mrf.mxu0  ;;  %v2638_v31 = vsel %vm2637_vm10, %v4379_v8, %v2634_v5 }
 0x382   :  { %v4381_v58 = vpop.eup %4380  ;;  %v3896_v43 = vmul.f32 -1.442695, %v2261_v33  ;;  %v2643_v32 = vsel %vm2640_vm6, %v2642_v49, %v2638_v31 }
 0x383   :  { %v2455_v35 = vadd.f32 1.0, %v4381_v58  ;;  %v4383_v10 = vpop.eup %4382 }
 0x384   :  { %4384 = vpow2.f32 %v3896_v43  ;;  %v7759_v18 = vmul.f32 %v4383_v10, %v2643_v32 }
 0x385   :  { %4386 = vrcp.f32 %v2455_v35  ;;  %v2405_v40 = vpop.f32.mrf.mxu1  ;;  %vm2464_vm7 = vweird.f32 %v2455_v35  ;;  %v2468_v41 = vand.u32 2147483647, %v2455_v35  ;;  %v2470_v44 = vand.u32 2147483648, %v2455_v35 }
 0x386   :  { %3659 = vst [vmem:[#allocation24 + $0x8] sm:$0xff] %v7759_v18  ;;  %2785 = vrot.lane.b32.xlu1 %v7759_v18, %s4870_s6  ;;  %2801 = vrot.lane.b32.xlu2 %v7759_v18, %s4871_s7 }
 0x387   :  { %v2234_v27 = vpop.f32.mrf.mxu2  ;;  %2817 = vrot.lane.b32.xlu0 %v7759_v18, %s4877_s27  ;;  %vm2469_vm11 = vcmp.eq.f32.partialorder %v2468_v41, 8.507059e+37  ;;  %v2471_v32 = vor.u32 1.1754944e-38, %v2470_v44 }
 0x388   :  { %v2264_v50 = vadd.f32 %v7755_v39, %v2234_v27 }
 0x389   :  { %v7768_v45 = vpop.f32.mrf.mxu0  ;;  %v2431_v51 = vpop.f32.mrf.mxu3 }
 0x38a   :  { %v4385_v34 = vpop.eup %4384  ;;  %v2432_v62 = vadd.f32 %v2431_v51, %v2402_v30 }
 0x38b   :  { %v4387_v15 = vpop.eup %4386  ;;  %v2531_v46 = vadd.f32 1.0, %v4385_v34 }
 0x38c   :  { %v2460_v17 = vmul.f32 %v4387_v15, %v2455_v35  ;;  %v3895_v60 = vmul.f32 -1.442695, %v2432_v62  ;;  %vm2465_vm5 = vweird.f32 %v4387_v15 }
 0x38d   :  { %4388 = vrcp.f32 %v2531_v46  ;;  %v2408_v30 = vpop.f32.mrf.mxu1  ;;  %vm7777_vm12 = vmor %vm2464_vm7, %vm2465_vm5  ;;  %v2546_v39 = vand.u32 2147483648, %v2531_v46  ;;  %v2544_v43 = vand.u32 2147483647, %v2531_v46  ;;  %vm2540_vm8 = vweird.f32 %v2531_v46 }
 0x38e   :  { %v2461_v42 = vsub.f32 1.0, %v2460_v17  ;;  %4390 = vpow2.f32 %v3895_v60 }
 0x38f   :  { %v2237_v47 = vpop.f32.mrf.mxu2  ;;  %2769 = vrot.lane.b32.xlu0 %v7759_v18, %s4872_s15  ;;  %v2547_v60 = vor.u32 1.1754944e-38, %v2546_v39  ;;  %vm2545_vm9 = vcmp.eq.f32.partialorder %v2544_v43, 8.507059e+37 }
 0x390   :  { %v2462_v28 = vmul.f32 %v4387_v15, %v2461_v42  ;;  %v2267_v21 = vadd.f32 %v2266_v61, %v2237_v47 }
 0x391   :  { %v7772_v24 = vpop.f32.mrf.mxu0  ;;  %v2434_v22 = vpop.f32.mrf.mxu3 }
 0x392   :  { %v3900_v6 = vmul.f32 -1.442695, %v2267_v21  ;;  %v2435_v8 = vadd.f32 %v2434_v22, %v2405_v40  ;;  %v2463_v29 = vadd.f32 %v4387_v15, %v2462_v28 }
 0x393   :  { %v4389_v53 = vpop.eup %4388 }
 0x394   :  { %v4391_v55 = vpop.eup %4390  ;;  %v2536_v57 = vmul.f32 %v4389_v53, %v2531_v46  ;;  %4392 = vpow2.f32 %v3900_v6  ;;  %v3899_v33 = vmul.f32 -1.442695, %v2435_v8  ;;  %v2467_v5 = vsel %vm7777_vm12, %v4387_v15, %v2463_v29 }
 0x395   :  { %v7775_v61 = vadd.f32 1.0, %v4391_v55  ;;  %4394 = vtanh.f32 %v2264_v50  ;;  %vm2541_vm15 = vweird.f32 %v4389_v53  ;;  %v2472_v15 = vsel %vm2469_vm11, %v2471_v32, %v2467_v5  ;;  %v2411_v55 = vpop.f32.mrf.mxu1 }
 0x396   :  { %v2537_v49 = vsub.f32 1.0, %v2536_v57  ;;  %vm2542_vm14 = vmor %vm2540_vm8, %vm2541_vm15 }
 0x397   :  { %4396 = vrcp.f32 %v7775_v61  ;;  %v2344_v31 = vpop.f32.mrf.mxu2  ;;  %vm2509_vm13 = vweird.f32 %v7775_v61 }
 0x398   :  { %v2538_v10 = vmul.f32 %v4389_v53, %v2537_v49  ;;  %4398 = vpow2.f32 %v3899_v33  ;;  %v2374_v35 = vadd.f32 %v2373_v23, %v2344_v31 }
 0x399   :  { %v2382_v27 = vpop.f32.mrf.mxu0  ;;  %v2437_v51 = vpop.f32.mrf.mxu3 }
 0x39a   :  { %v4393_v34 = vpop.eup %4392  ;;  %v2539_v62 = vadd.f32 %v4389_v53, %v2538_v10  ;;  %v3894_v40 = vmul.f32 -1.442695, %v2374_v35  ;;  %v2383_v17 = vadd.f32 %v2382_v27, %v7757_v20  ;;  %v2438_v27 = vadd.f32 %v2437_v51, %v2408_v30 }
 0x39b   :  { %v2611_v42 = vadd.f32 1.0, %v4393_v34  ;;  %v4395_v47 = vpop.eup %4394 }
 0x39c   :  { %v2543_v28 = vsel %vm2542_vm14, %v4389_v53, %v2539_v62  ;;  %4400 = vpow2.f32 %v3894_v40  ;;  %v3902_v21 = vmul.f32 -1.442695, %v2383_v17  ;;  %v2679_v46 = vmul.f32 %v4395_v47, %v2472_v15 }
 0x39d   :  { %v7785_v23 = vpop.eup %4396  ;;  %v2548_v22 = vsel %vm2545_vm9, %v2547_v60, %v2543_v28  ;;  %4402 = vrcp.f32 %v2611_v42  ;;  %v2624_v32 = vand.u32 2147483647, %v2611_v42  ;;  %v2626_v62 = vand.u32 2147483648, %v2611_v42 }
 0x39e   :  { %v4399_v50 = vpop.eup %4398  ;;  %v2675_v6 = vmul.f32 0.0, %v2548_v22  ;;  %v2505_v8 = vmul.f32 %v7785_v23, %v7775_v61  ;;  %4404 = vpow2.f32 %v3902_v21  ;;  %v2513_v17 = vand.u32 2147483647, %v7775_v61 }
 0x39f   :  { %v7789_v20 = vadd.f32 1.0, %v4399_v50  ;;  %v2347_v29 = vpop.f32.mrf.mxu2  ;;  %v2515_v47 = vand.u32 2147483648, %v7775_v61  ;;  %vm2620_vm6 = vweird.f32 %v2611_v42  ;;  %vm2510_vm5 = vweird.f32 %v7785_v23 }
 0x3a0   :  { %v2683_v57 = vadd.f32 %v2679_v46, %v2675_v6  ;;  %v2377_v53 = vadd.f32 %v7768_v45, %v2347_v29  ;;  %v2506_v41 = vsub.f32 1.0, %v2505_v8  ;;  %vm2625_vm7 = vcmp.eq.f32.partialorder %v2624_v32, 8.507059e+37  ;;  %vm7817_vm15 = vmor %vm2509_vm13, %vm2510_vm5 }
 0x3a1   :  { %4406 = vrcp.f32 %v7789_v20  ;;  %v2440_v44 = vpop.f32.mrf.mxu3  ;;  %v2627_v50 = vor.u32 1.1754944e-38, %v2626_v62  ;;  %v2591_v6 = vand.u32 2147483648, %v7789_v20  ;;  %vm2585_vm8 = vweird.f32 %v7789_v20 }
 0x3a2   :  { %v4401_v33 = vpop.eup %4400  ;;  %3662 = vst [vmem:[#allocation26] sm:$0xff] %v2683_v57  ;;  %v3898_v49 = vmul.f32 -1.442695, %v2377_v53  ;;  %v2441_v58 = vadd.f32 %v2440_v44, %v2411_v55  ;;  %v2507_v10 = vmul.f32 %v7785_v23, %v2506_v41  ;;  %vm2514_vm14 = vcmp.eq.f32.partialorder %v2513_v17, 8.507059e+37 }
 0x3a3   :  { %v4403_v39 = vpop.eup %4402  ;;  %3666 = vst [vmem:[#allocation27] sm:$0xff] %v2683_v57  ;;  %v7793_v5 = vadd.f32 1.0, %v4401_v33 }
 0x3a4   :  { %v4405_v43 = vpop.eup %4404  ;;  %v2616_v31 = vmul.f32 %v4403_v39, %v2611_v42  ;;  %4408 = vpow2.f32 %v3898_v49  ;;  %v3903_v45 = vmul.f32 -1.442695, %v2441_v58  ;;  %vm2621_vm10 = vweird.f32 %v4403_v39 }
 0x3a5   :  { %4410 = vrcp.f32 %v7793_v5  ;;  %v7798_v40 = vadd.f32 1.0, %v4405_v43  ;;  %v2508_v28 = vadd.f32 %v7785_v23, %v2507_v10  ;;  %vm2622_vm12 = vmor %vm2620_vm6, %vm2621_vm10  ;;  %v2516_v58 = vor.u32 1.1754944e-38, %v2515_v47 }
 0x3a6   :  { %v2617_v35 = vsub.f32 1.0, %v2616_v31  ;;  %4412 = vtanh.f32 %v2683_v57  ;;  %v2589_v57 = vand.u32 2147483647, %v7789_v20  ;;  %v2592_v31 = vor.u32 1.1754944e-38, %v2591_v6 }
 0x3a7   :  { %v4407_v34 = vpop.eup %4406  ;;  %4414 = vpow2.f32 %v3903_v45  ;;  %v2512_v44 = vsel %vm7817_vm15, %v7785_v23, %v2508_v28  ;;  %v2350_v23 = vpop.f32.mrf.mxu2  ;;  %vm2494_vm6 = vweird.f32 %v7793_v5 }
 0x3a8   :  { %v2618_v60 = vmul.f32 %v4403_v39, %v2617_v35  ;;  %v2581_v15 = vmul.f32 %v4407_v34, %v7789_v20  ;;  %4416 = vtanh.f32 %v2438_v27  ;;  %vm2586_vm11 = vweird.f32 %v4407_v34 }
 0x3a9   :  { %4418 = vrcp.f32 %v7798_v40  ;;  %v2517_v10 = vsel %vm2514_vm14, %v2516_v58, %v2512_v44  ;;  %vm2587_vm9 = vmor %vm2585_vm8, %vm2586_vm11  ;;  %vm2590_vm13 = vcmp.eq.f32.partialorder %v2589_v57, 8.507059e+37 }
 0x3aa   :  { %v4409_v30 = vpop.eup %4408  ;;  %v2619_v51 = vadd.f32 %v4403_v39, %v2618_v60  ;;  %v2582_v21 = vsub.f32 1.0, %v2581_v15  ;;  %v2380_v15 = vadd.f32 %v7772_v24, %v2350_v23 }
 0x3ab   :  { %v7805_v22 = vpop.eup %4410  ;;  %v7809_v46 = vadd.f32 1.0, %v4409_v30 }
 0x3ac   :  { %v2623_v42 = vsel %vm2622_vm12, %v4403_v39, %v2619_v51  ;;  %v2583_v8 = vmul.f32 %v4407_v34, %v2582_v21  ;;  %v2490_v29 = vmul.f32 %v7805_v22, %v7793_v5  ;;  %v4413_v53 = vpop.eup %4412  ;;  %vm2495_vm10 = vweird.f32 %v7805_v22 }
 0x3ad   :  { %v2628_v41 = vsel %vm2625_vm7, %v2627_v50, %v2623_v42  ;;  %4420 = vrcp.f32 %v7809_v46  ;;  %v4415_v61 = vpop.eup %4414  ;;  %v2500_v51 = vand.u32 2147483648, %v7793_v5  ;;  %v2498_v50 = vand.u32 2147483647, %v7793_v5  ;;  %vm7852_vm5 = vmor %vm2494_vm6, %vm2495_vm10 }
 0x3ae   :  { %v7826_v33 = vmul.f32 %v4413_v53, %v2628_v41  ;;  %v2491_v49 = vsub.f32 1.0, %v2490_v29  ;;  %v2584_v39 = vadd.f32 %v4407_v34, %v2583_v8  ;;  %v4417_v43 = vpop.eup %4416  ;;  %v7830_v45 = vadd.f32 1.0, %v4415_v61 }
 0x3af   :  { %v7837_v20 = vpop.eup %4418  ;;  %v2682_v60 = vmul.f32 %v4417_v43, %v2517_v10  ;;  %v2576_v24 = vand.u32 2147483648, %v7809_v46  ;;  %v2574_v42 = vand.u32 2147483647, %v7809_v46  ;;  %v2501_v53 = vor.u32 1.1754944e-38, %v2500_v51 }
 0x3b0   :  { %3658 = vst [vmem:[#allocation24] sm:$0xff] %v7826_v33  ;;  %v2492_v35 = vmul.f32 %v7805_v22, %v2491_v49  ;;  %2783 = vrot.lane.b32.xlu0 %v7826_v33, %s4870_s6  ;;  %2799 = vrot.lane.b32.xlu1 %v7826_v33, %s4871_s7  ;;  %v2588_v32 = vsel %vm2587_vm9, %v4407_v34, %v2584_v39  ;;  %4422 = vrcp.f32 %v7830_v45  ;;  %vm2570_vm12 = vweird.f32 %v7809_v46 }
 0x3b1   :  { %2815 = vrot.lane.b32.xlu2 %v7826_v33, %s4877_s27  ;;  %v2593_v27 = vsel %vm2590_vm13, %v2592_v31, %v2588_v32  ;;  %v2646_v47 = vmul.f32 %v7837_v20, %v7798_v40  ;;  %4424 = vtanh.f32 %v2380_v15  ;;  %vm2499_vm15 = vcmp.eq.f32.partialorder %v2498_v50, 8.507059e+37 }
 0x3b2   :  { %v2678_v17 = vmul.f32 0.0, %v2593_v27  ;;  %v2493_v30 = vadd.f32 %v7805_v22, %v2492_v35  ;;  %v2577_v44 = vor.u32 1.1754944e-38, %v2576_v24  ;;  %vm2575_vm8 = vcmp.eq.f32.partialorder %v2574_v42, 8.507059e+37 }
 0x3b3   :  { %v4421_v62 = vpop.eup %4420  ;;  %v2647_v29 = vsub.f32 1.0, %v2646_v47  ;;  %v2671_v61 = vand.u32 2147483648, %v7830_v45  ;;  %v2669_v10 = vand.u32 2147483647, %v7830_v45  ;;  %vm2665_vm9 = vweird.f32 %v7830_v45 }
 0x3b4   :  { %v2566_v28 = vmul.f32 %v4421_v62, %v7809_v46  ;;  %v2686_v34 = vadd.f32 %v2682_v60, %v2678_v17  ;;  %v2497_v57 = vsel %vm7852_vm5, %v7805_v22, %v2493_v30  ;;  %vm2571_vm7 = vweird.f32 %v4421_v62 }
 0x3b5   :  { %v2502_v22 = vsel %vm2499_vm15, %v2501_v53, %v2497_v57  ;;  %vm2572_vm11 = vmor %vm2570_vm12, %vm2571_vm7  ;;  %v2648_v58 = vmul.f32 %v7837_v20, %v2647_v29  ;;  %v2672_v27 = vor.u32 1.1754944e-38, %v2671_v61  ;;  %vm2651_vm10 = vweird.f32 %v7837_v20 }
 0x3b6   :  { %v2567_v21 = vsub.f32 1.0, %v2566_v28  ;;  %3665 = vst [vmem:[#allocation26 + $0x18] sm:$0xff] %v2686_v34  ;;  %v4423_v8 = vpop.eup %4422  ;;  %4426 = vtanh.f32 %v2686_v34  ;;  %vm2670_vm6 = vcmp.eq.f32.partialorder %v2669_v10, 8.507059e+37  ;;  %v2656_v47 = vand.u32 2147483648, %v7798_v40  ;;  %v9247_v10 = vld [vmem:[#allocation45_spill] sm:$0xff] }
 0x3b7   :  { %3669 = vst [vmem:[#allocation27 + $0x18] sm:$0xff] %v2686_v34  ;;  %v2661_v5 = vmul.f32 %v4423_v8, %v7830_v45  ;;  %v4425_v43 = vpop.eup %4424  ;;  %vm2666_vm14 = vweird.f32 %v4423_v8  ;;  %v2649_v60 = vadd.f32 %v7837_v20, %v2648_v58  ;;  %vm2650_vm5 = vweird.f32 %v7798_v40 }
 0x3b8   :  { %v2568_v55 = vmul.f32 %v4421_v62, %v2567_v21  ;;  %2735 = vrot.lane.b32.xlu0 %v7826_v33, %s4874_s1  ;;  %2751 = vrot.lane.b32.xlu1 %v7826_v33, %s4873_s25  ;;  %v2681_v35 = vmul.f32 %v4425_v43, %v2502_v22  ;;  %vm2667_vm13 = vmor %vm2665_vm9, %vm2666_vm14  ;;  %v2654_v45 = vand.u32 2147483647, %v7798_v40  ;;  %v2657_v51 = vor.u32 1.1754944e-38, %v2656_v47  ;;  %v9246_v43 = vld [vmem:[#allocation43_spill] sm:$0xff] }
 0x3b9   :  { %2767 = vrot.lane.b32.xlu2 %v7826_v33, %s4872_s15  ;;  %v2662_v49 = vsub.f32 1.0, %v2661_v5  ;;  %vm2652_vm7 = vmor %vm2650_vm5, %vm2651_vm10  ;;  %vm9244_vm15 = vcmp.lt.s32.totalorder %v5119_v16, 119  ;;  %vm9249_vm14 = vcmp.lt.s32.totalorder %v5119_v16, 9 }
 0x3ba   :  { %v2569_v41 = vadd.f32 %v4421_v62, %v2568_v55  ;;  %v2653_v34 = vsel %vm2652_vm7, %v7837_v20, %v2649_v60  ;;  %vm2655_vm12 = vcmp.eq.f32.partialorder %v2654_v45, 8.507059e+37  ;;  %vm9250_vm9 = vmmov %vm9244_vm15 }
 0x3bb   :  { %v2663_v31 = vmul.f32 %v4423_v8, %v2662_v49  ;;  %v2658_v50 = vsel %vm2655_vm12, %v2657_v51, %v2653_v34  ;;  %vm9258_vm12 = vmmov %vm9249_vm14 }
 0x3bc   :  { %v2573_v39 = vsel %vm2572_vm11, %v4421_v62, %v2569_v41  ;;  %v4427_v15 = vpop.eup %4426  ;;  %vm9245_vm11 = vcmp.lt.s32.totalorder %v5119_v16, 120 }
 0x3bd   :  { %v2578_v23 = vsel %vm2575_vm8, %v2577_v44, %v2573_v39  ;;  %v2664_v32 = vadd.f32 %v4423_v8, %v2663_v31  ;;  %vm9248_vm8 = vcmp.lt.s32.totalorder %v5119_v16, 8  ;;  %vm9251_vm10 = vmmov %vm9245_vm11 }
 0x3be   :  { %v2677_v46 = vmul.f32 0.0, %v2578_v23  ;;  %vm9256_vm7 = vmmov %vm9248_vm8 }
 0x3bf   :  { %v2668_v62 = vsel %vm2667_vm13, %v4423_v8, %v2664_v32  ;;  %v7930_v8 = vld [vmem:[#allocation12 + $0x20] ss:$0 sm:$0xff]  ;;  %vm2835_vm13 = vcmask 654336  }
 0x3c0   :  { %v2685_v17 = vadd.f32 %v2681_v35, %v2677_v46  ;;  %2703 = vrot.lane.b32.xlu1 %v7826_v33, %s4875_s26  ;;  %v2673_v28 = vsel %vm2670_vm6, %v2672_v27, %v2668_v62  ;;  %vm9252_vm6 = vmmov %vm9250_vm9 }
 0x3c1   :  { %2719 = vrot.lane.b32.xlu2 %v7826_v33, %s4862_s17  ;;  %v7881_v30 = vmul.f32 %v4427_v15, %v2673_v28  ;;  %vm9253_vm5 = vmmov %vm9252_vm6 }
 0x3c2   :  { %4428 = vtanh.f32 %v2685_v17  ;;  %3664 = vst [vmem:[#allocation26 + $0x10] sm:$0xff] %v2685_v17 }
 0x3c3   :  { %3668 = vst [vmem:[#allocation27 + $0x10] sm:$0xff] %v2685_v17  ;;  %2725 = vrot.lane.b32.xlu0 %v7881_v30, %s4862_s17 }
 0x3c4   :  { %3661 = vst [vmem:[#allocation24 + $0x18] sm:$0xff] %v7881_v30  ;;  %3739 = dma.vmem_to_hbm [thread:$0]  %s3735_s16, 512, %s3737_s19, [#allocation28]  }
 0x3c5   :  { %s3700_s16 = sshll.u32 %s8762_s8, 4  ;;  %s3701_s16 = int_to_ptr.hbm [resolvable:$true] %s3700_s16 }
 0x3c8   :  { %v4429_v21 = vpop.eup %4428  ;;  %2741 = vrot.lane.b32.xlu1 %v7881_v30, %s4874_s1 }
 0x3c9   :  { %v7889_v24 = vmul.f32 %v4429_v21, %v2658_v50  ;;  %2757 = vrot.lane.b32.xlu2 %v7881_v30, %s4873_s25 }
 0x3cb   :  { %3660 = vst [vmem:[#allocation24 + $0x10] sm:$0xff] %v7889_v24  ;;  %2819 = vrot.lane.b32.xlu0 %v7889_v24, %s4877_s27 }
 0x3cc   :  { %3717 = dma.vmem_to_hbm [thread:$0]  %s3713_s3, 512, %s3715_s2, [#allocation25]  }
 0x3cd   :  { %s4885_s2 = smov [#allocation32]  }
 0x3ce   :  { %s3770_s29 = sshll.u32 %s4885_s2, 4  ;;  %s3771_s29 = int_to_ptr.vmem [resolvable:$true] %s3770_s29 }
 0x3d0   :  { %2803 = vrot.lane.b32.xlu1 %v7889_v24, %s4871_s7 }
 0x3d1   :  { %2709 = vrot.lane.b32.xlu2 %v7881_v30, %s4875_s26 }
 0x3d3   :  { %2771 = vrot.lane.b32.xlu0 %v7889_v24, %s4872_s15 }
 0x3d8   :  { %2753 = vrot.lane.b32.xlu1 %v7759_v18, %s4873_s25 }
 0x3d9   :  { %2787 = vrot.lane.b32.xlu2 %v7889_v24, %s4870_s6 }
 0x3db   :  { %2721 = vrot.lane.b32.xlu0 %v7759_v18, %s4862_s17 }
 0x3e0   :  { %2705 = vrot.lane.b32.xlu1 %v7759_v18, %s4875_s26  ;;  %v2802_v40 = vpop.permute.xlu2 %2801 }
 0x3e1   :  { %2737 = vrot.lane.b32.xlu2 %v7759_v18, %s4874_s1 }
 0x3e3   :  { %2805 = vrot.lane.b32.xlu0 %v7881_v30, %s4871_s7 }
 0x3e8   :  { %2789 = vrot.lane.b32.xlu1 %v7881_v30, %s4870_s6 }
 0x3e9   :  { %2821 = vrot.lane.b32.xlu2 %v7881_v30, %s4877_s27 }
 0x3eb   :  { %2755 = vrot.lane.b32.xlu0 %v7889_v24, %s4873_s25 }
 0x3f0   :  { %2739 = vrot.lane.b32.xlu1 %v7889_v24, %s4874_s1 }
 0x3f1   :  { %2773 = vrot.lane.b32.xlu2 %v7881_v30, %s4872_s15 }
 0x3f3   :  { %2707 = vrot.lane.b32.xlu0 %v7889_v24, %s4875_s26 }
 0x3f8   :  { %v2786_v57 = vpop.permute.xlu1 %2785 }
 0x3f9   :  { %2723 = vrot.lane.b32.xlu2 %v7889_v24, %s4862_s17  ;;  %v2818_v20 = vpop.permute.xlu0 %2817 }
 0x401   :  { %v2770_v5 = vpop.permute.xlu0 %2769 }
 0x40b   :  { %v2816_v6 = vpop.permute.xlu2 %2815 }
 0x40c   :  { %v2825_v42 = vsel %vm9244_vm15, %v2816_v6, %v2818_v20  ;;  %vm9260_vm15 = vmmov %vm9251_vm10 }
 0x40d   :  { %v2827_v29 = vmul.f32 %v7930_v8, %v2825_v42 }
 0x40f   :  { %2855 = vmatpush.msrb.mxu2 %v2827_v29 }
 0x413   :  { %v7933_v55 = vpop.permute.xlu2 %2767 }
 0x414   :  { %v2777_v39 = vsel %vm439_vm2, %v7933_v55, %v2770_v5 }
 0x415   :  { %v2779_v23 = vmul.f32 %v2777_v39, %v9247_v10 }
 0x41b   :  { %v7935_v53 = vpop.permute.xlu2 %2719 }
 0x422   :  { %v7937_v41 = vpop.permute.xlu0 %2783  ;;  %v7939_v44 = vpop.permute.xlu1 %2799 }
 0x423   :  { %v2793_v49 = vsel %vm476_vm1, %v7937_v41, %v2786_v57  ;;  %v7944_v22 = vpop.permute.xlu2 %2757  ;;  %v2809_v58 = vsel %vm9245_vm11, %v7939_v44, %v2802_v40  ;;  %vm9261_vm11 = vmmov %vm9251_vm10 }
 0x424   :  { %v2811_v61 = vmul.f32 %v2809_v58, %v9135_v7  ;;  %v2795_v31 = vmul.f32 %v2793_v49, %v9246_v43  ;;  %v7985_v49 = vld [vmem:[#allocation18] sm:$0xff] }
 0x425   :  { %v7987_v58 = vld [vmem:[#allocation12 + $0x28] ss:$0 sm:$0xff] }
 0x426   :  { %2856 = vmatpush.msrb.mxu2 %v2811_v61 }
 0x428   :  { %2857 = vmatpush.msrb.mxu2 %v2795_v31 }
 0x42a   :  { %2858 = vmatpush.msrb.mxu2 %v2779_v23  ;;  %v2752_v46 = vpop.permute.xlu1 %2751  ;;  %v2736_v17 = vpop.permute.xlu0 %2735 }
 0x42b   :  { %v7955_v35 = vpop.permute.xlu2 %2709  ;;  %v2762_v32 = vsel %vm402_vm3, %v7944_v22, %v2752_v46 }
 0x42c   :  { %v2763_v27 = vmul.f32 %v2762_v32, %v9205_v59  ;;  %2859 = vmatpush.msrb.mxu2 %v7826_v33 }
 0x42e   :  { %2860 = vmatpush.msrb.mxu2 %v2763_v27 }
 0x432   :  { %v2704_v60 = vpop.permute.xlu1 %2703 }
 0x433   :  { %v7962_v62 = vpop.permute.xlu2 %2787  ;;  %v2714_v51 = vsel %vm9249_vm14, %v7955_v35, %v2704_v60  ;;  %vm9263_vm14 = vmmov %vm9256_vm7 }
 0x434   :  { %v2715_v42 = vmul.f32 %v2714_v51, %v9217_v56  ;;  %v2792_v31 = vsel %vm476_vm1, %v2786_v57, %v7962_v62 }
 0x435   :  { %v7964_v15 = vpop.permute.xlu0 %2725  ;;  %v2796_v51 = vmul.f32 %v2792_v31, %v9125_v11 }
 0x436   :  { %v2730_v28 = vsel %vm9248_vm8, %v7964_v15, %v7935_v53  ;;  %vm9262_vm8 = vmmov %vm9256_vm7 }
 0x437   :  { %v2731_v21 = vmul.f32 %v2730_v28, %v9216_v14 }
 0x43a   :  { %v7966_v47 = vpop.permute.xlu1 %2741 }
 0x43b   :  { %v7972_v45 = vpop.permute.xlu2 %2737  ;;  %v2746_v33 = vsel %vm365_vm4, %v7966_v47, %v2736_v17 }
 0x43c   :  { %v2747_v34 = vmul.f32 %v2746_v33, %v9210_v26  ;;  %v8003_v33 = vld [vmem:[#allocation12 + $0x30] ss:$0 sm:$0xff]  ;;  %v2745_v31 = vsel %vm365_vm4, %v2736_v17, %v7972_v45 }
 0x43d   :  { %v2820_v50 = vpop.permute.xlu0 %2819 }
 0x43e   :  { %2861 = vmatpush.msrb.mxu2 %v2747_v34  ;;  %v2824_v29 = vsel %vm9250_vm9, %v2818_v20, %v2820_v50  ;;  %v8006_v34 = vld [vmem:[#allocation12 + $0x38] ss:$0 sm:$0xff]  ;;  %vm9264_vm9 = vmmov %vm9258_vm12 }
 0x43f   :  { %v2828_v61 = vmul.f32 %v7987_v58, %v2824_v29 }
 0x440   :  { %2862 = vmatpush.msrb.mxu2 %v2731_v21 }
 0x441   :  { %2884 = vmatpush.msra.mxu0 %v2828_v61 }
 0x442   :  { %2863 = vmatpush.msrb.mxu2 %v2715_v42  ;;  %v2804_v39 = vpop.permute.xlu1 %2803 }
 0x443   :  { %v2822_v23 = vpop.permute.xlu2 %2821  ;;  %v2808_v32 = vsel %vm9251_vm10, %v2802_v40, %v2804_v39  ;;  %3904 = vmatmul.msk.f32.vlgmr.msrb.gmra.mxu2 %vm2835_vm13, %v7985_v49  ;;  %vm9265_vm10 = vmmov %vm9264_vm9 }
 0x444   :  { %v2823_v20 = vsel %vm9252_vm6, %v2820_v50, %v2822_v23  ;;  %v2826_v27 = vsel %vm9253_vm5, %v2822_v23, %v2816_v6  ;;  %v2812_v28 = vmul.f32 %v2808_v32, %v9124_v0  ;;  %2998 = vmatpush.msra.mxu2 %v9202_v13  ;;  %v8012_v50 = vld [vmem:[#allocation18 + $0x8] sm:$0xff]  ;;  %v9254_v23 = vld [vmem:[#allocation64_spill] sm:$0xff]  ;;  %vm9279_vm6 = vmmov %vm9261_vm11 }
 0x445   :  { %v2829_v57 = vmul.f32 %v8003_v33, %v2823_v20  ;;  %v2830_v40 = vmul.f32 %v8006_v34, %v2826_v27  ;;  %v2772_v21 = vpop.permute.xlu0 %2771  ;;  %vm9286_vm5 = vmmov %vm9279_vm6 }
 0x446   :  { %2885 = vmatpush.msra.mxu0 %v2812_v28  ;;  %v2776_v6 = vsel %vm439_vm2, %v2770_v5, %v2772_v21  ;;  %v9255_v5 = vld [vmem:[#allocation70_spill] sm:$0xff] }
 0x447   :  { %2913 = vmatpush.msrb.mxu1 %v2829_v57  ;;  %2942 = vmatpush.msra.mxu3 %v2830_v40  ;;  %v2780_v42 = vmul.f32 %v2776_v6, %v9131_v25  ;;  %v2748_v20 = vmul.f32 %v2745_v31, %v9255_v5  ;;  %v9257_v57 = vld [vmem:[#allocation71_spill] sm:$0xff] }
 0x448   :  { %2886 = vmatpush.msra.mxu0 %v2796_v51 }
 0x44a   :  { %v2754_v29 = vpop.permute.xlu1 %2753  ;;  %2887 = vmatpush.msra.mxu0 %v2780_v42 }
 0x44b   :  { %v2761_v61 = vsel %vm402_vm3, %v2752_v46, %v2754_v29  ;;  %3905 = vmatmul.msk.f32.gmra.mxu2 %vm2835_vm13, %v8012_v50  ;;  %v8028_v46 = vld [vmem:[#allocation18 + $0x10] sm:$0xff]  ;;  %v2774_v42 = vpop.permute.xlu2 %2773 }
 0x44c   :  { %v2764_v32 = vmul.f32 %v2761_v61, %v9254_v23  ;;  %2888 = vmatpush.msra.mxu0 %v7759_v18  ;;  %v9259_v18 = vld [vmem:[#allocation74_spill] sm:$0xff] }
 0x44d   :  { %v2722_v27 = vpop.permute.xlu0 %2721 }
 0x44e   :  { %2889 = vmatpush.msra.mxu0 %v2764_v32  ;;  %v2729_v28 = vsel %vm9256_vm7, %v7935_v53, %v2722_v27  ;;  %vm9287_vm7 = vmmov %vm9286_vm5 }
 0x44f   :  { %v2732_v40 = vmul.f32 %v2729_v28, %v9257_v57  ;;  %v2775_v28 = vsel %vm439_vm2, %v2772_v21, %v2774_v42 }
 0x450   :  { %2890 = vmatpush.msra.mxu0 %v2748_v20  ;;  %v2834_v20 = vld [vmem:[#allocation18 + $0x18] sm:$0xff]  ;;  %v2781_v21 = vmul.f32 %v2775_v28, %v9136_v1 }
 0x452   :  { %v2706_v51 = vpop.permute.xlu1 %2705  ;;  %2891 = vmatpush.msra.mxu0 %v2732_v40 }
 0x453   :  { %v2713_v17 = vsel %vm9258_vm12, %v2704_v60, %v2706_v51  ;;  %3906 = vmatmul.msk.f32.gmra.mxu2 %vm2835_vm13, %v8028_v46  ;;  %vm9289_vm12 = vmmov %vm9286_vm5 }
 0x454   :  { %v2716_v6 = vmul.f32 %v2713_v17, %v9259_v18  ;;  %v2778_v17 = vsel %vm439_vm2, %v2774_v42, %v7933_v55 }
 0x455   :  { %v2806_v61 = vpop.permute.xlu0 %2805  ;;  %v2782_v55 = vmul.f32 %v2778_v17, %v9195_v38 }
 0x456   :  { %2892 = vmatpush.msra.mxu0 %v2716_v6  ;;  %v2807_v53 = vsel %vm9260_vm15, %v2804_v39, %v2806_v61  ;;  %v2810_v31 = vsel %vm9261_vm11, %v2806_v61, %v7939_v44  ;;  %vm9290_vm15 = vcmp.lt.s32.totalorder %v5119_v16, 119 }
 0x457   :  { %3908 = vmatmul.msk.f32.vlgmr.msra.gmra.mxu0 %vm2835_vm13, %v7985_v49  ;;  %v2813_v60 = vmul.f32 %v2807_v53, %v9211_v37  ;;  %v2814_v32 = vmul.f32 %v2810_v31, %v9212_v19  ;;  %vm9291_vm11 = vmmov %vm9290_vm15 }
 0x458   :  { %3044 = vmatpush.msrb.mxu0 %v9202_v13 }
 0x459   :  { %2914 = vmatpush.msrb.mxu1 %v2813_v60  ;;  %2943 = vmatpush.msra.mxu3 %v2814_v32 }
 0x45a   :  { %v2790_v40 = vpop.permute.xlu1 %2789 }
 0x45b   :  { %v2791_v44 = vsel %vm476_vm1, %v7962_v62, %v2790_v40  ;;  %v2794_v39 = vsel %vm476_vm1, %v2790_v40, %v7937_v41  ;;  %3907 = vmatmul.msk.f32.gmra.mxu2 %vm2835_vm13, %v2834_v20  ;;  %v2724_v62 = vpop.permute.xlu2 %2723 }
 0x45c   :  { %v2797_v6 = vmul.f32 %v2791_v44, %v9213_v4  ;;  %v2798_v61 = vmul.f32 %v2794_v39, %v9193_v48  ;;  %v2727_v28 = vsel %vm9262_vm8, %v2724_v62, %v7964_v15  ;;  %vm9292_vm8 = vmmov %vm9286_vm5 }
 0x45d   :  { %v2756_v42 = vpop.permute.xlu0 %2755  ;;  %v2734_v15 = vmul.f32 %v2727_v28, %v9201_v54 }
 0x45e   :  { %2915 = vmatpush.msrb.mxu1 %v2797_v6  ;;  %2944 = vmatpush.msra.mxu3 %v2798_v61  ;;  %v2759_v41 = vsel %vm402_vm3, %v2756_v42, %v7944_v22  ;;  %v2760_v53 = vsel %vm402_vm3, %v2754_v29, %v2756_v42  ;;  %v2728_v22 = vsel %vm9263_vm14, %v2722_v27, %v2724_v62  ;;  %vm9293_vm14 = vmmov %vm9286_vm5 }
 0x45f   :  { %3909 = vmatmul.msk.f32.gmra.mxu0 %vm2835_vm13, %v8012_v50  ;;  %v2765_v31 = vmul.f32 %v2760_v53, %v9145_v63  ;;  %v2766_v60 = vmul.f32 %v2759_v41, %v9199_v2  ;;  %v2733_v17 = vmul.f32 %v2728_v22, %v9223_v9  ;;  %v4460_v53 = vld [vmem:[#allocation29 + $0x20] sm:$0xff] }
 0x460   :  { %2916 = vmatpush.msrb.mxu1 %v2781_v21  ;;  %2945 = vmatpush.msra.mxu3 %v2782_v55 }
 0x462   :  { %2917 = vmatpush.msrb.mxu1 %v7889_v24  ;;  %2946 = vmatpush.msra.mxu3 %v7881_v30  ;;  %v2740_v32 = vpop.permute.xlu1 %2739 }
 0x463   :  { %v2743_v29 = vsel %vm365_vm4, %v2740_v32, %v7966_v47  ;;  %v2744_v40 = vsel %vm365_vm4, %v7972_v45, %v2740_v32 }
 0x464   :  { %v2749_v24 = vmul.f32 %v2744_v40, %v9152_v12  ;;  %v2750_v30 = vmul.f32 %v2743_v29, %v9200_v3  ;;  %2918 = vmatpush.msrb.mxu1 %v2765_v31  ;;  %2947 = vmatpush.msra.mxu3 %v2766_v60  ;;  %v2980_v31 = vld [vmem:[#allocation20] sm:$0xff] }
 0x465   :  { %v2708_v27 = vpop.permute.xlu0 %2707 }
 0x466   :  { %2919 = vmatpush.msrb.mxu1 %v2749_v24  ;;  %2948 = vmatpush.msra.mxu3 %v2750_v30  ;;  %v2711_v47 = vsel %vm9264_vm9, %v2708_v27, %v7955_v35  ;;  %v2712_v45 = vsel %vm9265_vm10, %v2706_v51, %v2708_v27  ;;  %v2981_v30 = vld [vmem:[#allocation20 + $0x8] sm:$0xff]  ;;  %vm9294_vm9 = vmmov %vm9291_vm11 }
 0x467   :  { %3910 = vmatmul.msk.f32.gmra.mxu0 %vm2835_vm13, %v8028_v46  ;;  %v2717_v44 = vmul.f32 %v2712_v45, %v9224_v52  ;;  %v2718_v39 = vmul.f32 %v2711_v47, %v9203_v36  ;;  %v4463_v47 = vld [vmem:[#allocation29 + $0x8] sm:$0xff]  ;;  %vm9295_vm10 = vmmov %vm9286_vm5 }
 0x468   :  { %2920 = vmatpush.msrb.mxu1 %v2733_v17  ;;  %2949 = vmatpush.msra.mxu3 %v2734_v15  ;;  %v4462_v15 = vld [vmem:[#allocation29 + $0x28] sm:$0xff] }
 0x46a   :  { %2921 = vmatpush.msrb.mxu1 %v2717_v44  ;;  %2950 = vmatpush.msra.mxu3 %v2718_v39 }
 0x46b   :  { %3912 = vmatmul.msk.f32.vlgmr.msrb.gmra.mxu1 %vm2835_vm13, %v7985_v49  ;;  %3916 = vmatmul.msk.f32.vlgmr.msra.gmra.mxu3 %vm2835_vm13, %v7985_v49 }
 0x46c   :  { %3067 = vmatpush.msra.mxu1 %v9202_v13 }
 0x46f   :  { %3911 = vmatmul.msk.f32.gmra.mxu0 %vm2835_vm13, %v2834_v20 }
 0x473   :  { %3913 = vmatmul.msk.f32.gmra.mxu1 %vm2835_vm13, %v8012_v50  ;;  %3917 = vmatmul.msk.f32.gmra.mxu3 %vm2835_vm13, %v8012_v50 }
 0x47b   :  { %3914 = vmatmul.msk.f32.gmra.mxu1 %vm2835_vm13, %v8028_v46  ;;  %3918 = vmatmul.msk.f32.gmra.mxu3 %vm2835_vm13, %v8028_v46 }
 0x483   :  { %3915 = vmatmul.msk.f32.gmra.mxu1 %vm2835_vm13, %v2834_v20  ;;  %3919 = vmatmul.msk.f32.gmra.mxu3 %vm2835_vm13, %v2834_v20  ;;  %vm2982_vm13 = vcmask 457728   ;;  %v4461_v20 = vld [vmem:[#allocation29] sm:$0xff] }
 0x4c6   :  { %v2865_v35 = vpop.f32.mrf.mxu2 }
 0x4c7   :  { %v2964_v41 = vmax.f32 %v2865_v35, 0.0 }
 0x4ce   :  { %v2868_v49 = vpop.f32.mrf.mxu2 }
 0x4cf   :  { %v2968_v50 = vmax.f32 %v2868_v49, 0.0 }
 0x4d4   :  { %v2894_v51 = vpop.f32.mrf.mxu0 }
 0x4d5   :  { %v2965_v24 = vmax.f32 %v2894_v51, 0.0 }
 0x4d6   :  { %v2871_v6 = vpop.f32.mrf.mxu2 }
 0x4d7   :  { %v2972_v55 = vmax.f32 %v2871_v6, 0.0 }
 0x4dc   :  { %v2897_v61 = vpop.f32.mrf.mxu0 }
 0x4dd   :  { %v2969_v29 = vmax.f32 %v2897_v61, 0.0 }
 0x4de   :  { %v2874_v21 = vpop.f32.mrf.mxu2 }
 0x4df   :  { %v2976_v42 = vmax.f32 %v2874_v21, 0.0 }
 0x4e1   :  { %2999 = vmatpush.msra.mxu2 %v2976_v42  ;;  %v4464_v42 = vld [vmem:[#allocation29 + $0x30] sm:$0xff] }
 0x4e3   :  { %3000 = vmatpush.msra.mxu2 %v2972_v55 }
 0x4e4   :  { %v2900_v62 = vpop.f32.mrf.mxu0 }
 0x4e5   :  { %3001 = vmatpush.msra.mxu2 %v2968_v50  ;;  %v2973_v28 = vmax.f32 %v2900_v62, 0.0  ;;  %v4465_v62 = vld [vmem:[#allocation29 + $0x10] sm:$0xff] }
 0x4e7   :  { %3002 = vmatpush.msra.mxu2 %v2964_v41  ;;  %v4466_v41 = vld [vmem:[#allocation29 + $0x38] sm:$0xff] }
 0x4e8   :  { %v2923_v46 = vpop.f32.mrf.mxu1 }
 0x4e9   :  { %3003 = vmatpush.msra.mxu2 %v4460_v53  ;;  %v2966_v51 = vmax.f32 %v2923_v46, 0.0  ;;  %v4467_v46 = vld [vmem:[#allocation29 + $0x18] sm:$0xff] }
 0x4eb   :  { %3004 = vmatpush.msra.mxu2 %v4461_v20 }
 0x4ec   :  { %v2903_v60 = vpop.f32.mrf.mxu0  ;;  %3920 = vmatmul.msk.f32.vlgmr.msra.gmra.mxu2 %vm2982_vm13, %v2980_v31 }
 0x4ed   :  { %v2977_v32 = vmax.f32 %v2903_v60, 0.0  ;;  %3021 = vmatpush.msrb.mxu2 %v9202_v13 }
 0x4ee   :  { %v2952_v22 = vpop.f32.mrf.mxu3 }
 0x4ef   :  { %3022 = vmatpush.msrb.mxu2 %v2977_v32  ;;  %v2967_v50 = vmax.f32 %v2952_v22, 0.0 }
 0x4f0   :  { %v2926_v40 = vpop.f32.mrf.mxu1 }
 0x4f1   :  { %3023 = vmatpush.msrb.mxu2 %v2973_v28  ;;  %v2970_v49 = vmax.f32 %v2926_v40, 0.0 }
 0x4f3   :  { %3024 = vmatpush.msrb.mxu2 %v2969_v29 }
 0x4f4   :  { %3921 = vmatmul.msk.f32.gmra.mxu2 %vm2982_vm13, %v2981_v30 }
 0x4f5   :  { %3025 = vmatpush.msrb.mxu2 %v2965_v24 }
 0x4f6   :  { %v2955_v17 = vpop.f32.mrf.mxu3 }
 0x4f7   :  { %3026 = vmatpush.msrb.mxu2 %v4462_v15  ;;  %v2971_v55 = vmax.f32 %v2955_v17, 0.0 }
 0x4f8   :  { %v2929_v27 = vpop.f32.mrf.mxu1 }
 0x4f9   :  { %3027 = vmatpush.msrb.mxu2 %v4463_v47  ;;  %v2974_v39 = vmax.f32 %v2929_v27, 0.0 }
 0x4fb   :  { %3383 = vmatpush.msra.mxu2 %v9202_v13 }
 0x4fc   :  { %3922 = vmatmul.msk.f32.vlgmr.msrb.gmra.mxu2 %vm2982_vm13, %v2980_v31 }
 0x4fe   :  { %v2958_v45 = vpop.f32.mrf.mxu3 }
 0x4ff   :  { %v2975_v21 = vmax.f32 %v2958_v45, 0.0 }
 0x500   :  { %v2932_v44 = vpop.f32.mrf.mxu1 }
 0x501   :  { %v2978_v35 = vmax.f32 %v2932_v44, 0.0 }
 0x503   :  { %3045 = vmatpush.msrb.mxu0 %v2978_v35 }
 0x504   :  { %3923 = vmatmul.msk.f32.gmra.mxu2 %vm2982_vm13, %v2981_v30 }
 0x505   :  { %3046 = vmatpush.msrb.mxu0 %v2974_v39 }
 0x506   :  { %v2961_v6 = vpop.f32.mrf.mxu3 }
 0x507   :  { %v2979_v61 = vmax.f32 %v2961_v6, 0.0  ;;  %3047 = vmatpush.msrb.mxu0 %v2970_v49 }
 0x509   :  { %3048 = vmatpush.msrb.mxu0 %v2966_v51  ;;  %3068 = vmatpush.msra.mxu1 %v2979_v61 }
 0x50b   :  { %3049 = vmatpush.msrb.mxu0 %v4464_v42  ;;  %3069 = vmatpush.msra.mxu1 %v2975_v21 }
 0x50d   :  { %3050 = vmatpush.msrb.mxu0 %v4465_v62  ;;  %3070 = vmatpush.msra.mxu1 %v2971_v55 }
 0x50e   :  { %3924 = vmatmul.msk.f32.vlgmr.msrb.gmra.mxu0 %vm2982_vm13, %v2980_v31 }
 0x50f   :  { %3071 = vmatpush.msra.mxu1 %v2967_v50 }
 0x511   :  { %3072 = vmatpush.msra.mxu1 %v4466_v41 }
 0x513   :  { %3073 = vmatpush.msra.mxu1 %v4467_v46 }
 0x514   :  { %3926 = vmatmul.msk.f32.vlgmr.msra.gmra.mxu1 %vm2982_vm13, %v2980_v31 }
 0x515   :  { %3429 = vmatpush.msrb.mxu1 %v9202_v13 }
 0x516   :  { %3925 = vmatmul.msk.f32.gmra.mxu0 %vm2982_vm13, %v2981_v30 }
 0x51c   :  { %3927 = vmatmul.msk.f32.gmra.mxu1 %vm2982_vm13, %v2981_v30  ;;  %vm9296_vm13 = vmmov %vm9294_vm9 }
 0x56f   :  { %v8124_v53 = vpop.f32.mrf.mxu2 }
 0x570   :  { %3273 = vrot.lane.b32.xlu0 %v8124_v53, %s4871_s7  ;;  %3241 = vrot.lane.b32.xlu1 %v8124_v53, %s4870_s6 }
 0x571   :  { %3209 = vrot.lane.b32.xlu2 %v8124_v53, %s4872_s15 }
 0x577   :  { %v8164_v60 = vpop.f32.mrf.mxu2 }
 0x578   :  { %3305 = vrot.lane.b32.xlu0 %v8124_v53, %s4877_s27  ;;  %3113 = vrot.lane.b32.xlu1 %v8124_v53, %s4862_s17 }
 0x579   :  { %3145 = vrot.lane.b32.xlu2 %v8124_v53, %s4874_s1 }
 0x57f   :  { %v8206_v22 = vpop.f32.mrf.mxu2 }
 0x580   :  { %3177 = vrot.lane.b32.xlu0 %v8124_v53, %s4873_s25  ;;  %9268 = vst [vmem:[#allocation52_spill] sm:$0xff] %v8206_v22 }
 0x587   :  { %v8216_v40 = vpop.f32.mrf.mxu2 }
 0x588   :  { %3081 = vrot.lane.b32.xlu0 %v8124_v53, %s4875_s26 }
 0x58b   :  { %v8156_v20 = vpop.f32.mrf.mxu0 }
 0x58c   :  { %9266 = vst [vmem:[#allocation76_spill] sm:$0xff] %v8156_v20 }
 0x591   :  { %v8142_v31 = vpop.f32.mrf.mxu1 }
 0x592   :  { %3253 = vrot.lane.b32.xlu2 %v8142_v31, %s4870_s6  ;;  %3285 = vrot.lane.b32.xlu0 %v8142_v31, %s4871_s7 }
 0x593   :  { %3189 = vrot.lane.b32.xlu1 %v8142_v31, %s4873_s25  ;;  %v8198_v28 = vpop.f32.mrf.mxu0 }
 0x594   :  { %9267 = vst [vmem:[#allocation75_spill] sm:$0xff] %v8198_v28 }
 0x599   :  { %v8178_v32 = vpop.f32.mrf.mxu1 }
 0x59a   :  { %3125 = vrot.lane.b32.xlu2 %v8142_v31, %s4862_s17  ;;  %3157 = vrot.lane.b32.xlu0 %v8142_v31, %s4874_s1 }
 0x59b   :  { %3221 = vrot.lane.b32.xlu1 %v8142_v31, %s4872_s15 }
 0x5a2   :  { %3281 = vrot.lane.b32.xlu2 %v8156_v20, %s4871_s7  ;;  %3217 = vrot.lane.b32.xlu0 %v8156_v20, %s4872_s15 }
 0x5a3   :  { %3093 = vrot.lane.b32.xlu1 %v8142_v31, %s4875_s26 }
 0x5aa   :  { %3313 = vrot.lane.b32.xlu2 %v8156_v20, %s4877_s27  ;;  %3211 = vrot.lane.b32.xlu0 %v8164_v60, %s4872_s15 }
 0x5ab   :  { %3249 = vrot.lane.b32.xlu1 %v8156_v20, %s4870_s6 }
 0x5b2   :  { %3243 = vrot.lane.b32.xlu2 %v8164_v60, %s4870_s6  ;;  %3115 = vrot.lane.b32.xlu0 %v8164_v60, %s4862_s17 }
 0x5b3   :  { %3275 = vrot.lane.b32.xlu1 %v8164_v60, %s4871_s7 }
 0x5ba   :  { %3179 = vrot.lane.b32.xlu2 %v8164_v60, %s4873_s25  ;;  %3191 = vrot.lane.b32.xlu0 %v8178_v32, %s4873_s25 }
 0x5bb   :  { %3307 = vrot.lane.b32.xlu1 %v8164_v60, %s4877_s27 }
 0x5c2   :  { %3083 = vrot.lane.b32.xlu2 %v8164_v60, %s4875_s26  ;;  %3223 = vrot.lane.b32.xlu0 %v8178_v32, %s4872_s15 }
 0x5c3   :  { %3147 = vrot.lane.b32.xlu1 %v8164_v60, %s4874_s1 }
 0x5ca   :  { %3287 = vrot.lane.b32.xlu2 %v8178_v32, %s4871_s7  ;;  %3095 = vrot.lane.b32.xlu0 %v8178_v32, %s4875_s26 }
 0x5cb   :  { %3255 = vrot.lane.b32.xlu1 %v8178_v32, %s4870_s6  ;;  %v8208_v29 = vpop.permute.xlu2 %3209 }
 0x5d2   :  { %3159 = vrot.lane.b32.xlu2 %v8178_v32, %s4874_s1  ;;  %3251 = vrot.lane.b32.xlu0 %v8198_v28, %s4870_s6 }
 0x5d3   :  { %3127 = vrot.lane.b32.xlu1 %v8178_v32, %s4862_s17  ;;  %v8226_v30 = vpop.permute.xlu2 %3145 }
 0x5d4   :  { %9269 = vst [vmem:[#allocation63_spill] sm:$0xff] %v8226_v30 }
 0x5da   :  { %3319 = vrot.lane.b32.xlu2 %v8178_v32, %s4877_s27  ;;  %3213 = vrot.lane.b32.xlu0 %v8206_v22, %s4872_s15 }
 0x5db   :  { %3283 = vrot.lane.b32.xlu1 %v8198_v28, %s4871_s7 }
 0x5e2   :  { %v8218_v24 = vpop.permute.xlu0 %3273  ;;  %3219 = vrot.lane.b32.xlu2 %v8198_v28, %s4872_s15  ;;  %3247 = vrot.lane.b32.xlu0 %v8216_v40, %s4870_s6  ;;  %v8244_v47 = vpop.permute.xlu1 %3241 }
 0x5e3   :  { %3315 = vrot.lane.b32.xlu1 %v8198_v28, %s4877_s27 }
 0x5ea   :  { %v8228_v17 = vpop.permute.xlu0 %3305  ;;  %3245 = vrot.lane.b32.xlu2 %v8206_v22, %s4870_s6  ;;  %3317 = vrot.lane.b32.xlu0 %v8142_v31, %s4877_s27  ;;  %v8260_v35 = vpop.permute.xlu1 %3113 }
 0x5eb   :  { %3277 = vrot.lane.b32.xlu1 %v8206_v22, %s4871_s7  ;;  %9273 = vst [vmem:[#allocation80_spill] sm:$0xff] %v8260_v35 }
 0x5ec   :  { %v8236_v15 = vpop.permute.xlu2 %3253 }
 0x5f2   :  { %v8238_v27 = vpop.permute.xlu0 %3177  ;;  %3279 = vrot.lane.b32.xlu2 %v8216_v40, %s4871_s7  ;;  %3181 = vrot.lane.b32.xlu0 %v8206_v22, %s4873_s25  ;;  %s3725_s7 = sshll.u32 %s8764_s10, 4  ;;  %s3772_s10 = sshll.u32 %s8768_s14, 4  ;;  %s3726_s7 = int_to_ptr.hbm [resolvable:$true] %s3725_s7  ;;  %s3773_s10 = int_to_ptr.hbm [resolvable:$true] %s3772_s10 }
 0x5f3   :  { %3309 = vrot.lane.b32.xlu1 %v8206_v22, %s4877_s27 }
 0x5f4   :  { %v8248_v45 = vpop.permute.xlu2 %3125  ;;  %3778 = dma.vmem_to_hbm [thread:$0]  %s3771_s29, 1024, %s3773_s10, [#allocation31], %s4855_s21, %s4855_s21, %s4856_s22  }
 0x5f5   :  { %9270 = vst [vmem:[#allocation65_spill] sm:$0xff] %v8248_v45 }
 0x5fa   :  { %3187 = vrot.lane.b32.xlu2 %v8198_v28, %s4873_s25  ;;  %3155 = vrot.lane.b32.xlu0 %v8198_v28, %s4874_s1  ;;  %v8256_v44 = vpop.permute.xlu0 %3081 }
 0x5fb   :  { %3185 = vrot.lane.b32.xlu1 %v8156_v20, %s4873_s25  ;;  %9271 = vst [vmem:[#allocation66_spill] sm:$0xff] %v8256_v44 }
 0x5fc   :  { %v8258_v39 = vpop.permute.xlu2 %3281 }
 0x5fd   :  { %9272 = vst [vmem:[#allocation67_spill] sm:$0xff] %v8258_v39 }
 0x602   :  { %3311 = vrot.lane.b32.xlu2 %v8216_v40, %s4877_s27  ;;  %3121 = vrot.lane.b32.xlu0 %v8156_v20, %s4862_s17  ;;  %s3746_s27 = sshll.u32 %s8766_s12, 4  ;;  %s4886_s12 = smov [#allocation23]   ;;  %s3747_s27 = int_to_ptr.hbm [resolvable:$true] %s3746_s27 }
 0x603   :  { %3215 = vrot.lane.b32.xlu1 %v8216_v40, %s4872_s15  ;;  %s3723_s15 = sshll.u32 %s4883_s11, 4  ;;  %s3698_s14 = sshll.u32 %s4886_s12, 4  ;;  %s3724_s15 = int_to_ptr.vmem [resolvable:$true] %s3723_s15  ;;  %s3699_s14 = int_to_ptr.vmem [resolvable:$true] %s3698_s14 }
 0x604   :  { %v8268_v49 = vpop.permute.xlu2 %3313  ;;  %v8270_v51 = vpop.permute.xlu0 %3285  ;;  %3728 = dma.vmem_to_hbm [thread:$0]  %s3724_s15, 512, %s3726_s7, [#allocation25]  }
 0x605   :  { %v8272_v6 = vpop.permute.xlu1 %3189 }
 0x60a   :  { %3153 = vrot.lane.b32.xlu2 %v8156_v20, %s4874_s1  ;;  %3119 = vrot.lane.b32.xlu0 %v8216_v40, %s4862_s17 }
 0x60b   :  { %3149 = vrot.lane.b32.xlu1 %v8206_v22, %s4874_s1 }
 0x60c   :  { %v8280_v61 = vpop.permute.xlu2 %3243  ;;  %v8282_v21 = vpop.permute.xlu0 %3157 }
 0x60d   :  { %v8284_v55 = vpop.permute.xlu1 %3221 }
 0x612   :  { %3117 = vrot.lane.b32.xlu2 %v8206_v22, %s4862_s17  ;;  %3085 = vrot.lane.b32.xlu0 %v8206_v22, %s4875_s26 }
 0x613   :  { %3123 = vrot.lane.b32.xlu1 %v8198_v28, %s4862_s17 }
 0x614   :  { %v8292_v42 = vpop.permute.xlu2 %3179  ;;  %v8294_v50 = vpop.permute.xlu0 %3217 }
 0x615   :  { %v8300_v62 = vsel %vm439_vm2, %v8294_v50, %v8284_v55  ;;  %v8302_v41 = vpop.permute.xlu1 %3093 }
 0x616   :  { %9274 = vst [vmem:[#allocation58_spill] sm:$0xff] %v8300_v62 }
 0x617   :  { %9275 = vst [vmem:[#allocation59_spill] sm:$0xff] %v8302_v41 }
 0x61a   :  { %3151 = vrot.lane.b32.xlu2 %v8216_v40, %s4874_s1 }
 0x61b   :  { %3183 = vrot.lane.b32.xlu1 %v8216_v40, %s4873_s25  ;;  %s4884_s25 = smov [#allocation29]  }
 0x61c   :  { %v8308_v46 = vpop.permute.xlu2 %3083  ;;  %v8310_v52 = vpop.permute.xlu0 %3211  ;;  %s3744_s1 = sshll.u32 %s4884_s25, 4  ;;  %s3745_s1 = int_to_ptr.vmem [resolvable:$true] %s3744_s1 }
 0x61d   :  { %9276 = vst [vmem:[#allocation62_spill] sm:$0xff] %v8308_v46  ;;  %v3250_v9 = vpop.permute.xlu1 %3249  ;;  %3752 = dma.vmem_to_hbm [thread:$0]  %s3745_s1, 1024, %s3747_s27, [#allocation28], %s4855_s21, %s4855_s21, %s4856_s22  }
 0x61e   :  { %v8315_v12 = vsel %vm476_vm1, %v3250_v9, %v8236_v15 }
 0x61f   :  { %9277 = vst [vmem:[#allocation42_spill] sm:$0xff] %v8315_v12 }
 0x622   :  { %3091 = vrot.lane.b32.xlu2 %v8198_v28, %s4875_s26 }
 0x623   :  { %3087 = vrot.lane.b32.xlu1 %v8216_v40, %s4875_s26 }
 0x624   :  { %v8321_v63 = vpop.permute.xlu0 %3115  ;;  %v3288_v18 = vpop.permute.xlu2 %3287 }
 0x625   :  { %9278 = vst [vmem:[#allocation68_spill] sm:$0xff] %v8321_v63  ;;  %v3276_v62 = vpop.permute.xlu1 %3275 }
 0x626   :  { %v8325_v1 = vsel %vm9279_vm6, %v3288_v18, %v3276_v62  ;;  %vm9297_vm6 = vmmov %vm9294_vm9 }
 0x62b   :  { %3089 = vrot.lane.b32.xlu1 %v8156_v20, %s4875_s26 }
 0x62c   :  { %v8329_v57 = vpop.permute.xlu2 %3159  ;;  %v8331_v12 = vpop.permute.xlu0 %3191 }
 0x62d   :  { %v8333_v4 = vpop.permute.xlu1 %3307 }
 0x634   :  { %v8335_v28 = vpop.permute.xlu2 %3319  ;;  %v8337_v5 = vpop.permute.xlu0 %3223 }
 0x635   :  { %v8339_v37 = vpop.permute.xlu1 %3147 }
 0x636   :  { %9280 = vst [vmem:[#allocation79_spill] sm:$0xff] %v8339_v37  ;;  %v8345_v23 = vsel %vm365_vm4, %v8329_v57, %v8339_v37 }
 0x637   :  { %9281 = vst [vmem:[#allocation69_spill] sm:$0xff] %v8345_v23 }
 0x63c   :  { %v8347_v56 = vpop.permute.xlu2 %3219  ;;  %v8349_v20 = vpop.permute.xlu0 %3095 }
 0x63d   :  { %9282 = vst [vmem:[#allocation83_spill] sm:$0xff] %v8349_v20  ;;  %v8355_v36 = vsel %vm439_vm2, %v8347_v56, %v8337_v5  ;;  %v3256_v41 = vpop.permute.xlu1 %3255 }
 0x63e   :  { %9283 = vst [vmem:[#allocation53_spill] sm:$0xff] %v8355_v36 }
 0x644   :  { %v3246_v44 = vpop.permute.xlu2 %3245  ;;  %v3252_v46 = vpop.permute.xlu0 %3251 }
 0x645   :  { %v8359_v14 = vsel %vm476_vm1, %v3252_v46, %v3256_v41  ;;  %v8361_v54 = vpop.permute.xlu1 %3127 }
 0x646   :  { %9284 = vst [vmem:[#allocation86_spill] sm:$0xff] %v8359_v14 }
 0x647   :  { %9285 = vst [vmem:[#allocation49_spill] sm:$0xff] %v8361_v54 }
 0x64c   :  { %v3280_v37 = vpop.permute.xlu2 %3279  ;;  %v8370_v36 = vpop.permute.xlu0 %3213 }
 0x64d   :  { %v3294_v35 = vsel %vm9286_vm5, %v3276_v62, %v3280_v37  ;;  %v3284_v20 = vpop.permute.xlu1 %3283  ;;  %vm9298_vm5 = vmmov %vm9297_vm6 }
 0x64e   :  { %v3301_v45 = vmul.f32 %v3294_v35, %v9135_v7  ;;  %v8368_v63 = vsel %vm9287_vm7, %v3284_v20, %v3288_v18  ;;  %v3292_v23 = vsel %vm9289_vm12, %v3280_v37, %v3284_v20  ;;  %vm9299_vm7 = vmmov %vm9298_vm5 }
 0x64f   :  { %9288 = vst [vmem:[#allocation46_spill] sm:$0xff] %v8368_v63  ;;  %v3302_v14 = vmul.f32 %v3292_v23, %v9124_v0 }
 0x650   :  { %3347 = vmatpush.msrb.mxu3 %v3301_v45 }
 0x651   :  { %3393 = vmatpush.msra.mxu0 %v3302_v14 }
 0x654   :  { %v8375_v54 = vpop.permute.xlu2 %3187  ;;  %v3248_v62 = vpop.permute.xlu0 %3247 }
 0x655   :  { %v3316_v26 = vpop.permute.xlu1 %3315  ;;  %v3260_v14 = vsel %vm476_vm1, %v3248_v62, %v3252_v46  ;;  %v3262_v23 = vsel %vm476_vm1, %v8280_v61, %v3248_v62  ;;  %v3259_v46 = vsel %vm476_vm1, %v3246_v44, %v3250_v9  ;;  %v3261_v62 = vsel %vm476_vm1, %v8244_v47, %v3246_v44 }
 0x656   :  { %v3295_v44 = vsel %vm9295_vm10, %v8270_v51, %v8218_v24 }
 0x65c   :  { %v3312_v30 = vpop.permute.xlu2 %3311 }
 0x65d   :  { %v3324_v35 = vsel %vm9290_vm15, %v3312_v30, %v3316_v26  ;;  %v3326_v18 = vsel %vm9291_vm11, %v8333_v4, %v3312_v30  ;;  %v3278_v63 = vpop.permute.xlu1 %3277 }
 0x65e   :  { %v3333_v22 = vmul.f32 %v7930_v8, %v3326_v18  ;;  %v3334_v37 = vmul.f32 %v7987_v58, %v3324_v35  ;;  %v3291_v20 = vsel %vm9292_vm8, %v3278_v63, %v8258_v39  ;;  %v3293_v30 = vsel %vm9293_vm14, %v8218_v24, %v3278_v63  ;;  %v3318_v63 = vpop.permute.xlu0 %3317 }
 0x65f   :  { %v3297_v45 = vmul.f32 %v3293_v30, %v9135_v7  ;;  %v3298_v18 = vmul.f32 %v3291_v20, %v9124_v0  ;;  %v3269_v35 = vmul.f32 %v3262_v23, %v9246_v43  ;;  %v3270_v39 = vmul.f32 %v3260_v14, %v9125_v11  ;;  %v8428_v20 = vld [vmem:[#allocation21 + $0x8] sm:$0xff] }
 0x660   :  { %3384 = vmatpush.msra.mxu2 %v3333_v22  ;;  %3430 = vmatpush.msrb.mxu1 %v3334_v37  ;;  %v3265_v7 = vmul.f32 %v3261_v62, %v9246_v43  ;;  %v3266_v0 = vmul.f32 %v3259_v46, %v9125_v11  ;;  %v3322_v14 = vsel %vm9297_vm6, %v3316_v26, %v8335_v28  ;;  %vm9316_vm8 = vcmp.lt.s32.totalorder %v5119_v16, 9 }
 0x661   :  { %3348 = vmatpush.msrb.mxu3 %v3297_v45  ;;  %3394 = vmatpush.msra.mxu0 %v3298_v18  ;;  %v3264_v24 = vsel %vm476_vm1, %v3256_v41, %v8280_v61  ;;  %v3300_v30 = vmul.f32 %v3295_v44, %v9212_v19  ;;  %v3335_v26 = vmul.f32 %v8003_v33, %v3322_v14  ;;  %v9306_v14 = vld [vmem:[#allocation49_spill] sm:$0xff]  ;;  %vm9318_vm14 = vmmov %vm9316_vm8 }
 0x663   :  { %3349 = vmatpush.msrb.mxu3 %v3269_v35  ;;  %3395 = vmatpush.msra.mxu0 %v3270_v39  ;;  %v3304_v39 = vmul.f32 %v8325_v1, %v9212_v19  ;;  %v3263_v1 = vsel %vm476_vm1, %v8236_v15, %v8244_v47  ;;  %v3272_v19 = vmul.f32 %v3264_v24, %v9193_v48  ;;  %vm9300_vm1 = vmmov %vm9298_vm5  ;;  %v9308_v24 = vld [vmem:[#allocation65_spill] sm:$0xff] }
 0x664   :  { %v8413_v37 = vpop.permute.xlu2 %3153  ;;  %v3232_v15 = vsel %vm439_vm2, %v8337_v5, %v8310_v52  ;;  %v3268_v41 = vmul.f32 %v3263_v1, %v9193_v48  ;;  %v9311_v1 = vld [vmem:[#allocation80_spill] sm:$0xff] }
 0x665   :  { %v3310_v22 = vpop.permute.xlu1 %3309  ;;  %3350 = vmatpush.msrb.mxu3 %v3265_v7  ;;  %3396 = vmatpush.msra.mxu0 %v3266_v0  ;;  %v3240_v5 = vmul.f32 %v3232_v15, %v9195_v38  ;;  %v9314_v15 = vld [vmem:[#allocation51_spill] sm:$0xff] }
 0x666   :  { %v3323_v9 = vsel %vm9294_vm9, %v3310_v22, %v8268_v49  ;;  %v3325_v11 = vsel %vm9296_vm13, %v8228_v17, %v3310_v22  ;;  %vm9321_vm9 = vmmov %vm9316_vm8 }
 0x667   :  { %v3330_v43 = vmul.f32 %v7987_v58, %v3323_v9  ;;  %v3329_v23 = vmul.f32 %v7930_v8, %v3325_v11  ;;  %v3321_v58 = vsel %vm9298_vm5, %v8268_v49, %v3318_v63  ;;  %v3328_v8 = vsel %vm9299_vm7, %v8335_v28, %v8333_v4  ;;  %v8454_v49 = vpop.permute.xlu0 %3181  ;;  %v9301_v9 = vld [vmem:[#allocation52_spill] sm:$0xff]  ;;  %vm9338_vm5 = vmmov %vm9316_vm8 }
 0x668   :  { %v3331_v47 = vmul.f32 %v8003_v33, %v3321_v58  ;;  %v3231_v4 = vsel %vm439_vm2, %v8284_v55, %v8208_v29  ;;  %v3327_v28 = vsel %vm9300_vm1, %v3318_v63, %v8228_v17  ;;  %v3336_v33 = vmul.f32 %v8006_v34, %v3328_v8  ;;  %v8473_v55 = vld [vmem:[#allocation21 + $0x18] sm:$0xff] }
 0x669   :  { %3431 = vmatpush.msrb.mxu1 %v3330_v43  ;;  %3385 = vmatpush.msra.mxu2 %v3329_v23  ;;  %v3236_v48 = vmul.f32 %v3231_v4, %v9195_v38  ;;  %v3332_v18 = vmul.f32 %v8006_v34, %v3327_v28  ;;  %v3194_v38 = vsel %vm402_vm3, %v8375_v54, %v8331_v12  ;;  %v9317_v28 = vld [vmem:[#allocation62_spill] sm:$0xff] }
 0x66a   :  { %3930 = vmatmul.msk.f32.vlgmr.msrb.gmra.mxu1 %vm2198_vm0, %v8428_v20  ;;  %3928 = vmatmul.msk.f32.vlgmr.msra.gmra.mxu2 %vm2198_vm0, %v8428_v20  ;;  %v3229_v34 = vsel %vm439_vm2, %v8208_v29, %v8370_v36 }
 0x66b   :  { %3485 = vmatpush.msra.mxu1 %v3304_v39  ;;  %3475 = vmatpush.msrb.mxu2 %v9202_v13  ;;  %v3233_v29 = vmul.f32 %v3229_v34, %v9247_v10  ;;  %v9305_v39 = vld [vmem:[#allocation68_spill] sm:$0xff] }
 0x66c   :  { %v8469_v45 = vpop.permute.xlu2 %3117 }
 0x66d   :  { %3486 = vmatpush.msra.mxu1 %v3300_v30  ;;  %3476 = vmatpush.msrb.mxu2 %v3335_v26  ;;  %v8456_v61 = vpop.permute.xlu1 %3185 }
 0x66f   :  { %3487 = vmatpush.msra.mxu1 %v3272_v19  ;;  %3477 = vmatpush.msrb.mxu2 %v3331_v47  ;;  %v8492_v46 = vpop.permute.xlu0 %3155  ;;  %v9313_v19 = vld [vmem:[#allocation44_spill] sm:$0xff] }
 0x671   :  { %3521 = vmatpush.msra.mxu2 %v9202_v13  ;;  %3488 = vmatpush.msra.mxu1 %v3268_v41  ;;  %v3227_v13 = vsel %vm439_vm2, %v8370_v36, %v8294_v50  ;;  %v3193_v50 = vsel %vm402_vm3, %v8456_v61, %v8272_v6  ;;  %v3208_v36 = vmul.f32 %v3194_v38, %v9199_v2  ;;  %v9315_v41 = vld [vmem:[#allocation83_spill] sm:$0xff]  ;;  %v9319_v38 = vld [vmem:[#allocation66_spill] sm:$0xff] }
 0x672   :  { %3931 = vmatmul.msk.f32.gmra.mxu1 %vm2198_vm0, %v8473_v55  ;;  %3929 = vmatmul.msk.f32.gmra.mxu2 %vm2198_vm0, %v8473_v55  ;;  %v3204_v7 = vmul.f32 %v3193_v50, %v9199_v2  ;;  %v3199_v2 = vsel %vm402_vm3, %v8272_v6, %v8238_v27  ;;  %v9303_v6 = vld [vmem:[#allocation48_spill] sm:$0xff] }
 0x673   :  { %3522 = vmatpush.msra.mxu2 %v3336_v33  ;;  %3489 = vmatpush.msra.mxu1 %v3240_v5  ;;  %v3201_v44 = vmul.f32 %v3199_v2, %v9205_v59  ;;  %v3104_v33 = vsel %vm9318_vm14, %v9315_v41, %v9317_v28  ;;  %v9325_v2 = vld [vmem:[#allocation64_spill] sm:$0xff] }
 0x674   :  { %v8515_v0 = vpop.permute.xlu2 %3151 }
 0x675   :  { %3523 = vmatpush.msra.mxu2 %v3332_v18  ;;  %3490 = vmatpush.msra.mxu1 %v3236_v48  ;;  %v3216_v17 = vpop.permute.xlu1 %3215  ;;  %v4879_v48 = vmov 0  }
 0x676   :  { %v3228_v62 = vsel %vm439_vm2, %v3216_v17, %v8347_v56  ;;  %v3234_v56 = vmul.f32 %v3227_v13, %v9131_v25  ;;  %4233 = vset.pattern.permute.xlu1 %v4879_v48  ;;  %4232 = vset.pattern.permute.xlu0 %v4879_v48  ;;  %v9320_v13 = vld [vmem:[#allocation59_spill] sm:$0xff] }
 0x677   :  { %3491 = vmatpush.msra.mxu1 %v8178_v32  ;;  %v3230_v32 = vsel %vm439_vm2, %v8310_v52, %v3216_v17  ;;  %v3238_v63 = vmul.f32 %v3228_v62, %v9131_v25  ;;  %v3162_v52 = vsel %vm365_vm4, %v8492_v46, %v8329_v57  ;;  %v3200_v25 = vsel %vm402_vm3, %v8331_v12, %v8292_v42  ;;  %v8545_v11 = vpop.permute.xlu0 %3121  ;;  %v3531_v17 = vld [vmem:[#allocation14] sm:$0xff]  ;;  %v9322_v62 = vld [vmem:[#allocation56_spill] sm:$0xff] }
 0x678   :  { %v3237_v35 = vmul.f32 %v3230_v32, %v9247_v10  ;;  %v3176_v10 = vmul.f32 %v3162_v52, %v9200_v3  ;;  %v3205_v12 = vmul.f32 %v3200_v25, %v9205_v59  ;;  %vm9307_vm2 = vcmp.lt.s32.totalorder %v5119_v16, 8  ;;  %4231 = vset.pattern.permute.xlu2 %v4879_v48  ;;  %v9324_v25 = vld [vmem:[#allocation67_spill] sm:$0xff] }
 0x679   :  { %3492 = vmatpush.msra.mxu1 %v8142_v31  ;;  %3397 = vmatpush.msra.mxu0 %v3238_v63  ;;  %v3161_v31 = vsel %vm365_vm4, %v8413_v37, %v8282_v21  ;;  %vm9309_vm12 = vmmov %vm9307_vm2  ;;  %v3103_v34 = vsel %vm9321_vm9, %v9320_v13, %v9319_v38  ;;  %v3575_v50 = vsub.f32 1.0, %v3531_v17  ;;  %v3197_v52 = vsel %vm402_vm3, %v8238_v27, %v8454_v49 }
 0x67a   :  { %3351 = vmatpush.msrb.mxu3 %v3237_v35  ;;  %3932 = vmatmul.msk.f32.vlgmr.msrb.gmra.mxu2 %vm2198_vm0, %v8428_v20  ;;  %v3172_v22 = vmul.f32 %v3161_v31, %v9200_v3  ;;  %v9304_v3 = vld [vmem:[#allocation69_spill] sm:$0xff]  ;;  %v3129_v30 = vsel %vm9309_vm12, %v8545_v11, %v9308_v24  ;;  %vm9310_vm15 = vmmov %vm9307_vm2  ;;  %v9323_v35 = vld [vmem:[#allocation54_spill] sm:$0xff] }
 0x67b   :  { %3493 = vmatpush.msra.mxu1 %v3208_v36  ;;  %3398 = vmatpush.msra.mxu0 %v3234_v56  ;;  %v3173_v43 = vmul.f32 %v9304_v3, %v9303_v6  ;;  %vm9312_vm11 = vmmov %vm9307_vm2  ;;  %v3140_v5 = vmul.f32 %v3129_v30, %v9313_v19  ;;  %v3109_v63 = vmul.f32 %v3104_v33, %v9323_v35  ;;  %v8600_v31 = vld [vmem:[#allocation21] sm:$0xff]  ;;  %v9337_v33 = vld [vmem:[#allocation53_spill] sm:$0xff] }
 0x67c   :  { %3352 = vmatpush.msrb.mxu3 %v3233_v29  ;;  %v8553_v23 = vpop.permute.xlu2 %3091  ;;  %v3135_v26 = vsel %vm9312_vm11, %v9308_v24, %v9311_v1  ;;  %3559 = vperm.xlu2 %4231, %v3531_v17   ;;  %v3105_v56 = vmul.f32 %v3103_v34, %v9323_v35  ;;  %vm9332_vm13 = vmmov %vm9307_vm2  ;;  %v9341_v34 = vld [vmem:[#allocation74_spill] sm:$0xff] }
 0x67d   :  { %3494 = vmatpush.msra.mxu1 %v3204_v7  ;;  %v8526_v57 = vpop.permute.xlu1 %3149  ;;  %3399 = vmatpush.msra.mxu0 %v8216_v40  ;;  %v3098_v4 = vsel %vm9316_vm8, %v8553_v23, %v9315_v41  ;;  %v3137_v18 = vmul.f32 %v3135_v26, %v9314_v15  ;;  %v9333_v26 = vld [vmem:[#allocation42_spill] sm:$0xff]  ;;  %vm9334_vm6 = vmmov %vm9307_vm2 }
 0x67e   :  { %3353 = vmatpush.msrb.mxu3 %v8164_v60  ;;  %v9302_v60 = vld [vmem:[#allocation63_spill] sm:$0xff]  ;;  %v3112_v32 = vmul.f32 %v3098_v4, %v9322_v62  ;;  %3579 = vperm.xlu1 %4233, %v3575_v50   ;;  %v9336_v4 = vld [vmem:[#allocation81_spill] sm:$0xff]  ;;  %vm9348_vm1 = vmmov %vm9307_vm2 }
 0x67f   :  { %3495 = vmatpush.msra.mxu1 %v3176_v10  ;;  %3400 = vmatpush.msra.mxu0 %v9301_v9  ;;  %v3167_v40 = vsel %vm365_vm4, %v8282_v21, %v9302_v60  ;;  %v8590_v36 = vpop.permute.xlu0 %3119  ;;  %v3289_v10 = vsel %vm9295_vm10, %v9324_v25, %v8270_v51  ;;  %v9327_v9 = vld [vmem:[#allocation46_spill] sm:$0xff]  ;;  %v3165_v51 = vsel %vm365_vm4, %v9302_v60, %v8526_v57 }
 0x680   :  { %3354 = vmatpush.msrb.mxu3 %v8124_v53  ;;  %v3136_v53 = vsel %vm9307_vm2, %v9306_v14, %v9305_v39  ;;  %v3169_v21 = vmul.f32 %v3167_v40, %v9303_v6  ;;  %v3202_v40 = vmul.f32 %v3197_v52, %v9325_v2  ;;  %v3134_v30 = vsel %vm9332_vm13, %v9305_v39, %v8590_v36  ;;  %v9335_v39 = vld [vmem:[#allocation71_spill] sm:$0xff] }
 0x681   :  { %3496 = vmatpush.msra.mxu1 %v3172_v22  ;;  %v3141_v47 = vmul.f32 %v3136_v53, %v9314_v15  ;;  %v9330_v53 = vld [vmem:[#allocation77_spill] sm:$0xff]  ;;  %v3339_v15 = vld [vmem:[#allocation21 + $0x10] sm:$0xff] }
 0x682   :  { %3355 = vmatpush.msrb.mxu3 %v3205_v12  ;;  %3933 = vmatmul.msk.f32.gmra.mxu2 %vm2198_vm0, %v8473_v55  ;;  %v9326_v12 = vld [vmem:[#allocation84_spill] sm:$0xff] }
 0x683   :  { %v3303_v27 = vmul.f32 %v9327_v9, %v9326_v12  ;;  %v3299_v6 = vmul.f32 %v3289_v10, %v9326_v12  ;;  %v9345_v10 = vld [vmem:[#allocation76_spill] sm:$0xff] }
 0x684   :  { %3356 = vmatpush.msrb.mxu3 %v3201_v44  ;;  %v9328_v44 = vld [vmem:[#allocation79_spill] sm:$0xff] }
 0x685   :  { %v8555_v59 = vpop.permute.xlu1 %3123 }
 0x686   :  { %3357 = vmatpush.msrb.mxu3 %v3173_v43  ;;  %v3130_v58 = vsel %vm9310_vm15, %v8555_v59, %v9306_v14  ;;  %v9329_v43 = vld [vmem:[#allocation70_spill] sm:$0xff] }
 0x687   :  { %v3144_v8 = vmul.f32 %v3130_v58, %v9313_v19  ;;  %v3170_v58 = vmul.f32 %v3165_v51, %v9329_v43  ;;  %v3267_v19 = vmul.f32 %v9333_v26, %v9330_v53  ;;  %v3086_v41 = vpop.permute.xlu0 %3085 }
 0x688   :  { %3358 = vmatpush.msrb.mxu3 %v3169_v21  ;;  %v9331_v21 = vld [vmem:[#allocation86_spill] sm:$0xff] }
 0x689   :  { %3497 = vmatpush.msra.mxu1 %v3144_v8  ;;  %v3271_v24 = vmul.f32 %v9331_v21, %v9330_v53  ;;  %v3133_v8 = vsel %vm9334_vm6, %v9311_v1, %v8469_v45  ;;  %v9339_v1 = vld [vmem:[#allocation58_spill] sm:$0xff] }
 0x68a   :  { %3359 = vmatpush.msrb.mxu3 %v3141_v47  ;;  %3934 = vmatmul.msk.f32.vlgmr.msra.gmra.mxu2 %vm2198_vm0, %v8428_v20  ;;  %v3532_v20 = vld [vmem:[#allocation14 + $0x8] sm:$0xff]  ;;  %v3142_v47 = vmul.f32 %v3134_v30, %v9335_v39  ;;  %v3235_v17 = vmul.f32 %v9339_v1, %v9336_v4 }
 0x68b   :  { %3498 = vmatpush.msra.mxu1 %v3140_v5  ;;  %v3576_v3 = vsub.f32 1.0, %v3532_v20  ;;  %3564 = vperm.xlu0 %4232, %v3532_v20   ;;  %v3239_v5 = vmul.f32 %v9337_v33, %v9336_v4 }
 0x68c   :  { %3360 = vmatpush.msrb.mxu3 %v3137_v18  ;;  %v3138_v18 = vmul.f32 %v3133_v8, %v9335_v39 }
 0x68d   :  { %3499 = vmatpush.msra.mxu1 %v3112_v32  ;;  %v3184_v29 = vpop.permute.xlu1 %3183  ;;  %3584 = vperm.xlu2 %4231, %v3576_v3  }
 0x68e   :  { %3361 = vmatpush.msrb.mxu3 %v3109_v63  ;;  %v3198_v7 = vsel %vm402_vm3, %v8292_v42, %v3184_v29  ;;  %v3166_v42 = vsel %vm365_vm4, %v9328_v44, %v8515_v0  ;;  %v9342_v63 = vld [vmem:[#allocation75_spill] sm:$0xff] }
 0x68f   :  { %v3206_v22 = vmul.f32 %v3198_v7, %v9325_v2  ;;  %v3174_v14 = vmul.f32 %v3166_v42, %v9329_v43  ;;  %v9344_v7 = vld [vmem:[#allocation82_spill] sm:$0xff]  ;;  %v9349_v2 = vld [vmem:[#allocation87_spill] sm:$0xff] }
 0x690   :  { %3362 = vmatpush.msrb.mxu3 %v3105_v56 }
 0x691   :  { %3363 = vmatmul.f32.vlgmr.msrb.gmra.mxu3 %v8600_v31  ;;  %3401 = vmatpush.msra.mxu0 %v3206_v22 }
 0x692   :  { %3439 = vmatpush.msra.mxu3 %v3303_v27  ;;  %3935 = vmatmul.msk.f32.gmra.mxu2 %vm2198_vm0, %v8473_v55  ;;  %vm9340_vm0 = vmmov %vm9338_vm5 }
 0x693   :  { %3402 = vmatpush.msra.mxu0 %v3202_v40  ;;  %v3101_v55 = vsel %vm9340_vm0, %v9319_v38, %v3086_v41  ;;  %vm9343_vm7 = vmmov %vm9340_vm0  ;;  %v3195_v38 = vsel %vm402_vm3, %v8454_v49, %v8456_v61  ;;  %v3163_v49 = vsel %vm365_vm4, %v8526_v57, %v8413_v37  ;;  %v9346_v61 = vld [vmem:[#allocation85_spill] sm:$0xff] }
 0x694   :  { %3440 = vmatpush.msra.mxu3 %v3299_v6  ;;  %v3106_v50 = vmul.f32 %v3101_v55, %v9341_v34  ;;  %v4468_v6 = vld [vmem:[#allocation9] sm:$0xff] }
 0x695   :  { %3403 = vmatpush.msra.mxu0 %v3174_v14  ;;  %v3088_v60 = vpop.permute.xlu1 %3087 }
 0x696   :  { %3441 = vmatpush.msra.mxu3 %v3271_v24  ;;  %v3102_v48 = vsel %vm9338_vm5, %v9317_v28, %v3088_v60  ;;  %v3196_v28 = vsel %vm402_vm3, %v3184_v29, %v8375_v54  ;;  %v3164_v54 = vsel %vm365_vm4, %v8515_v0, %v8492_v46  ;;  %vm9347_vm3 = vmmov %vm9307_vm2  ;;  %v3171_v46 = vmul.f32 %v3163_v49, %v9346_v61 }
 0x697   :  { %3404 = vmatpush.msra.mxu0 %v3170_v58  ;;  %v3110_v32 = vmul.f32 %v3102_v48, %v9341_v34  ;;  %v3207_v25 = vmul.f32 %v3196_v28, %v9344_v7  ;;  %v3132_v29 = vsel %vm9347_vm3, %v8590_v36, %v8555_v59  ;;  %v3131_v0 = vsel %vm9348_vm1, %v8469_v45, %v8545_v11  ;;  %vm9350_vm4 = vmmov %vm9340_vm0  ;;  %v9352_v36 = vld [vmem:[#allocation88_spill] sm:$0xff]  ;;  %v4471_v34 = vld [vmem:[#allocation9 + $0x18] sm:$0xff] }
 0x698   :  { %3442 = vmatpush.msra.mxu3 %v3267_v19  ;;  %v3143_v22 = vmul.f32 %v3132_v29, %v9349_v2  ;;  %v3100_v37 = vsel %vm9350_vm4, %v3088_v60, %v8553_v23  ;;  %v3139_v57 = vmul.f32 %v3131_v0, %v9349_v2  ;;  %vm9351_vm2 = vmmov %vm9340_vm0 }
 0x699   :  { %3366 = vmatmul.f32.gmra.mxu3 %v3339_v15  ;;  %3405 = vmatpush.msra.mxu0 %v3142_v47  ;;  %v3111_v12 = vmul.f32 %v3100_v37, %v9352_v36  ;;  %v4469_v47 = vld [vmem:[#allocation9 + $0x20] sm:$0xff]  ;;  %v4473_v37 = vld [vmem:[#allocation9 + $0x38] sm:$0xff] }
 0x69a   :  { %3443 = vmatpush.msra.mxu3 %v3239_v5  ;;  %v4470_v5 = vld [vmem:[#allocation9 + $0x8] sm:$0xff] }
 0x69b   :  { %3406 = vmatpush.msra.mxu0 %v3138_v18 }
 0x69c   :  { %3444 = vmatpush.msra.mxu3 %v3235_v17 }
 0x69d   :  { %3407 = vmatpush.msra.mxu0 %v3110_v32  ;;  %v3090_v35 = vpop.permute.xlu1 %3089 }
 0x69e   :  { %3445 = vmatpush.msra.mxu3 %v9342_v63  ;;  %v3097_v56 = vsel %vm9343_vm7, %v3090_v35, %v9320_v13  ;;  %v3203_v13 = vmul.f32 %v3195_v38, %v9344_v7  ;;  %v3099_v59 = vsel %vm9351_vm2, %v3086_v41, %v3090_v35 }
 0x69f   :  { %v3108_v52 = vmul.f32 %v3097_v56, %v9322_v62  ;;  %3408 = vmatpush.msra.mxu0 %v3106_v50  ;;  %v3175_v62 = vmul.f32 %v3164_v54, %v9346_v61  ;;  %v3107_v45 = vmul.f32 %v3099_v59, %v9352_v36 }
 0x6a0   :  { %3446 = vmatpush.msra.mxu3 %v9345_v10  ;;  %3409 = vmatmul.f32.vlgmr.msra.gmra.mxu0 %v8600_v31 }
 0x6a1   :  { %3500 = vmatpush.msra.mxu1 %v3108_v52 }
 0x6a2   :  { %3447 = vmatpush.msra.mxu3 %v3207_v25  ;;  %3501 = vmatmul.f32.vlgmr.msra.gmra.mxu1 %v8600_v31 }
 0x6a4   :  { %3448 = vmatpush.msra.mxu3 %v3203_v13 }
 0x6a6   :  { %3449 = vmatpush.msra.mxu3 %v3175_v62  ;;  %v4472_v62 = vld [vmem:[#allocation9 + $0x28] sm:$0xff] }
 0x6a8   :  { %3450 = vmatpush.msra.mxu3 %v3171_v46  ;;  %3412 = vmatmul.f32.gmra.mxu0 %v3339_v15 }
 0x6aa   :  { %3451 = vmatpush.msra.mxu3 %v3143_v22  ;;  %3504 = vmatmul.f32.gmra.mxu1 %v3339_v15 }
 0x6ac   :  { %3452 = vmatpush.msra.mxu3 %v3139_v57 }
 0x6ae   :  { %3453 = vmatpush.msra.mxu3 %v3111_v12 }
 0x6b0   :  { %3454 = vmatpush.msra.mxu3 %v3107_v45 }
 0x6b1   :  { %3455 = vmatmul.f32.vlgmr.msra.gmra.mxu3 %v8600_v31 }
 0x6b9   :  { %3458 = vmatmul.f32.gmra.mxu3 %v3339_v15 }
 0x6d6   :  { %v8728_v20 = vpop.permute.xlu2 %3559 }
 0x6e7   :  { %v3433_v31 = vpop.f32.mrf.mxu1  ;;  %v8734_v4 = vpop.permute.xlu2 %3584 }
 0x6ed   :  { %v3387_v16 = vpop.f32.mrf.mxu2 }
 0x6ef   :  { %v3436_v42 = vpop.f32.mrf.mxu1 }
 0x6f0   :  { %v8730_v3 = vpop.permute.xlu1 %3579 }
 0x6f5   :  { %v3390_v11 = vpop.f32.mrf.mxu2 }
 0x6fd   :  { %v8724_v23 = vpop.f32.mrf.mxu2  ;;  %v3565_v33 = vpop.permute.xlu0 %3564 }
 0x705   :  { %v8726_v9 = vpop.f32.mrf.mxu2 }
 0x70d   :  { %v3525_v14 = vpop.f32.mrf.mxu2 }
 0x714   :  { %v3364_v27 = vpop.f32.mrf.mxu3 }
 0x715   :  { %v3388_v44 = vadd.f32 %v3387_v16, %v3364_v27  ;;  %v3528_v63 = vpop.f32.mrf.mxu2 }
 0x717   :  { %v3533_v40 = vmul.f32 0.05, %v3388_v44 }
 0x719   :  { %v3541_v51 = vadd.f32 %v4468_v6, %v3533_v40 }
 0x71b   :  { %v3549_v43 = vand.u32 2147483647, %v3541_v51  ;;  %v3587_v30 = vmul.f32 %v8730_v3, %v3541_v51 }
 0x71c   :  { %v3367_v53 = vpop.f32.mrf.mxu3 }
 0x71d   :  { %v3567_v21 = vmul.f32 %v8728_v20, %v3549_v43  ;;  %v3391_v24 = vadd.f32 %v3390_v11, %v3367_v53  ;;  %v3410_v58 = vpop.f32.mrf.mxu0 }
 0x71e   :  { %v3434_v60 = vadd.f32 %v3433_v31, %v3410_v58 }
 0x71f   :  { %v3537_v26 = vmul.f32 0.05, %v3391_v24  ;;  %v3595_v19 = vadd.f32 %v3587_v30, %v3567_v21  ;;  %v3502_v8 = vpop.f32.mrf.mxu1  ;;  %v4475_v30 = vld [vmem:[#allocation9 + $0x30] sm:$0xff] }
 0x720   :  { %v3534_v15 = vmul.f32 0.05, %v3434_v60  ;;  %v3526_v39 = vadd.f32 %v3525_v14, %v3502_v8 }
 0x721   :  { %v3545_v41 = vadd.f32 %v4469_v47, %v3537_v26  ;;  %3611 = vst [vmem:[#allocation23] sm:$0xff] %v3595_v19 }
 0x722   :  { %v3542_v48 = vadd.f32 %v4470_v5, %v3534_v15  ;;  %v3536_v18 = vmul.f32 0.05, %v3526_v39 }
 0x723   :  { %v3553_v1 = vand.u32 2147483647, %v3545_v41  ;;  %v3591_v50 = vmul.f32 %v8734_v4, %v3545_v41 }
 0x724   :  { %v3550_v17 = vand.u32 2147483647, %v3542_v48  ;;  %v3588_v55 = vmul.f32 %v8730_v3, %v3542_v48  ;;  %v3544_v32 = vadd.f32 %v4471_v34, %v3536_v18 }
 0x725   :  { %v3571_v28 = vmul.f32 %v3565_v33, %v3553_v1  ;;  %v3413_v35 = vpop.f32.mrf.mxu0 }
 0x726   :  { %v3568_v56 = vmul.f32 %v8728_v20, %v3550_v17  ;;  %v3437_v38 = vadd.f32 %v3436_v42, %v3413_v35  ;;  %v3552_v52 = vand.u32 2147483647, %v3544_v32  ;;  %v3590_v7 = vmul.f32 %v8730_v3, %v3544_v32  ;;  %v4474_v42 = vld [vmem:[#allocation9 + $0x10] sm:$0xff] }
 0x727   :  { %v3599_v25 = vadd.f32 %v3591_v50, %v3571_v28  ;;  %v3505_v10 = vpop.f32.mrf.mxu1 }
 0x728   :  { %v3596_v54 = vadd.f32 %v3588_v55, %v3568_v56  ;;  %v3538_v13 = vmul.f32 0.05, %v3437_v38  ;;  %v3570_v49 = vmul.f32 %v8728_v20, %v3552_v52  ;;  %v3529_v61 = vadd.f32 %v3528_v63, %v3505_v10 }
 0x729   :  { %3615 = vst [vmem:[#allocation23 + $0x20] sm:$0xff] %v3599_v25 }
 0x72a   :  { %3612 = vst [vmem:[#allocation23 + $0x8] sm:$0xff] %v3596_v54  ;;  %v3546_v29 = vadd.f32 %v4472_v62, %v3538_v13  ;;  %v3598_v46 = vadd.f32 %v3590_v7, %v3570_v49  ;;  %v3540_v0 = vmul.f32 0.05, %v3529_v61 }
 0x72c   :  { %v3554_v2 = vand.u32 2147483647, %v3546_v29  ;;  %v3592_v22 = vmul.f32 %v8734_v4, %v3546_v29  ;;  %3614 = vst [vmem:[#allocation23 + $0x18] sm:$0xff] %v3598_v46  ;;  %v3548_v57 = vadd.f32 %v4473_v37, %v3540_v0 }
 0x72e   :  { %v3572_v59 = vmul.f32 %v3565_v33, %v3554_v2  ;;  %v3556_v36 = vand.u32 2147483647, %v3548_v57  ;;  %v3594_v12 = vmul.f32 %v8734_v4, %v3548_v57 }
 0x730   :  { %v3600_v45 = vadd.f32 %v3592_v22, %v3572_v59  ;;  %v3574_v16 = vmul.f32 %v3565_v33, %v3556_v36 }
 0x732   :  { %3616 = vst [vmem:[#allocation23 + $0x28] sm:$0xff] %v3600_v45  ;;  %v3602_v11 = vadd.f32 %v3594_v12, %v3574_v16 }
 0x734   :  { %v3456_v31 = vpop.f32.mrf.mxu3  ;;  %3618 = vst [vmem:[#allocation23 + $0x38] sm:$0xff] %v3602_v11 }
 0x735   :  { %v3480_v27 = vadd.f32 %v8724_v23, %v3456_v31 }
 0x737   :  { %v3535_v44 = vmul.f32 0.05, %v3480_v27 }
 0x739   :  { %v3543_v40 = vadd.f32 %v4474_v42, %v3535_v44 }
 0x73b   :  { %v3551_v6 = vand.u32 2147483647, %v3543_v40  ;;  %v3589_v14 = vmul.f32 %v8730_v3, %v3543_v40 }
 0x73c   :  { %v3459_v51 = vpop.f32.mrf.mxu3 }
 0x73d   :  { %v3569_v43 = vmul.f32 %v8728_v20, %v3551_v6  ;;  %v3483_v53 = vadd.f32 %v8726_v9, %v3459_v51 }
 0x73f   :  { %v3597_v21 = vadd.f32 %v3589_v14, %v3569_v43  ;;  %v3539_v24 = vmul.f32 0.05, %v3483_v53 }
 0x741   :  { %3613 = vst [vmem:[#allocation23 + $0x10] sm:$0xff] %v3597_v21  ;;  %v3547_v58 = vadd.f32 %v4475_v30, %v3539_v24 }
 0x743   :  { %v3555_v60 = vand.u32 2147483647, %v3547_v58  ;;  %v3593_v26 = vmul.f32 %v8734_v4, %v3547_v58 }
 0x745   :  { %v3573_v23 = vmul.f32 %v3565_v33, %v3555_v60 }
 0x747   :  { %v3601_v20 = vadd.f32 %v3593_v26, %v3573_v23 }
 0x749   :  { %3617 = vst [vmem:[#allocation23 + $0x30] sm:$0xff] %v3601_v20 }
 0x74a   :  { %3706 = dma.vmem_to_hbm [thread:$0]  %s3699_s14, 1024, %s3701_s16, [#allocation11], %s4855_s21, %s4855_s21, %s4856_s22  }
 0x74b   :  { %4846 = dma.done.wait [#allocation11], 1024  }
 0x74c   :  { %4847 = vsyncadd [#allocation11], 4294966272 }
 0x74d   :  { %4848 = dma.done.wait [#allocation25], 1024  }
 0x74e   :  { %4849 = vsyncadd [#allocation25], 4294966272 }
 0x74f   :  { %4850 = dma.done.wait [#allocation28], 1536  }
 0x750   :  { %4851 = vsyncadd [#allocation28], 4294965760 }
 0x751   :  { %4852 = dma.done.wait [#allocation31], 2048  }
 0x752   :  { %4853 = vsyncadd [#allocation31], 4294965248 }
 0x753   :  { %3807 = vsyncpa [#allocation10], 1 }
 0x754   :  { %3808 = vsyncpa [#allocation13], 1 }
 0x755   :  { %3809 = vsyncpa [#allocation16], 1 }
 0x756   :  { %3810 = vsyncpa [#allocation19], 1 }
 0x757   :  { %3811 = vsyncpa [#allocation22], 1 }
 0x758   :  { %3812 = vsyncpa [#allocation11], 1 }
 0x759   :  { %3813 = vsyncpa [#allocation25], 1 }
 0x75a   :  { %3814 = vsyncpa [#allocation28], 1 }
 0x75b   :  { %3815 = vsyncpa [#allocation31], 1 }

</bundles_post_ra>
